<compile_context>
chip_gen: v7x
topology: tpu7x:2x2x1
jax: 0.10.0
libtpu: 0.0.40
codegen_flags: <defaults>
</compile_context>

<pallas_src>
import numpy as np
import jax
import jax.numpy as jnp
from jax import lax
from jax.experimental import pallas as pl
from jax.experimental.pallas import tpu as pltpu

# ----------------------------- model constants ------------------------------
HDIM = 96                      # hidden dim (net) -- logical
HPAD = 128                     # hidden dim padded to 128 lanes
CDIM = 64                      # context dim (inp) -- logical (padded to 128 lanes)
MOTION = 80                    # motion-encoder output width
CORR_LEVELS = 3
CORR_RADIUS = 3
CORR_PLANES = CORR_LEVELS * (2 * CORR_RADIUS + 1) ** 2   # 147
CP_PAD = 160                   # corr features padded to 160 (cols 147/148 carry fx/fy)
FDIM = 128                     # fnet output dim
PILLAR_IN = 8
PILLAR_OUT = 32
PATCH = 8                      # SmallEncoder downsamples by 8

_VMEM_LIMIT = 32 * 1024 * 1024


def _cparams(n_parallel):
    return pltpu.CompilerParams(
        dimension_semantics=("parallel",) * n_parallel,
        vmem_limit_bytes=_VMEM_LIMIT)


def _choose_tile(M, cap=512):
    # Largest sublane-friendly tile that still yields >=2 grid steps (keeps both v7x TCs busy).
    for t in (512, 256, 128, 64, 32, 16, 8):
        if t <= cap and M % t == 0 and M // t >= 2:
            return t
    return M                   # whole-array block (allowed: equals full dim)


def _choose_lane_tile(N, cap=1024):
    # Lane-dim tile must be a multiple of 128 or the full dim.
    for t in (1024, 512, 256, 128):
        if t <= cap and N % t == 0:
            return t
    return N


def _fixed_spec(shape):
    nd = len(shape)
    return pl.BlockSpec(shape, lambda *args, _nd=nd: (0,) * _nd)


# ------------------- generic fused linear: matmul + bias (+relu) ------------
def pallas_linear(x, w, b, activation=None, out_dtype=jnp.float32, tm_cap=512):
    M, K = x.shape
    N = w.shape[1]
    tm = _choose_tile(M, tm_cap)
    wdtype = w.dtype

    def kernel(x_ref, w_ref, b_ref, o_ref):
        xv = x_ref[...]
        if xv.dtype != wdtype:
            xv = xv.astype(wdtype)
        y = jnp.dot(xv, w_ref[...], preferred_element_type=jnp.float32) + b_ref[...]
        if activation == "relu":
            y = jax.nn.relu(y)
        o_ref[...] = y.astype(out_dtype)

    return pl.pallas_call(
        kernel,
        out_shape=jax.ShapeDtypeStruct((M, N), out_dtype),
        grid=(M // tm,),
        in_specs=[pl.BlockSpec((tm, K), lambda i: (i, 0)),
                  _fixed_spec((K, N)),
                  _fixed_spec((1, N))],
        out_specs=pl.BlockSpec((tm, N), lambda i: (i, 0)),
        compiler_params=_cparams(1),
    )(x, w, b)


# --------- fused fnet + cnet + context split (frame 1 only) ------------------
def pallas_encoder_context(x, w, b):
    # x: (M, KIN) bf16; w: (KIN, 384) bf16 = [fnet 128 | cnet_net 128 | cnet_inp 128]
    # -> fmap1 (M,128) bf16, net = tanh (M,128) f32, inp = relu (M,128) bf16.
    # Padded weight columns are zero, so padded net/inp lanes come out exactly 0.
    M, K = x.shape
    tm = _choose_tile(M)
    NTOT = FDIM + 2 * HPAD

    def kernel(x_ref, w_ref, b_ref, f_ref, n_ref, i_ref):
        y = jnp.dot(x_ref[...], w_ref[...],
                    preferred_element_type=jnp.float32) + b_ref[...]
        f_ref[...] = y[:, :FDIM].astype(jnp.bfloat16)
        n_ref[...] = jnp.tanh(y[:, FDIM:FDIM + HPAD])
        i_ref[...] = jax.nn.relu(y[:, FDIM + HPAD:]).astype(jnp.bfloat16)

    return pl.pallas_call(
        kernel,
        out_shape=(jax.ShapeDtypeStruct((M, FDIM), jnp.bfloat16),
                   jax.ShapeDtypeStruct((M, HPAD), jnp.float32),
                   jax.ShapeDtypeStruct((M, HPAD), jnp.bfloat16)),
        grid=(M // tm,),
        in_specs=[pl.BlockSpec((tm, K), lambda i: (i, 0)),
                  _fixed_spec((K, NTOT)),
                  _fixed_spec((1, NTOT))],
        out_specs=(pl.BlockSpec((tm, FDIM), lambda i: (i, 0)),
                   pl.BlockSpec((tm, HPAD), lambda i: (i, 0)),
                   pl.BlockSpec((tm, HPAD), lambda i: (i, 0))),
        compiler_params=_cparams(1),
    )(x, w, b)


# ------------------------- all-pairs correlation -----------------------------
def pallas_correlation(f1, f2, tq_cap=256, tn_cap=1024):
    # f1, f2: (B, HW, D) bf16 -> corr (B, HW, HW) f32 = (f1/sqrt(D)) @ f2^T
    # Tiled over both the query rows and the f2 (output-N) dimension so VMEM stays bounded.
    B, HW, D = f1.shape
    scale = 1.0 / float(np.sqrt(D))
    tq = _choose_tile(HW, tq_cap)
    tn = _choose_lane_tile(HW, tn_cap)

    def kernel(f1_ref, f2_ref, o_ref):
        a = (f1_ref[0].astype(jnp.float32) * scale).astype(jnp.bfloat16)
        b2 = f2_ref[0]
        o_ref[0] = lax.dot_general(a, b2, (((1,), (1,)), ((), ())),
                                   preferred_element_type=jnp.float32)

    return pl.pallas_call(
        kernel,
        out_shape=jax.ShapeDtypeStruct((B, HW, HW), jnp.float32),
        grid=(B, HW // tq, HW // tn),
        in_specs=[pl.BlockSpec((1, tq, D), lambda b, q, n: (b, q, 0)),
                  pl.BlockSpec((1, tn, D), lambda b, q, n: (b, n, 0))],
        out_specs=pl.BlockSpec((1, tq, tn), lambda b, q, n: (b, q, n)),
        compiler_params=_cparams(3),
    )(f1, f2)


# -------- fused update block: SmallMotionEncoder + ConvGRU + FlowHead --------
def pallas_update_block(net, inp, corr_flow, p):
    # net (M,128) f32, inp (M,128) bf16, corr_flow (M,160) bf16 = [corr147 | fx | fy | 0..]
    M = net.shape[0]
    tm = _choose_tile(M)

    acts = (net, inp, corr_flow)
    weights = (p["me_wc1"], p["me_bc1"], p["me_wf1"], p["me_bf1"],
               p["me_wf2"], p["me_bf2"], p["me_wcc"], p["me_wcf"], p["me_bco"],
               p["gru_wh_zr"], p["gru_wqh"], p["gru_wi_zrq"], p["gru_wm_zrq"],
               p["gru_wf_zrq"], p["gru_b_zrq"],
               p["fh_w1"], p["fh_b1"], p["fh_w2"], p["fh_b2"])

    def kernel(net_ref, inp_ref, cf_ref,
               wc1, bc1, wf1, bf1, wf2, bf2, wcc, wcf, bco,
               wh_zr, wqh, wi_zrq, wm_zrq, wf_zrq, b_zrq,
               fw1, fb1, fw2, fb2,
               net_out, delta_out):
        h = net_ref[...]                               # (tm, 128) f32 (lanes >=96 dead)
        hb = h.astype(jnp.bfloat16)
        xi = inp_ref[...]                              # (tm, 128) bf16 (lanes >=64 are 0)
        cf = cf_ref[...]                               # (tm, 160) bf16
        fx = cf[:, CORR_PLANES:CORR_PLANES + 1].astype(jnp.float32)       # (tm, 1)
        fy = cf[:, CORR_PLANES + 1:CORR_PLANES + 2].astype(jnp.float32)   # (tm, 1)

        # --- SmallMotionEncoder (TODO(synk): real 7x7/3x3 convs approximated as 1x1) ---
        # wc1 rows >= 147 are zero, so the flow/zero lanes of cf do not contaminate cor.
        cor = jax.nn.relu(
            jnp.dot(cf, wc1[...], preferred_element_type=jnp.float32) + bc1[...])     # (tm,96)
        # K=2 flow projection on the VPU (broadcast-sum), not the MXU
        flo = jax.nn.relu(fx * wf1[0:1, :] + fy * wf1[1:2, :] + bf1[...])             # (tm,64)
        flo = jax.nn.relu(
            jnp.dot(flo.astype(jnp.bfloat16), wf2[...],
                    preferred_element_type=jnp.float32) + bf2[...])                   # (tm,32)
        mot = jax.nn.relu(
            jnp.dot(cor.astype(jnp.bfloat16), wcc[...], preferred_element_type=jnp.float32)
            + jnp.dot(flo.astype(jnp.bfloat16), wcf[...], preferred_element_type=jnp.float32)
            + bco[...])                                                                # (tm,80)

        # --- ConvGRU: x = [inp | mot | flow]; gates [z|r|q] each padded to 128 lanes ---
        xc = (jnp.dot(xi, wi_zrq[...], preferred_element_type=jnp.float32)
              + jnp.dot(mot.astype(jnp.bfloat16), wm_zrq[...],
                        preferred_element_type=jnp.float32)
              + fx * wf_zrq[0:1, :] + fy * wf_zrq[1:2, :]
              + b_zrq[...])                                                            # (tm,384)
        hc = jnp.dot(hb, wh_zr[...], preferred_element_type=jnp.float32)               # (tm,256)
        z = jax.nn.sigmoid(hc[:, :HPAD] + xc[:, :HPAD])
        r = jax.nn.sigmoid(hc[:, HPAD:] + xc[:, HPAD:2 * HPAD])
        q = jnp.tanh(
            jnp.dot((r * h).astype(jnp.bfloat16), wqh[...],
                    preferred_element_type=jnp.float32) + xc[:, 2 * HPAD:])
        net_new = (1.0 - z) * h + z * q
        net_out[...] = net_new                                                         # dense 128

        # --- FlowHead (output padded to 128 lanes -> lane-dense store) ---
        fh = jax.nn.relu(
            jnp.dot(net_new.astype(jnp.bfloat16), fw1[...],
                    preferred_element_type=jnp.float32) + fb1[...])
        delta_out[...] = jnp.dot(fh.astype(jnp.bfloat16), fw2[...],
                                 preferred_element_type=jnp.float32) + fb2[...]

    in_specs = ([pl.BlockSpec((tm, a.shape[1]), lambda i: (i, 0)) for a in acts]
                + [_fixed_spec(w.shape) for w in weights])
    out_specs = (pl.BlockSpec((tm, HPAD), lambda i: (i, 0)),
                 pl.BlockSpec((tm, 128), lambda i: (i, 0)))

    net_new, delta_pad = pl.pallas_call(
        kernel,
        out_shape=(jax.ShapeDtypeStruct((M, HPAD), jnp.float32),
                   jax.ShapeDtypeStruct((M, 128), jnp.float32)),
        grid=(M // tm,),
        in_specs=in_specs,
        out_specs=out_specs,
        input_output_aliases={0: 0},        # update hidden state in place
        compiler_params=_cparams(1),
    )(*acts, *weights)
    return net_new, delta_pad[:, :2]


# ---------------- upflow8: separable bilinear upsample (two matmuls) ----------
def _interp_matrix_np(n_out, n_in):
    A = np.zeros((n_out, n_in), dtype=np.float64)
    if n_in == 1:
        A[:, 0] = 1.0
    else:
        src = np.arange(n_out) * (n_in - 1) / (n_out - 1)   # align_corners=True
        i0 = np.floor(src).astype(np.int64)
        i1 = np.minimum(i0 + 1, n_in - 1)
        frac = src - i0
        A[np.arange(n_out), i0] += 1.0 - frac
        A[np.arange(n_out), i1] += frac
    return A.astype(np.float32)


def upflow8_separable(flow_lr, B, h, w):
    # flow_lr: (B, 2, h, w) f32 -> (B, 2, 8h, 8w), 8 * bilinear upsample.
    Ho, Wo = PATCH * h, PATCH * w
    AwT = jnp.asarray(_interp_matrix_np(Wo, w).T, jnp.float32)          # (w, 8w)
    AhT = jnp.asarray((8.0 * _interp_matrix_np(Ho, h)).T, jnp.float32)  # (h, 8h), x8 folded
    bw = jnp.zeros((1, Wo), jnp.float32)
    bh = jnp.zeros((1, Ho), jnp.float32)

    x = flow_lr.reshape(B * 2 * h, w)
    y = pallas_linear(x, AwT, bw)                                       # (B*2*h, 8w)
    y = y.reshape(B * 2, h, Wo).transpose(0, 2, 1).reshape(B * 2 * Wo, h)
    z = pallas_linear(y, AhT, bh)                                       # (B*2*8w, 8h)
    return z.reshape(B, 2, Wo, Ho).transpose(0, 1, 3, 2)


# ------------------------------ plain-JAX glue --------------------------------
def coords_grid(batch, ht, wd):
    ys, xs = jnp.meshgrid(jnp.arange(ht, dtype=jnp.float32),
                          jnp.arange(wd, dtype=jnp.float32), indexing="ij")
    coords = jnp.stack([xs, ys], axis=0)             # (2, ht, wd): [x, y]
    return jnp.broadcast_to(coords[None], (batch, 2, ht, wd))


def bilinear_sample(img, x, y):
    # img: (N, hh, ww); x, y: (N, K) pixel coords; zero padding outside.
    N, hh, ww = img.shape
    x0 = jnp.floor(x)
    y0 = jnp.floor(y)
    x1 = x0 + 1.0
    y1 = y0 + 1.0
    wx1 = x - x0
    wx0 = 1.0 - wx1
    wy1 = y - y0
    wy0 = 1.0 - wy1
    flat = img.reshape(N, hh * ww)

    def gather(xi, yi):
        valid = (xi >= 0) & (xi <= ww - 1) & (yi >= 0) & (yi <= hh - 1)
        xc = jnp.clip(xi, 0, ww - 1).astype(jnp.int32)
        yc = jnp.clip(yi, 0, hh - 1).astype(jnp.int32)
        vals = jnp.take_along_axis(flat, yc * ww + xc, axis=1)
        return jnp.where(valid, vals, 0.0)

    return (wy0 * wx0 * gather(x0, y0) + wy0 * wx1 * gather(x1, y0)
            + wy1 * wx0 * gather(x0, y1) + wy1 * wx1 * gather(x1, y1))


def avg_pool2x2(x):
    N, hh, ww = x.shape
    return x.reshape(N, hh // 2, 2, ww // 2, 2).mean(axis=(2, 4))


def build_corr_pyramid(corr_volume, B, h, w, num_levels):
    lvl = corr_volume.reshape(B * h * w, h, w)
    pyr = [lvl]
    for _ in range(num_levels - 1):
        lvl = avg_pool2x2(lvl)
        pyr.append(lvl)
    return pyr


def corr_lookup(pyramid, coords, num_levels, radius):
    # TODO(synk): CorrBlock pyramid lookup is gather-bound (grid_sample); kept in JAX.
    B, _, h, w = coords.shape
    N = B * h * w
    cxy = coords.transpose(0, 2, 3, 1).reshape(N, 2)
    d = jnp.arange(-radius, radius + 1, dtype=jnp.float32)
    dy, dx = jnp.meshgrid(d, d, indexing="ij")
    dx = dx.reshape(-1)
    dy = dy.reshape(-1)
    outs = []
    for i in range(num_levels):
        cx = cxy[:, 0:1] / (2.0 ** i) + dx[None, :]
        cy = cxy[:, 1:2] / (2.0 ** i) + dy[None, :]
        outs.append(bilinear_sample(pyramid[i], cx, cy))
    return jnp.concatenate(outs, axis=-1)            # (N, CORR_PLANES)


def pillar_features(pc, H_in, W_in):
    B, Np, _ = pc.shape
    x, y, z, r = pc[..., 0], pc[..., 1], pc[..., 2], pc[..., 3]
    ix = jnp.clip(jnp.floor(x), 0, W_in - 1)
    iy = jnp.clip(jnp.floor(y), 0, H_in - 1)
    feat = jnp.stack([x, y, z, r, x - (ix + 0.5), y - (iy + 0.5),
                      x / W_in, y / H_in], axis=-1)
    flat_idx = (jnp.arange(B)[:, None] * (H_in * W_in)
                + iy.astype(jnp.int32) * W_in + ix.astype(jnp.int32))
    return feat.reshape(B * Np, PILLAR_IN).astype(jnp.float32), flat_idx.reshape(B * Np)


def pillar_encode(pc, params, H_in, W_in):
    # TODO(synk): real PillarLayer/PillarEncoder voxelize with max_num_points/max_voxels caps
    # and a PointNet; simplified to per-point MLP (Pallas) + scatter-max (JAX).
    B = pc.shape[0]
    feat, idx = pillar_features(pc, H_in, W_in)
    pf = pallas_linear(feat, params["pillar_w"], params["pillar_b"], activation="relu")
    bev = jnp.zeros((B * H_in * W_in, PILLAR_OUT), jnp.float32).at[idx].max(pf)
    return bev.reshape(B, H_in, W_in, PILLAR_OUT)


def patchify(bev):
    # TODO(synk): real SmallEncoder is a residual CNN with instance/batch norm; approximated
    # as a single 8x8/stride-8 patchify conv (im2col + MXU matmul). bf16 emitted here so the
    # big (M, 2048) activation read is half-width.
    B, H, W, C = bev.shape
    hh, ww = H // PATCH, W // PATCH
    x = bev.reshape(B, hh, PATCH, ww, PATCH, C).transpose(0, 1, 3, 2, 4, 5)
    return x.reshape(B * hh * ww, PATCH * PATCH * C).astype(jnp.bfloat16), (B, hh, ww)


# ------------------------------- parameters ----------------------------------
def init_params(key):
    KIN = PATCH * PATCH * PILLAR_OUT                  # 2048

    def w_init(k, shape, dtype=jnp.bfloat16):
        return (0.05 * jax.random.normal(k, shape, dtype=jnp.float32)).astype(dtype)

    keys = iter(jax.random.split(key, 32))
    p = {}
    p["pillar_w"] = w_init(next(keys), (PILLAR_IN, PILLAR_OUT))
    p["pillar_b"] = jnp.zeros((1, PILLAR_OUT), jnp.float32)

    # Fused fnet + cnet encoder weight: [fnet 128 | cnet_net 96->128 | cnet_inp 64->128].
    # Padded columns are zero so padded net/inp lanes come out exactly 0.
    fnet_w = w_init(next(keys), (KIN, FDIM))
    cnet_h = w_init(next(keys), (KIN, HDIM))
    cnet_c = w_init(next(keys), (KIN, CDIM))
    p["fnet_w"] = fnet_w
    p["fnet_b"] = jnp.zeros((1, FDIM), jnp.float32)
    p["enc_w"] = jnp.concatenate(
        [fnet_w,
         jnp.pad(cnet_h, ((0, 0), (0, HPAD - HDIM))),
         jnp.pad(cnet_c, ((0, 0), (0, HPAD - CDIM)))], axis=1)        # (KIN, 384)
    p["enc_b"] = jnp.zeros((1, FDIM + 2 * HPAD), jnp.float32)

    # SmallMotionEncoder (1x1 approximation). wc1 rows >= 147 zeroed so the fx/fy lanes
    # stashed in the padded corr slab never leak into the correlation projection.
    wc1 = w_init(next(keys), (CORR_PLANES, 96))
    p["me_wc1"] = jnp.pad(wc1, ((0, CP_PAD - CORR_PLANES), (0, 0)))
    p["me_bc1"] = jnp.zeros((1, 96), jnp.float32)
    p["me_wf1"] = w_init(next(keys), (2, 64), jnp.float32)            # VPU broadcast path
    p["me_bf1"] = jnp.zeros((1, 64), jnp.float32)
    p["me_wf2"] = w_init(next(keys), (64, 32))
    p["me_bf2"] = jnp.zeros((1, 32), jnp.float32)
    p["me_wcc"] = w_init(next(keys), (96, MOTION))
    p["me_wcf"] = w_init(next(keys), (32, MOTION))
    p["me_bco"] = jnp.zeros((1, MOTION), jnp.float32)

    # ConvGRU: gates fused [z|r|q] each padded to 128 lanes; x-weights split by source
    # [inp | motion80 | flow]. Weight ROWS above the logical widths are zeroed so the
    # garbage in padded hidden/inp lanes can never contaminate the real gate lanes.
    wh_zr = w_init(next(keys), (HDIM, 2 * HPAD))
    p["gru_wh_zr"] = jnp.pad(wh_zr, ((0, HPAD - HDIM), (0, 0)))       # h -> [z|r]
    wqh = w_init(next(keys), (HDIM, HPAD))
    p["gru_wqh"] = jnp.pad(wqh, ((0, HPAD - HDIM), (0, 0)))           # (r*h) -> q
    wi = w_init(next(keys), (CDIM, 3 * HPAD))
    p["gru_wi_zrq"] = jnp.pad(wi, ((0, HPAD - CDIM), (0, 0)))         # inp -> [z|r|q]
    p["gru_wm_zrq"] = w_init(next(keys), (MOTION, 3 * HPAD))          # motion(80) -> [z|r|q]
    p["gru_wf_zrq"] = w_init(next(keys), (2, 3 * HPAD), jnp.float32)  # flow -> [z|r|q] (VPU)
    p["gru_b_zrq"] = jnp.zeros((1, 3 * HPAD), jnp.float32)

    # FlowHead (input/output padded to 128 lanes for lane-dense matmuls + stores).
    fh1 = w_init(next(keys), (HDIM, 128))
    p["fh_w1"] = jnp.pad(fh1, ((0, HPAD - HDIM), (0, 0)))
    p["fh_b1"] = jnp.zeros((1, 128), jnp.float32)
    fh_w2 = w_init(next(keys), (128, 2), jnp.float32)
    p["fh_w2"] = jnp.pad(fh_w2, ((0, 0), (0, 126))).astype(jnp.bfloat16)
    p["fh_b2"] = jnp.zeros((1, 128), jnp.float32)
    return p


# --------------------------------- forward -----------------------------------
def _raft_forward(params, pc1, pc2, H_in, W_in, iters=6, flow_init=None):
    B = pc1.shape[0]
    pf1 = pillar_encode(pc1, params, H_in, W_in)
    pf2 = pillar_encode(pc2, params, H_in, W_in)

    x1, (_, h, w) = patchify(pf1)            # bf16 (M, 2048)
    x2, _ = patchify(pf2)

    # frame 1: fused fnet + cnet + tanh/relu context split (one read of the big activation)
    fmap1_flat, net, inp = pallas_encoder_context(x1, params["enc_w"], params["enc_b"])
    # frame 2: fnet only (bf16 output feeds correlation directly)
    fmap2_flat = pallas_linear(x2, params["fnet_w"], params["fnet_b"],
                               out_dtype=jnp.bfloat16)

    f1 = fmap1_flat.reshape(B, h * w, FDIM)
    f2 = fmap2_flat.reshape(B, h * w, FDIM)
    corr_volume = pallas_correlation(f1, f2)                      # (B, h*w, h*w) f32
    corr_pyramid = build_corr_pyramid(corr_volume, B, h, w, CORR_LEVELS)  # built once

    coords0 = coords_grid(B, h, w)
    coords1 = coords_grid(B, h, w)
    logits = jnp.zeros((B, 3, h, w), jnp.float32)                 # created (unused) as in ref
    if flow_init is not None:
        coords1 = coords1 + flow_init

    M = B * h * w
    moving_predicts = []
    for _ in range(iters):
        corr = corr_lookup(corr_pyramid, coords1, CORR_LEVELS, CORR_RADIUS)   # (M, 147) f32
        flow = coords1 - coords0
        flow_flat = flow.transpose(0, 2, 3, 1).reshape(M, 2)
        # bf16 corr slab padded to 160; fx/fy stashed into the spare lanes 147/148.
        corr_flow = jnp.concatenate(
            [corr.astype(jnp.bfloat16),
             flow_flat.astype(jnp.bfloat16),
             jnp.zeros((M, CP_PAD - CORR_PLANES - 2), jnp.bfloat16)], axis=1)

        net, delta_flat = pallas_update_block(net, inp, corr_flow, params)
        up_mask = None   # RAFT-small SmallUpdateBlock has no mask head
        # TODO(synk): mask-based convex upsample unreachable (up_mask always None here).

        delta = delta_flat.reshape(B, h, w, 2).transpose(0, 3, 1, 2)
        coords1 = coords1 + delta

    # upflow8 hoisted out of the loop: only the final flow_up is consumed.
    flow_up = upflow8_separable(coords1 - coords0, B, h, w)

    # NOTE: the reference forward returns `moving_predicts` (never appended to).
    return {"moving_predicts": moving_predicts, "flow_up": flow_up,
            "flow_lowres": coords1 - coords0, "logits": logits}


raft_forward = jax.jit(_raft_forward, static_argnames=("H_in", "W_in", "iters"))


# ----------------------------------- main -------------------------------------
def make_pointcloud(key, B, Np, H_in, W_in):
    kx, ky, kz, kr = jax.random.split(key, 4)
    x = jax.random.uniform(kx, (B, Np), minval=0.0, maxval=W_in - 1e-3)
    y = jax.random.uniform(ky, (B, Np), minval=0.0, maxval=H_in - 1e-3)
    z = jax.random.uniform(kz, (B, Np), minval=-1.0, maxval=1.0)
    r = jax.random.uniform(kr, (B, Np))
    return jnp.stack([x, y, z, r], axis=-1).astype(jnp.float32)


if __name__ == "__main__":
    B, NPTS = 2, 512
    H_INPUT = W_INPUT = 32                  # BEV grid; /8 -> 4x4 flow resolution

    key = jax.random.PRNGKey(0)
    k1, k2, kp = jax.random.split(key, 3)
    pc1 = make_pointcloud(k1, B, NPTS, H_INPUT, W_INPUT)
    pc2 = make_pointcloud(k2, B, NPTS, H_INPUT, W_INPUT)
    params = init_params(kp)

    out = raft_forward(params, pc1, pc2, H_in=H_INPUT, W_in=W_INPUT, iters=6)
    jax.block_until_ready(out["flow_up"])
    assert out["flow_up"].shape == (B, 2, H_INPUT, W_INPUT)
    assert out["moving_predicts"] == []     # matches reference forward's return value
    print("KERNEL_OK")
</pallas_src>

<mosaic_0001>
module attributes {stable_mosaic.version = 11 : i64} {
  func.func @kernel(%arg0: i32, %arg1: memref<512x8xf32, #tpu.memory_space<vmem>>, %arg2: memref<8x32xbf16, #tpu.memory_space<vmem>>, %arg3: memref<1x32xf32, #tpu.memory_space<vmem>>, %arg4: memref<512x32xf32, #tpu.memory_space<vmem>>) attributes {dimension_semantics = [#tpu.dimension_semantics<parallel>], iteration_bounds = array<i64: 2>, scalar_prefetch = 0 : i64, scratch_operands = 0 : i64, tpu.core_type = #tpu.core_type<tc>, window_params = [{transform_indices = @transform_0, window_bounds = array<i64: 512, 8>}, {pipeline_mode = #tpu.pipeline_mode<synchronous>, transform_indices = @transform_1, window_bounds = array<i64: 8, 32>}, {pipeline_mode = #tpu.pipeline_mode<synchronous>, transform_indices = @transform_2, window_bounds = array<i64: 1, 32>}, {transform_indices = @transform_3, window_bounds = array<i64: 512, 32>}]} {
    %c0 = arith.constant 0 : index
    %c0_0 = arith.constant 0 : index
    %0 = vector.load %arg1[%c0, %c0_0] : memref<512x8xf32, #tpu.memory_space<vmem>>, vector<512x8xf32>
    %1 = arith.truncf %0 : vector<512x8xf32> to vector<512x8xbf16>
    %c0_1 = arith.constant 0 : index
    %c0_2 = arith.constant 0 : index
    %2 = vector.load %arg2[%c0_1, %c0_2] : memref<8x32xbf16, #tpu.memory_space<vmem>>, vector<8x32xbf16>
    %cst = arith.constant dense<0.000000e+00> : vector<512x32xf32>
    %3 = tpu.matmul %1, %2, %cst {dimension_numbers = #tpu.dot_dimension_numbers<[1], [0], [0], [1], [0, 0, 1, 1], [], []>} : vector<512x8xbf16>, vector<8x32xbf16>, vector<512x32xf32> -> vector<512x32xf32>
    %c0_3 = arith.constant 0 : index
    %c0_4 = arith.constant 0 : index
    %4 = vector.load %arg3[%c0_3, %c0_4] : memref<1x32xf32, #tpu.memory_space<vmem>>, vector<1x32xf32>
    %5 = vector.broadcast %4 : vector<1x32xf32> to vector<512x32xf32>
    %6 = arith.addf %3, %5 : vector<512x32xf32>
    %cst_5 = arith.constant 0.000000e+00 : f32
    %7 = vector.broadcast %cst_5 : f32 to vector<512x32xf32>
    %8 = arith.maximumf %6, %7 : vector<512x32xf32>
    %c0_6 = arith.constant 0 : index
    %c0_7 = arith.constant 0 : index
    %9 = vector.load %arg4[%c0_6, %c0_7] : memref<512x32xf32, #tpu.memory_space<vmem>>, vector<512x32xf32>
    tpu.vector_store %arg4[%c0_6, %c0_7], %8 {strides = array<i32>} : memref<512x32xf32, #tpu.memory_space<vmem>>, vector<512x32xf32>,
    return
  }
  func.func @transform_0(%arg0: i32) -> (i32, i32) {
    %c0_i32 = arith.constant 0 : i32
    %c0_i32_0 = arith.constant 0 : i32
    return %arg0, %c0_i32 : i32, i32
  }
  func.func @transform_1(%arg0: i32) -> (i32, i32) {
    %c0_i32 = arith.constant 0 : i32
    %c0_i32_0 = arith.constant 0 : i32
    %c0_i32_1 = arith.constant 0 : i32
    return %c0_i32, %c0_i32_0 : i32, i32
  }
  func.func @transform_2(%arg0: i32) -> (i32, i32) {
    %c0_i32 = arith.constant 0 : i32
    %c0_i32_0 = arith.constant 0 : i32
    %c0_i32_1 = arith.constant 0 : i32
    return %c0_i32, %c0_i32_0 : i32, i32
  }
  func.func @transform_3(%arg0: i32) -> (i32, i32) {
    %c0_i32 = arith.constant 0 : i32
    %c0_i32_0 = arith.constant 0 : i32
    return %arg0, %c0_i32 : i32, i32
  }
}

module attributes {stable_mosaic.version = 11 : i64} {
  func.func @kernel(%arg0: i32, %arg1: memref<16x2048xbf16, #tpu.memory_space<vmem>>, %arg2: memref<2048x384xbf16, #tpu.memory_space<vmem>>, %arg3: memref<1x384xf32, #tpu.memory_space<vmem>>, %arg4: memref<16x128xbf16, #tpu.memory_space<vmem>>, %arg5: memref<16x128xf32, #tpu.memory_space<vmem>>, %arg6: memref<16x128xbf16, #tpu.memory_space<vmem>>) attributes {dimension_semantics = [#tpu.dimension_semantics<parallel>], iteration_bounds = array<i64: 2>, scalar_prefetch = 0 : i64, scratch_operands = 0 : i64, tpu.core_type = #tpu.core_type<tc>, window_params = [{transform_indices = @transform_0, window_bounds = array<i64: 16, 2048>}, {pipeline_mode = #tpu.pipeline_mode<synchronous>, transform_indices = @transform_1, window_bounds = array<i64: 2048, 384>}, {pipeline_mode = #tpu.pipeline_mode<synchronous>, transform_indices = @transform_2, window_bounds = array<i64: 1, 384>}, {transform_indices = @transform_3, window_bounds = array<i64: 16, 128>}, {transform_indices = @transform_4, window_bounds = array<i64: 16, 128>}, {transform_indices = @transform_5, window_bounds = array<i64: 16, 128>}]} {
    %c0 = arith.constant 0 : index
    %c0_0 = arith.constant 0 : index
    %0 = vector.load %arg1[%c0, %c0_0] : memref<16x2048xbf16, #tpu.memory_space<vmem>>, vector<16x2048xbf16>
    %c0_1 = arith.constant 0 : index
    %c0_2 = arith.constant 0 : index
    %1 = vector.load %arg2[%c0_1, %c0_2] : memref<2048x384xbf16, #tpu.memory_space<vmem>>, vector<2048x384xbf16>
    %cst = arith.constant dense<0.000000e+00> : vector<16x384xf32>
    %2 = tpu.matmul %0, %1, %cst {dimension_numbers = #tpu.dot_dimension_numbers<[1], [0], [0], [1], [0, 0, 1, 1], [], []>} : vector<16x2048xbf16>, vector<2048x384xbf16>, vector<16x384xf32> -> vector<16x384xf32>
    %c0_3 = arith.constant 0 : index
    %c0_4 = arith.constant 0 : index
    %3 = vector.load %arg3[%c0_3, %c0_4] : memref<1x384xf32, #tpu.memory_space<vmem>>, vector<1x384xf32>
    %4 = vector.broadcast %3 : vector<1x384xf32> to vector<16x384xf32>
    %5 = arith.addf %2, %4 : vector<16x384xf32>
    %6 = vector.extract_strided_slice %5 {offsets = [0, 0], sizes = [16, 128], strides = [1, 1]} : vector<16x384xf32> to vector<16x128xf32>
    %7 = arith.truncf %6 : vector<16x128xf32> to vector<16x128xbf16>
    %c0_5 = arith.constant 0 : index
    %c0_6 = arith.constant 0 : index
    %8 = vector.load %arg4[%c0_5, %c0_6] : memref<16x128xbf16, #tpu.memory_space<vmem>>, vector<16x128xbf16>
    tpu.vector_store %arg4[%c0_5, %c0_6], %7 {strides = array<i32>} : memref<16x128xbf16, #tpu.memory_space<vmem>>, vector<16x128xbf16>,
    %9 = vector.extract_strided_slice %5 {offsets = [0, 128], sizes = [16, 128], strides = [1, 1]} : vector<16x384xf32> to vector<16x128xf32>
    %10 = math.tanh %9 : vector<16x128xf32>
    %c0_7 = arith.constant 0 : index
    %c0_8 = arith.constant 0 : index
    %11 = vector.load %arg5[%c0_7, %c0_8] : memref<16x128xf32, #tpu.memory_space<vmem>>, vector<16x128xf32>
    tpu.vector_store %arg5[%c0_7, %c0_8], %10 {strides = array<i32>} : memref<16x128xf32, #tpu.memory_space<vmem>>, vector<16x128xf32>,
    %12 = vector.extract_strided_slice %5 {offsets = [0, 256], sizes = [16, 128], strides = [1, 1]} : vector<16x384xf32> to vector<16x128xf32>
    %cst_9 = arith.constant 0.000000e+00 : f32
    %13 = vector.broadcast %cst_9 : f32 to vector<16x128xf32>
    %14 = arith.maximumf %12, %13 : vector<16x128xf32>
    %15 = arith.truncf %14 : vector<16x128xf32> to vector<16x128xbf16>
    %c0_10 = arith.constant 0 : index
    %c0_11 = arith.constant 0 : index
    %16 = vector.load %arg6[%c0_10, %c0_11] : memref<16x128xbf16, #tpu.memory_space<vmem>>, vector<16x128xbf16>
    tpu.vector_store %arg6[%c0_10, %c0_11], %15 {strides = array<i32>} : memref<16x128xbf16, #tpu.memory_space<vmem>>, vector<16x128xbf16>,
    return
  }
  func.func @transform_0(%arg0: i32) -> (i32, i32) {
    %c0_i32 = arith.constant 0 : i32
    %c0_i32_0 = arith.constant 0 : i32
    return %arg0, %c0_i32 : i32, i32
  }
  func.func @transform_1(%arg0: i32) -> (i32, i32) {
    %c0_i32 = arith.constant 0 : i32
    %c0_i32_0 = arith.constant 0 : i32
    %c0_i32_1 = arith.constant 0 : i32
    return %c0_i32, %c0_i32_0 : i32, i32
  }
  func.func @transform_2(%arg0: i32) -> (i32, i32) {
    %c0_i32 = arith.constant 0 : i32
    %c0_i32_0 = arith.constant 0 : i32
    %c0_i32_1 = arith.constant 0 : i32
    return %c0_i32, %c0_i32_0 : i32, i32
  }
  func.func @transform_3(%arg0: i32) -> (i32, i32) {
    %c0_i32 = arith.constant 0 : i32
    %c0_i32_0 = arith.constant 0 : i32
    return %arg0, %c0_i32 : i32, i32
  }
  func.func @transform_4(%arg0: i32) -> (i32, i32) {
    %c0_i32 = arith.constant 0 : i32
    %c0_i32_0 = arith.constant 0 : i32
    return %arg0, %c0_i32 : i32, i32
  }
  func.func @transform_5(%arg0: i32) -> (i32, i32) {
    %c0_i32 = arith.constant 0 : i32
    %c0_i32_0 = arith.constant 0 : i32
    return %arg0, %c0_i32 : i32, i32
  }
}

module attributes {stable_mosaic.version = 11 : i64} {
  func.func @kernel(%arg0: i32, %arg1: memref<512x8xf32, #tpu.memory_space<vmem>>, %arg2: memref<8x32xbf16, #tpu.memory_space<vmem>>, %arg3: memref<1x32xf32, #tpu.memory_space<vmem>>, %arg4: memref<512x32xf32, #tpu.memory_space<vmem>>) attributes {dimension_semantics = [#tpu.dimension_semantics<parallel>], iteration_bounds = array<i64: 2>, scalar_prefetch = 0 : i64, scratch_operands = 0 : i64, tpu.core_type = #tpu.core_type<tc>, window_params = [{transform_indices = @transform_0, window_bounds = array<i64: 512, 8>}, {pipeline_mode = #tpu.pipeline_mode<synchronous>, transform_indices = @transform_1, window_bounds = array<i64: 8, 32>}, {pipeline_mode = #tpu.pipeline_mode<synchronous>, transform_indices = @transform_2, window_bounds = array<i64: 1, 32>}, {transform_indices = @transform_3, window_bounds = array<i64: 512, 32>}]} {
    %c0 = arith.constant 0 : index
    %c0_0 = arith.constant 0 : index
    %0 = vector.load %arg1[%c0, %c0_0] : memref<512x8xf32, #tpu.memory_space<vmem>>, vector<512x8xf32>
    %1 = arith.truncf %0 : vector<512x8xf32> to vector<512x8xbf16>
    %c0_1 = arith.constant 0 : index
    %c0_2 = arith.constant 0 : index
    %2 = vector.load %arg2[%c0_1, %c0_2] : memref<8x32xbf16, #tpu.memory_space<vmem>>, vector<8x32xbf16>
    %cst = arith.constant dense<0.000000e+00> : vector<512x32xf32>
    %3 = tpu.matmul %1, %2, %cst {dimension_numbers = #tpu.dot_dimension_numbers<[1], [0], [0], [1], [0, 0, 1, 1], [], []>} : vector<512x8xbf16>, vector<8x32xbf16>, vector<512x32xf32> -> vector<512x32xf32>
    %c0_3 = arith.constant 0 : index
    %c0_4 = arith.constant 0 : index
    %4 = vector.load %arg3[%c0_3, %c0_4] : memref<1x32xf32, #tpu.memory_space<vmem>>, vector<1x32xf32>
    %5 = vector.broadcast %4 : vector<1x32xf32> to vector<512x32xf32>
    %6 = arith.addf %3, %5 : vector<512x32xf32>
    %cst_5 = arith.constant 0.000000e+00 : f32
    %7 = vector.broadcast %cst_5 : f32 to vector<512x32xf32>
    %8 = arith.maximumf %6, %7 : vector<512x32xf32>
    %c0_6 = arith.constant 0 : index
    %c0_7 = arith.constant 0 : index
    %9 = vector.load %arg4[%c0_6, %c0_7] : memref<512x32xf32, #tpu.memory_space<vmem>>, vector<512x32xf32>
    tpu.vector_store %arg4[%c0_6, %c0_7], %8 {strides = array<i32>} : memref<512x32xf32, #tpu.memory_space<vmem>>, vector<512x32xf32>,
    return
  }
  func.func @transform_0(%arg0: i32) -> (i32, i32) {
    %c0_i32 = arith.constant 0 : i32
    %c0_i32_0 = arith.constant 0 : i32
    return %arg0, %c0_i32 : i32, i32
  }
  func.func @transform_1(%arg0: i32) -> (i32, i32) {
    %c0_i32 = arith.constant 0 : i32
    %c0_i32_0 = arith.constant 0 : i32
    %c0_i32_1 = arith.constant 0 : i32
    return %c0_i32, %c0_i32_0 : i32, i32
  }
  func.func @transform_2(%arg0: i32) -> (i32, i32) {
    %c0_i32 = arith.constant 0 : i32
    %c0_i32_0 = arith.constant 0 : i32
    %c0_i32_1 = arith.constant 0 : i32
    return %c0_i32, %c0_i32_0 : i32, i32
  }
  func.func @transform_3(%arg0: i32) -> (i32, i32) {
    %c0_i32 = arith.constant 0 : i32
    %c0_i32_0 = arith.constant 0 : i32
    return %arg0, %c0_i32 : i32, i32
  }
}

module attributes {stable_mosaic.version = 11 : i64} {
  func.func @kernel(%arg0: i32, %arg1: memref<16x2048xbf16, #tpu.memory_space<vmem>>, %arg2: memref<2048x128xbf16, #tpu.memory_space<vmem>>, %arg3: memref<1x128xf32, #tpu.memory_space<vmem>>, %arg4: memref<16x128xbf16, #tpu.memory_space<vmem>>) attributes {dimension_semantics = [#tpu.dimension_semantics<parallel>], iteration_bounds = array<i64: 2>, scalar_prefetch = 0 : i64, scratch_operands = 0 : i64, tpu.core_type = #tpu.core_type<tc>, window_params = [{transform_indices = @transform_0, window_bounds = array<i64: 16, 2048>}, {pipeline_mode = #tpu.pipeline_mode<synchronous>, transform_indices = @transform_1, window_bounds = array<i64: 2048, 128>}, {pipeline_mode = #tpu.pipeline_mode<synchronous>, transform_indices = @transform_2, window_bounds = array<i64: 1, 128>}, {transform_indices = @transform_3, window_bounds = array<i64: 16, 128>}]} {
    %c0 = arith.constant 0 : index
    %c0_0 = arith.constant 0 : index
    %0 = vector.load %arg1[%c0, %c0_0] : memref<16x2048xbf16, #tpu.memory_space<vmem>>, vector<16x2048xbf16>
    %c0_1 = arith.constant 0 : index
    %c0_2 = arith.constant 0 : index
    %1 = vector.load %arg2[%c0_1, %c0_2] : memref<2048x128xbf16, #tpu.memory_space<vmem>>, vector<2048x128xbf16>
    %cst = arith.constant dense<0.000000e+00> : vector<16x128xf32>
    %2 = tpu.matmul %0, %1, %cst {dimension_numbers = #tpu.dot_dimension_numbers<[1], [0], [0], [1], [0, 0, 1, 1], [], []>} : vector<16x2048xbf16>, vector<2048x128xbf16>, vector<16x128xf32> -> vector<16x128xf32>
    %c0_3 = arith.constant 0 : index
    %c0_4 = arith.constant 0 : index
    %3 = vector.load %arg3[%c0_3, %c0_4] : memref<1x128xf32, #tpu.memory_space<vmem>>, vector<1x128xf32>
    %4 = vector.broadcast %3 : vector<1x128xf32> to vector<16x128xf32>
    %5 = arith.addf %2, %4 : vector<16x128xf32>
    %6 = arith.truncf %5 : vector<16x128xf32> to vector<16x128xbf16>
    %c0_5 = arith.constant 0 : index
    %c0_6 = arith.constant 0 : index
    %7 = vector.load %arg4[%c0_5, %c0_6] : memref<16x128xbf16, #tpu.memory_space<vmem>>, vector<16x128xbf16>
    tpu.vector_store %arg4[%c0_5, %c0_6], %6 {strides = array<i32>} : memref<16x128xbf16, #tpu.memory_space<vmem>>, vector<16x128xbf16>,
    return
  }
  func.func @transform_0(%arg0: i32) -> (i32, i32) {
    %c0_i32 = arith.constant 0 : i32
    %c0_i32_0 = arith.constant 0 : i32
    return %arg0, %c0_i32 : i32, i32
  }
  func.func @transform_1(%arg0: i32) -> (i32, i32) {
    %c0_i32 = arith.constant 0 : i32
    %c0_i32_0 = arith.constant 0 : i32
    %c0_i32_1 = arith.constant 0 : i32
    return %c0_i32, %c0_i32_0 : i32, i32
  }
  func.func @transform_2(%arg0: i32) -> (i32, i32) {
    %c0_i32 = arith.constant 0 : i32
    %c0_i32_0 = arith.constant 0 : i32
    %c0_i32_1 = arith.constant 0 : i32
    return %c0_i32, %c0_i32_0 : i32, i32
  }
  func.func @transform_3(%arg0: i32) -> (i32, i32) {
    %c0_i32 = arith.constant 0 : i32
    %c0_i32_0 = arith.constant 0 : i32
    return %arg0, %c0_i32 : i32, i32
  }
}

module attributes {stable_mosaic.version = 11 : i64} {
  func.func @kernel(%arg0: i32, %arg1: i32, %arg2: i32, %arg3: memref<1x8x128xbf16, #tpu.memory_space<vmem>>, %arg4: memref<1x16x128xbf16, #tpu.memory_space<vmem>>, %arg5: memref<1x8x16xf32, #tpu.memory_space<vmem>>) attributes {dimension_semantics = [#tpu.dimension_semantics<parallel>, #tpu.dimension_semantics<parallel>, #tpu.dimension_semantics<parallel>], iteration_bounds = array<i64: 2, 2, 1>, scalar_prefetch = 0 : i64, scratch_operands = 0 : i64, tpu.core_type = #tpu.core_type<tc>, window_params = [{transform_indices = @transform_0, window_bounds = array<i64: 1, 8, 128>}, {transform_indices = @transform_1, window_bounds = array<i64: 1, 16, 128>}, {transform_indices = @transform_2, window_bounds = array<i64: 1, 8, 16>}]} {
    %c0 = arith.constant 0 : index
    %c0_0 = arith.constant 0 : index
    %c0_1 = arith.constant 0 : index
    %0 = vector.load %arg3[%c0, %c0_0, %c0_1] : memref<1x8x128xbf16, #tpu.memory_space<vmem>>, vector<1x8x128xbf16>
    %1 = vector.shape_cast %0 : vector<1x8x128xbf16> to vector<8x128xbf16>
    %2 = arith.extf %1 : vector<8x128xbf16> to vector<8x128xf32>
    %cst = arith.constant 0.0883883461 : f32
    %3 = vector.broadcast %cst : f32 to vector<8x128xf32>
    %4 = arith.mulf %2, %3 : vector<8x128xf32>
    %5 = arith.truncf %4 : vector<8x128xf32> to vector<8x128xbf16>
    %c0_2 = arith.constant 0 : index
    %c0_3 = arith.constant 0 : index
    %c0_4 = arith.constant 0 : index
    %6 = vector.load %arg4[%c0_2, %c0_3, %c0_4] : memref<1x16x128xbf16, #tpu.memory_space<vmem>>, vector<1x16x128xbf16>
    %7 = vector.shape_cast %6 : vector<1x16x128xbf16> to vector<16x128xbf16>
    %cst_5 = arith.constant dense<0.000000e+00> : vector<8x16xf32>
    %8 = tpu.matmul %5, %7, %cst_5 {dimension_numbers = #tpu.dot_dimension_numbers<[1], [1], [0], [0], [0, 0, 1, 0], [], []>} : vector<8x128xbf16>, vector<16x128xbf16>, vector<8x16xf32> -> vector<8x16xf32>
    %c0_6 = arith.constant 0 : index
    %c0_7 = arith.constant 0 : index
    %c0_8 = arith.constant 0 : index
    %9 = vector.load %arg5[%c0_6, %c0_7, %c0_8] : memref<1x8x16xf32, #tpu.memory_space<vmem>>, vector<1x8x16xf32>
    %10 = vector.shape_cast %9 : vector<1x8x16xf32> to vector<8x16xf32>
    %11 = vector.shape_cast %8 : vector<8x16xf32> to vector<1x8x16xf32>
    tpu.vector_store %arg5[%c0_6, %c0_7, %c0_8], %11 {strides = array<i32>} : memref<1x8x16xf32, #tpu.memory_space<vmem>>, vector<1x8x16xf32>,
    return
  }
  func.func @transform_0(%arg0: i32, %arg1: i32, %arg2: i32) -> (i32, i32, i32) {
    %c0_i32 = arith.constant 0 : i32
    %c0_i32_0 = arith.constant 0 : i32
    return %arg0, %arg1, %c0_i32 : i32, i32, i32
  }
  func.func @transform_1(%arg0: i32, %arg1: i32, %arg2: i32) -> (i32, i32, i32) {
    %c0_i32 = arith.constant 0 : i32
    %c0_i32_0 = arith.constant 0 : i32
    return %arg0, %arg2, %c0_i32 : i32, i32, i32
  }
  func.func @transform_2(%arg0: i32, %arg1: i32, %arg2: i32) -> (i32, i32, i32) {
    %c0_i32 = arith.constant 0 : i32
    return %arg0, %arg1, %arg2 : i32, i32, i32
  }
}

module attributes {stable_mosaic.version = 11 : i64} {
  func.func @kernel(%arg0: i32, %arg1: memref<16x128xf32, #tpu.memory_space<vmem>>, %arg2: memref<16x128xbf16, #tpu.memory_space<vmem>>, %arg3: memref<16x160xbf16, #tpu.memory_space<vmem>>, %arg4: memref<160x96xbf16, #tpu.memory_space<vmem>>, %arg5: memref<1x96xf32, #tpu.memory_space<vmem>>, %arg6: memref<2x64xf32, #tpu.memory_space<vmem>>, %arg7: memref<1x64xf32, #tpu.memory_space<vmem>>, %arg8: memref<64x32xbf16, #tpu.memory_space<vmem>>, %arg9: memref<1x32xf32, #tpu.memory_space<vmem>>, %arg10: memref<96x80xbf16, #tpu.memory_space<vmem>>, %arg11: memref<32x80xbf16, #tpu.memory_space<vmem>>, %arg12: memref<1x80xf32, #tpu.memory_space<vmem>>, %arg13: memref<128x256xbf16, #tpu.memory_space<vmem>>, %arg14: memref<128x128xbf16, #tpu.memory_space<vmem>>, %arg15: memref<128x384xbf16, #tpu.memory_space<vmem>>, %arg16: memref<80x384xbf16, #tpu.memory_space<vmem>>, %arg17: memref<2x384xf32, #tpu.memory_space<vmem>>, %arg18: memref<1x384xf32, #tpu.memory_space<vmem>>, %arg19: memref<128x128xbf16, #tpu.memory_space<vmem>>, %arg20: memref<1x128xf32, #tpu.memory_space<vmem>>, %arg21: memref<128x128xbf16, #tpu.memory_space<vmem>>, %arg22: memref<1x128xf32, #tpu.memory_space<vmem>>, %arg23: memref<16x128xf32, #tpu.memory_space<vmem>>, %arg24: memref<16x128xf32, #tpu.memory_space<vmem>>) attributes {dimension_semantics = [#tpu.dimension_semantics<parallel>], iteration_bounds = array<i64: 2>, scalar_prefetch = 0 : i64, scratch_operands = 0 : i64, tpu.core_type = #tpu.core_type<tc>, window_params = [{transform_indices = @transform_0, window_bounds = array<i64: 16, 128>}, {transform_indices = @transform_1, window_bounds = array<i64: 16, 128>}, {transform_indices = @transform_2, window_bounds = array<i64: 16, 160>}, {pipeline_mode = #tpu.pipeline_mode<synchronous>, transform_indices = @transform_3, window_bounds = array<i64: 160, 96>}, {pipeline_mode = #tpu.pipeline_mode<synchronous>, transform_indices = @transform_4, window_bounds = array<i64: 1, 96>}, {pipeline_mode = #tpu.pipeline_mode<synchronous>, transform_indices = @transform_5, window_bounds = array<i64: 2, 64>}, {pipeline_mode = #tpu.pipeline_mode<synchronous>, transform_indices = @transform_6, window_bounds = array<i64: 1, 64>}, {pipeline_mode = #tpu.pipeline_mode<synchronous>, transform_indices = @transform_7, window_bounds = array<i64: 64, 32>}, {pipeline_mode = #tpu.pipeline_mode<synchronous>, transform_indices = @transform_8, window_bounds = array<i64: 1, 32>}, {pipeline_mode = #tpu.pipeline_mode<synchronous>, transform_indices = @transform_9, window_bounds = array<i64: 96, 80>}, {pipeline_mode = #tpu.pipeline_mode<synchronous>, transform_indices = @transform_10, window_bounds = array<i64: 32, 80>}, {pipeline_mode = #tpu.pipeline_mode<synchronous>, transform_indices = @transform_11, window_bounds = array<i64: 1, 80>}, {pipeline_mode = #tpu.pipeline_mode<synchronous>, transform_indices = @transform_12, window_bounds = array<i64: 128, 256>}, {pipeline_mode = #tpu.pipeline_mode<synchronous>, transform_indices = @transform_13, window_bounds = array<i64: 128, 128>}, {pipeline_mode = #tpu.pipeline_mode<synchronous>, transform_indices = @transform_14, window_bounds = array<i64: 128, 384>}, {pipeline_mode = #tpu.pipeline_mode<synchronous>, transform_indices = @transform_15, window_bounds = array<i64: 80, 384>}, {pipeline_mode = #tpu.pipeline_mode<synchronous>, transform_indices = @transform_16, window_bounds = array<i64: 2, 384>}, {pipeline_mode = #tpu.pipeline_mode<synchronous>, transform_indices = @transform_17, window_bounds = array<i64: 1, 384>}, {pipeline_mode = #tpu.pipeline_mode<synchronous>, transform_indices = @transform_18, window_bounds = array<i64: 128, 128>}, {pipeline_mode = #tpu.pipeline_mode<synchronous>, transform_indices = @transform_19, window_bounds = array<i64: 1, 128>}, {pipeline_mode = #tpu.pipeline_mode<synchronous>, transform_indices = @transform_20, window_bounds = array<i64: 128, 128>}, {pipeline_mode = #tpu.pipeline_mode<synchronous>, transform_indices = @transform_21, window_bounds = array<i64: 1, 128>}, {transform_indices = @transform_22, window_bounds = array<i64: 16, 128>}, {transform_indices = @transform_23, window_bounds = array<i64: 16, 128>}]} {
    %c0 = arith.constant 0 : index
    %c0_0 = arith.constant 0 : index
    %0 = vector.load %arg1[%c0, %c0_0] : memref<16x128xf32, #tpu.memory_space<vmem>>, vector<16x128xf32>
    %1 = arith.truncf %0 : vector<16x128xf32> to vector<16x128xbf16>
    %c0_1 = arith.constant 0 : index
    %c0_2 = arith.constant 0 : index
    %2 = vector.load %arg2[%c0_1, %c0_2] : memref<16x128xbf16, #tpu.memory_space<vmem>>, vector<16x128xbf16>
    %c0_3 = arith.constant 0 : index
    %c0_4 = arith.constant 0 : index
    %3 = vector.load %arg3[%c0_3, %c0_4] : memref<16x160xbf16, #tpu.memory_space<vmem>>, vector<16x160xbf16>
    %4 = vector.extract_strided_slice %3 {offsets = [0, 147], sizes = [16, 1], strides = [1, 1]} : vector<16x160xbf16> to vector<16x1xbf16>
    %5 = arith.extf %4 : vector<16x1xbf16> to vector<16x1xf32>
    %6 = vector.extract_strided_slice %3 {offsets = [0, 148], sizes = [16, 1], strides = [1, 1]} : vector<16x160xbf16> to vector<16x1xbf16>
    %7 = arith.extf %6 : vector<16x1xbf16> to vector<16x1xf32>
    %c0_5 = arith.constant 0 : index
    %c0_6 = arith.constant 0 : index
    %8 = vector.load %arg4[%c0_5, %c0_6] : memref<160x96xbf16, #tpu.memory_space<vmem>>, vector<160x96xbf16>
    %cst = arith.constant dense<0.000000e+00> : vector<16x96xf32>
    %9 = tpu.matmul %3, %8, %cst {dimension_numbers = #tpu.dot_dimension_numbers<[1], [0], [0], [1], [0, 0, 1, 1], [], []>} : vector<16x160xbf16>, vector<160x96xbf16>, vector<16x96xf32> -> vector<16x96xf32>
    %c0_7 = arith.constant 0 : index
    %c0_8 = arith.constant 0 : index
    %10 = vector.load %arg5[%c0_7, %c0_8] : memref<1x96xf32, #tpu.memory_space<vmem>>, vector<1x96xf32>
    %11 = vector.broadcast %10 : vector<1x96xf32> to vector<16x96xf32>
    %12 = arith.addf %9, %11 : vector<16x96xf32>
    %cst_9 = arith.constant 0.000000e+00 : f32
    %13 = vector.broadcast %cst_9 : f32 to vector<16x96xf32>
    %14 = arith.maximumf %12, %13 : vector<16x96xf32>
    %c0_10 = arith.constant 0 : index
    %c0_11 = arith.constant 0 : index
    %15 = vector.load %arg6[%c0_10, %c0_11] : memref<2x64xf32, #tpu.memory_space<vmem>>, vector<1x64xf32>
    %16 = vector.broadcast %5 : vector<16x1xf32> to vector<16x64xf32>
    %17 = vector.broadcast %15 : vector<1x64xf32> to vector<16x64xf32>
    %18 = arith.mulf %16, %17 : vector<16x64xf32>
    %c1 = arith.constant 1 : index
    %c0_12 = arith.constant 0 : index
    %19 = vector.load %arg6[%c1, %c0_12] : memref<2x64xf32, #tpu.memory_space<vmem>>, vector<1x64xf32>
    %20 = vector.broadcast %7 : vector<16x1xf32> to vector<16x64xf32>
    %21 = vector.broadcast %19 : vector<1x64xf32> to vector<16x64xf32>
    %22 = arith.mulf %20, %21 : vector<16x64xf32>
    %23 = arith.addf %18, %22 : vector<16x64xf32>
    %c0_13 = arith.constant 0 : index
    %c0_14 = arith.constant 0 : index
    %24 = vector.load %arg7[%c0_13, %c0_14] : memref<1x64xf32, #tpu.memory_space<vmem>>, vector<1x64xf32>
    %25 = vector.broadcast %24 : vector<1x64xf32> to vector<16x64xf32>
    %26 = arith.addf %23, %25 : vector<16x64xf32>
    %cst_15 = arith.constant 0.000000e+00 : f32
    %27 = vector.broadcast %cst_15 : f32 to vector<16x64xf32>
    %28 = arith.maximumf %26, %27 : vector<16x64xf32>
    %29 = arith.truncf %28 : vector<16x64xf32> to vector<16x64xbf16>
    %c0_16 = arith.constant 0 : index
    %c0_17 = arith.constant 0 : index
    %30 = vector.load %arg8[%c0_16, %c0_17] : memref<64x32xbf16, #tpu.memory_space<vmem>>, vector<64x32xbf16>
    %cst_18 = arith.constant dense<0.000000e+00> : vector<16x32xf32>
    %31 = tpu.matmul %29, %30, %cst_18 {dimension_numbers = #tpu.dot_dimension_numbers<[1], [0], [0], [1], [0, 0, 1, 1], [], []>} : vector<16x64xbf16>, vector<64x32xbf16>, vector<16x32xf32> -> vector<16x32xf32>
    %c0_19 = arith.constant 0 : index
    %c0_20 = arith.constant 0 : index
    %32 = vector.load %arg9[%c0_19, %c0_20] : memref<1x32xf32, #tpu.memory_space<vmem>>, vector<1x32xf32>
    %33 = vector.broadcast %32 : vector<1x32xf32> to vector<16x32xf32>
    %34 = arith.addf %31, %33 : vector<16x32xf32>
    %cst_21 = arith.constant 0.000000e+00 : f32
    %35 = vector.broadcast %cst_21 : f32 to vector<16x32xf32>
    %36 = arith.maximumf %34, %35 : vector<16x32xf32>
    %37 = arith.truncf %14 : vector<16x96xf32> to vector<16x96xbf16>
    %c0_22 = arith.constant 0 : index
    %c0_23 = arith.constant 0 : index
    %38 = vector.load %arg10[%c0_22, %c0_23] : memref<96x80xbf16, #tpu.memory_space<vmem>>, vector<96x80xbf16>
    %cst_24 = arith.constant dense<0.000000e+00> : vector<16x80xf32>
    %39 = tpu.matmul %37, %38, %cst_24 {dimension_numbers = #tpu.dot_dimension_numbers<[1], [0], [0], [1], [0, 0, 1, 1], [], []>} : vector<16x96xbf16>, vector<96x80xbf16>, vector<16x80xf32> -> vector<16x80xf32>
    %40 = arith.truncf %36 : vector<16x32xf32> to vector<16x32xbf16>
    %c0_25 = arith.constant 0 : index
    %c0_26 = arith.constant 0 : index
    %41 = vector.load %arg11[%c0_25, %c0_26] : memref<32x80xbf16, #tpu.memory_space<vmem>>, vector<32x80xbf16>
    %cst_27 = arith.constant dense<0.000000e+00> : vector<16x80xf32>
    %42 = tpu.matmul %40, %41, %cst_27 {dimension_numbers = #tpu.dot_dimension_numbers<[1], [0], [0], [1], [0, 0, 1, 1], [], []>} : vector<16x32xbf16>, vector<32x80xbf16>, vector<16x80xf32> -> vector<16x80xf32>
    %43 = arith.addf %39, %42 : vector<16x80xf32>
    %c0_28 = arith.constant 0 : index
    %c0_29 = arith.constant 0 : index
    %44 = vector.load %arg12[%c0_28, %c0_29] : memref<1x80xf32, #tpu.memory_space<vmem>>, vector<1x80xf32>
    %45 = vector.broadcast %44 : vector<1x80xf32> to vector<16x80xf32>
    %46 = arith.addf %43, %45 : vector<16x80xf32>
    %cst_30 = arith.constant 0.000000e+00 : f32
    %47 = vector.broadcast %cst_30 : f32 to vector<16x80xf32>
    %48 = arith.maximumf %46, %47 : vector<16x80xf32>
    %c0_31 = arith.constant 0 : index
    %c0_32 = arith.constant 0 : index
    %49 = vector.load %arg15[%c0_31, %c0_32] : memref<128x384xbf16, #tpu.memory_space<vmem>>, vector<128x384xbf16>
    %cst_33 = arith.constant dense<0.000000e+00> : vector<16x384xf32>
    %50 = tpu.matmul %2, %49, %cst_33 {dimension_numbers = #tpu.dot_dimension_numbers<[1], [0], [0], [1], [0, 0, 1, 1], [], []>} : vector<16x128xbf16>, vector<128x384xbf16>, vector<16x384xf32> -> vector<16x384xf32>
    %51 = arith.truncf %48 : vector<16x80xf32> to vector<16x80xbf16>
    %c0_34 = arith.constant 0 : index
    %c0_35 = arith.constant 0 : index
    %52 = vector.load %arg16[%c0_34, %c0_35] : memref<80x384xbf16, #tpu.memory_space<vmem>>, vector<80x384xbf16>
    %cst_36 = arith.constant dense<0.000000e+00> : vector<16x384xf32>
    %53 = tpu.matmul %51, %52, %cst_36 {dimension_numbers = #tpu.dot_dimension_numbers<[1], [0], [0], [1], [0, 0, 1, 1], [], []>} : vector<16x80xbf16>, vector<80x384xbf16>, vector<16x384xf32> -> vector<16x384xf32>
    %54 = arith.addf %50, %53 : vector<16x384xf32>
    %c0_37 = arith.constant 0 : index
    %c0_38 = arith.constant 0 : index
    %55 = vector.load %arg17[%c0_37, %c0_38] : memref<2x384xf32, #tpu.memory_space<vmem>>, vector<1x384xf32>
    %56 = vector.broadcast %5 : vector<16x1xf32> to vector<16x384xf32>
    %57 = vector.broadcast %55 : vector<1x384xf32> to vector<16x384xf32>
    %58 = arith.mulf %56, %57 : vector<16x384xf32>
    %59 = arith.addf %54, %58 : vector<16x384xf32>
    %c1_39 = arith.constant 1 : index
    %c0_40 = arith.constant 0 : index
    %60 = vector.load %arg17[%c1_39, %c0_40] : memref<2x384xf32, #tpu.memory_space<vmem>>, vector<1x384xf32>
    %61 = vector.broadcast %7 : vector<16x1xf32> to vector<16x384xf32>
    %62 = vector.broadcast %60 : vector<1x384xf32> to vector<16x384xf32>
    %63 = arith.mulf %61, %62 : vector<16x384xf32>
    %64 = arith.addf %59, %63 : vector<16x384xf32>
    %c0_41 = arith.constant 0 : index
    %c0_42 = arith.constant 0 : index
    %65 = vector.load %arg18[%c0_41, %c0_42] : memref<1x384xf32, #tpu.memory_space<vmem>>, vector<1x384xf32>
    %66 = vector.broadcast %65 : vector<1x384xf32> to vector<16x384xf32>
    %67 = arith.addf %64, %66 : vector<16x384xf32>
    %c0_43 = arith.constant 0 : index
    %c0_44 = arith.constant 0 : index
    %68 = vector.load %arg13[%c0_43, %c0_44] : memref<128x256xbf16, #tpu.memory_space<vmem>>, vector<128x256xbf16>
    %cst_45 = arith.constant dense<0.000000e+00> : vector<16x256xf32>
    %69 = tpu.matmul %1, %68, %cst_45 {dimension_numbers = #tpu.dot_dimension_numbers<[1], [0], [0], [1], [0, 0, 1, 1], [], []>} : vector<16x128xbf16>, vector<128x256xbf16>, vector<16x256xf32> -> vector<16x256xf32>
    %70 = vector.extract_strided_slice %69 {offsets = [0, 0], sizes = [16, 128], strides = [1, 1]} : vector<16x256xf32> to vector<16x128xf32>
    %71 = vector.extract_strided_slice %67 {offsets = [0, 0], sizes = [16, 128], strides = [1, 1]} : vector<16x384xf32> to vector<16x128xf32>
    %72 = arith.addf %70, %71 : vector<16x128xf32>
    %73 = arith.negf %72 : vector<16x128xf32>
    %74 = math.exp %73 : vector<16x128xf32>
    %cst_46 = arith.constant 1.000000e+00 : f32
    %75 = vector.broadcast %cst_46 : f32 to vector<16x128xf32>
    %76 = arith.addf %75, %74 : vector<16x128xf32>
    %77 = arith.divf %75, %76 : vector<16x128xf32>
    %78 = vector.extract_strided_slice %69 {offsets = [0, 128], sizes = [16, 128], strides = [1, 1]} : vector<16x256xf32> to vector<16x128xf32>
    %79 = vector.extract_strided_slice %67 {offsets = [0, 128], sizes = [16, 128], strides = [1, 1]} : vector<16x384xf32> to vector<16x128xf32>
    %80 = arith.addf %78, %79 : vector<16x128xf32>
    %81 = arith.negf %80 : vector<16x128xf32>
    %82 = math.exp %81 : vector<16x128xf32>
    %cst_47 = arith.constant 1.000000e+00 : f32
    %83 = vector.broadcast %cst_47 : f32 to vector<16x128xf32>
    %84 = arith.addf %83, %82 : vector<16x128xf32>
    %85 = arith.divf %83, %84 : vector<16x128xf32>
    %86 = arith.mulf %85, %0 : vector<16x128xf32>
    %87 = arith.truncf %86 : vector<16x128xf32> to vector<16x128xbf16>
    %c0_48 = arith.constant 0 : index
    %c0_49 = arith.constant 0 : index
    %88 = vector.load %arg14[%c0_48, %c0_49] : memref<128x128xbf16, #tpu.memory_space<vmem>>, vector<128x128xbf16>
    %cst_50 = arith.constant dense<0.000000e+00> : vector<16x128xf32>
    %89 = tpu.matmul %87, %88, %cst_50 {dimension_numbers = #tpu.dot_dimension_numbers<[1], [0], [0], [1], [0, 0, 1, 1], [], []>} : vector<16x128xbf16>, vector<128x128xbf16>, vector<16x128xf32> -> vector<16x128xf32>
    %90 = vector.extract_strided_slice %67 {offsets = [0, 256], sizes = [16, 128], strides = [1, 1]} : vector<16x384xf32> to vector<16x128xf32>
    %91 = arith.addf %89, %90 : vector<16x128xf32>
    %92 = math.tanh %91 : vector<16x128xf32>
    %cst_51 = arith.constant 1.000000e+00 : f32
    %93 = vector.broadcast %cst_51 : f32 to vector<16x128xf32>
    %94 = arith.subf %93, %77 : vector<16x128xf32>
    %95 = arith.mulf %94, %0 : vector<16x128xf32>
    %96 = arith.mulf %77, %92 : vector<16x128xf32>
    %97 = arith.addf %95, %96 : vector<16x128xf32>
    %c0_52 = arith.constant 0 : index
    %c0_53 = arith.constant 0 : index
    %98 = vector.load %arg23[%c0_52, %c0_53] : memref<16x128xf32, #tpu.memory_space<vmem>>, vector<16x128xf32>
    tpu.vector_store %arg23[%c0_52, %c0_53], %97 {strides = array<i32>} : memref<16x128xf32, #tpu.memory_space<vmem>>, vector<16x128xf32>,
    %99 = arith.truncf %97 : vector<16x128xf32> to vector<16x128xbf16>
    %c0_54 = arith.constant 0 : index
    %c0_55 = arith.constant 0 : index
    %100 = vector.load %arg19[%c0_54, %c0_55] : memref<128x128xbf16, #tpu.memory_space<vmem>>, vector<128x128xbf16>
    %cst_56 = arith.constant dense<0.000000e+00> : vector<16x128xf32>
    %101 = tpu.matmul %99, %100, %cst_56 {dimension_numbers = #tpu.dot_dimension_numbers<[1], [0], [0], [1], [0, 0, 1, 1], [], []>} : vector<16x128xbf16>, vector<128x128xbf16>, vector<16x128xf32> -> vector<16x128xf32>
    %c0_57 = arith.constant 0 : index
    %c0_58 = arith.constant 0 : index
    %102 = vector.load %arg20[%c0_57, %c0_58] : memref<1x128xf32, #tpu.memory_space<vmem>>, vector<1x128xf32>
    %103 = vector.broadcast %102 : vector<1x128xf32> to vector<16x128xf32>
    %104 = arith.addf %101, %103 : vector<16x128xf32>
    %cst_59 = arith.constant 0.000000e+00 : f32
    %105 = vector.broadcast %cst_59 : f32 to vector<16x128xf32>
    %106 = arith.maximumf %104, %105 : vector<16x128xf32>
    %107 = arith.truncf %106 : vector<16x128xf32> to vector<16x128xbf16>
    %c0_60 = arith.constant 0 : index
    %c0_61 = arith.constant 0 : index
    %108 = vector.load %arg21[%c0_60, %c0_61] : memref<128x128xbf16, #tpu.memory_space<vmem>>, vector<128x128xbf16>
    %cst_62 = arith.constant dense<0.000000e+00> : vector<16x128xf32>
    %109 = tpu.matmul %107, %108, %cst_62 {dimension_numbers = #tpu.dot_dimension_numbers<[1], [0], [0], [1], [0, 0, 1, 1], [], []>} : vector<16x128xbf16>, vector<128x128xbf16>, vector<16x128xf32> -> vector<16x128xf32>
    %c0_63 = arith.constant 0 : index
    %c0_64 = arith.constant 0 : index
    %110 = vector.load %arg22[%c0_63, %c0_64] : memref<1x128xf32, #tpu.memory_space<vmem>>, vector<1x128xf32>
    %111 = vector.broadcast %110 : vector<1x128xf32> to vector<16x128xf32>
    %112 = arith.addf %109, %111 : vector<16x128xf32>
    %c0_65 = arith.constant 0 : index
    %c0_66 = arith.constant 0 : index
    %113 = vector.load %arg24[%c0_65, %c0_66] : memref<16x128xf32, #tpu.memory_space<vmem>>, vector<16x128xf32>
    tpu.vector_store %arg24[%c0_65, %c0_66], %112 {strides = array<i32>} : memref<16x128xf32, #tpu.memory_space<vmem>>, vector<16x128xf32>,
    return
  }
  func.func @transform_0(%arg0: i32) -> (i32, i32) {
    %c0_i32 = arith.constant 0 : i32
    %c0_i32_0 = arith.constant 0 : i32
    return %arg0, %c0_i32 : i32, i32
  }
  func.func @transform_1(%arg0: i32) -> (i32, i32) {
    %c0_i32 = arith.constant 0 : i32
    %c0_i32_0 = arith.constant 0 : i32
    return %arg0, %c0_i32 : i32, i32
  }
  func.func @transform_2(%arg0: i32) -> (i32, i32) {
    %c0_i32 = arith.constant 0 : i32
    %c0_i32_0 = arith.constant 0 : i32
    return %arg0, %c0_i32 : i32, i32
  }
  func.func @transform_3(%arg0: i32) -> (i32, i32) {
    %c0_i32 = arith.constant 0 : i32
    %c0_i32_0 = arith.constant 0 : i32
    %c0_i32_1 = arith.constant 0 : i32
    return %c0_i32, %c0_i32_0 : i32, i32
  }
  func.func @transform_4(%arg0: i32) -> (i32, i32) {
    %c0_i32 = arith.constant 0 : i32
    %c0_i32_0 = arith.constant 0 : i32
    %c0_i32_1 = arith.constant 0 : i32
    return %c0_i32, %c0_i32_0 : i32, i32
  }
  func.func @transform_5(%arg0: i32) -> (i32, i32) {
    %c0_i32 = arith.constant 0 : i32
    %c0_i32_0 = arith.constant 0 : i32
    %c0_i32_1 = arith.constant 0 : i32
    return %c0_i32, %c0_i32_0 : i32, i32
  }
  func.func @transform_6(%arg0: i32) -> (i32, i32) {
    %c0_i32 = arith.constant 0 : i32
    %c0_i32_0 = arith.constant 0 : i32
    %c0_i32_1 = arith.constant 0 : i32
    return %c0_i32, %c0_i32_0 : i32, i32
  }
  func.func @transform_7(%arg0: i32) -> (i32, i32) {
    %c0_i32 = arith.constant 0 : i32
    %c0_i32_0 = arith.constant 0 : i32
    %c0_i32_1 = arith.constant 0 : i32
    return %c0_i32, %c0_i32_0 : i32, i32
  }
  func.func @transform_8(%arg0: i32) -> (i32, i32) {
    %c0_i32 = arith.constant 0 : i32
    %c0_i32_0 = arith.constant 0 : i32
    %c0_i32_1 = arith.constant 0 : i32
    return %c0_i32, %c0_i32_0 : i32, i32
  }
  func.func @transform_9(%arg0: i32) -> (i32, i32) {
    %c0_i32 = arith.constant 0 : i32
    %c0_i32_0 = arith.constant 0 : i32
    %c0_i32_1 = arith.constant 0 : i32
    return %c0_i32, %c0_i32_0 : i32, i32
  }
  func.func @transform_10(%arg0: i32) -> (i32, i32) {
    %c0_i32 = arith.constant 0 : i32
    %c0_i32_0 = arith.constant 0 : i32
    %c0_i32_1 = arith.constant 0 : i32
    return %c0_i32, %c0_i32_0 : i32, i32
  }
  func.func @transform_11(%arg0: i32) -> (i32, i32) {
    %c0_i32 = arith.constant 0 : i32
    %c0_i32_0 = arith.constant 0 : i32
    %c0_i32_1 = arith.constant 0 : i32
    return %c0_i32, %c0_i32_0 : i32, i32
  }
  func.func @transform_12(%arg0: i32) -> (i32, i32) {
    %c0_i32 = arith.constant 0 : i32
    %c0_i32_0 = arith.constant 0 : i32
    %c0_i32_1 = arith.constant 0 : i32
    return %c0_i32, %c0_i32_0 : i32, i32
  }
  func.func @transform_13(%arg0: i32) -> (i32, i32) {
    %c0_i32 = arith.constant 0 : i32
    %c0_i32_0 = arith.constant 0 : i32
    %c0_i32_1 = arith.constant 0 : i32
    return %c0_i32, %c0_i32_0 : i32, i32
  }
  func.func @transform_14(%arg0: i32) -> (i32, i32) {
    %c0_i32 = arith.constant 0 : i32
    %c0_i32_0 = arith.constant 0 : i32
    %c0_i32_1 = arith.constant 0 : i32
    return %c0_i32, %c0_i32_0 : i32, i32
  }
  func.func @transform_15(%arg0: i32) -> (i32, i32) {
    %c0_i32 = arith.constant 0 : i32
    %c0_i32_0 = arith.constant 0 : i32
    %c0_i32_1 = arith.constant 0 : i32
    return %c0_i32, %c0_i32_0 : i32, i32
  }
  func.func @transform_16(%arg0: i32) -> (i32, i32) {
    %c0_i32 = arith.constant 0 : i32
    %c0_i32_0 = arith.constant 0 : i32
    %c0_i32_1 = arith.constant 0 : i32
    return %c0_i32, %c0_i32_0 : i32, i32
  }
  func.func @transform_17(%arg0: i32) -> (i32, i32) {
    %c0_i32 = arith.constant 0 : i32
    %c0_i32_0 = arith.constant 0 : i32
    %c0_i32_1 = arith.constant 0 : i32
    return %c0_i32, %c0_i32_0 : i32, i32
  }
  func.func @transform_18(%arg0: i32) -> (i32, i32) {
    %c0_i32 = arith.constant 0 : i32
    %c0_i32_0 = arith.constant 0 : i32
    %c0_i32_1 = arith.constant 0 : i32
    return %c0_i32, %c0_i32_0 : i32, i32
  }
  func.func @transform_19(%arg0: i32) -> (i32, i32) {
    %c0_i32 = arith.constant 0 : i32
    %c0_i32_0 = arith.constant 0 : i32
    %c0_i32_1 = arith.constant 0 : i32
    return %c0_i32, %c0_i32_0 : i32, i32
  }
  func.func @transform_20(%arg0: i32) -> (i32, i32) {
    %c0_i32 = arith.constant 0 : i32
    %c0_i32_0 = arith.constant 0 : i32
    %c0_i32_1 = arith.constant 0 : i32
    return %c0_i32, %c0_i32_0 : i32, i32
  }
  func.func @transform_21(%arg0: i32) -> (i32, i32) {
    %c0_i32 = arith.constant 0 : i32
    %c0_i32_0 = arith.constant 0 : i32
    %c0_i32_1 = arith.constant 0 : i32
    return %c0_i32, %c0_i32_0 : i32, i32
  }
  func.func @transform_22(%arg0: i32) -> (i32, i32) {
    %c0_i32 = arith.constant 0 : i32
    %c0_i32_0 = arith.constant 0 : i32
    return %arg0, %c0_i32 : i32, i32
  }
  func.func @transform_23(%arg0: i32) -> (i32, i32) {
    %c0_i32 = arith.constant 0 : i32
    %c0_i32_0 = arith.constant 0 : i32
    return %arg0, %c0_i32 : i32, i32
  }
}

module attributes {stable_mosaic.version = 11 : i64} {
  func.func @kernel(%arg0: i32, %arg1: memref<8x4xf32, #tpu.memory_space<vmem>>, %arg2: memref<4x32xf32, #tpu.memory_space<vmem>>, %arg3: memref<1x32xf32, #tpu.memory_space<vmem>>, %arg4: memref<8x32xf32, #tpu.memory_space<vmem>>) attributes {dimension_semantics = [#tpu.dimension_semantics<parallel>], iteration_bounds = array<i64: 2>, scalar_prefetch = 0 : i64, scratch_operands = 0 : i64, tpu.core_type = #tpu.core_type<tc>, window_params = [{transform_indices = @transform_0, window_bounds = array<i64: 8, 4>}, {pipeline_mode = #tpu.pipeline_mode<synchronous>, transform_indices = @transform_1, window_bounds = array<i64: 4, 32>}, {pipeline_mode = #tpu.pipeline_mode<synchronous>, transform_indices = @transform_2, window_bounds = array<i64: 1, 32>}, {transform_indices = @transform_3, window_bounds = array<i64: 8, 32>}]} {
    %c0 = arith.constant 0 : index
    %c0_0 = arith.constant 0 : index
    %0 = vector.load %arg1[%c0, %c0_0] : memref<8x4xf32, #tpu.memory_space<vmem>>, vector<8x4xf32>
    %c0_1 = arith.constant 0 : index
    %c0_2 = arith.constant 0 : index
    %1 = vector.load %arg2[%c0_1, %c0_2] : memref<4x32xf32, #tpu.memory_space<vmem>>, vector<4x32xf32>
    %cst = arith.constant dense<0.000000e+00> : vector<8x32xf32>
    %2 = tpu.matmul %0, %1, %cst {dimension_numbers = #tpu.dot_dimension_numbers<[1], [0], [0], [1], [0, 0, 1, 1], [], []>} : vector<8x4xf32>, vector<4x32xf32>, vector<8x32xf32> -> vector<8x32xf32>
    %c0_3 = arith.constant 0 : index
    %c0_4 = arith.constant 0 : index
    %3 = vector.load %arg3[%c0_3, %c0_4] : memref<1x32xf32, #tpu.memory_space<vmem>>, vector<1x32xf32>
    %4 = vector.broadcast %3 : vector<1x32xf32> to vector<8x32xf32>
    %5 = arith.addf %2, %4 : vector<8x32xf32>
    %c0_5 = arith.constant 0 : index
    %c0_6 = arith.constant 0 : index
    %6 = vector.load %arg4[%c0_5, %c0_6] : memref<8x32xf32, #tpu.memory_space<vmem>>, vector<8x32xf32>
    tpu.vector_store %arg4[%c0_5, %c0_6], %5 {strides = array<i32>} : memref<8x32xf32, #tpu.memory_space<vmem>>, vector<8x32xf32>,
    return
  }
  func.func @transform_0(%arg0: i32) -> (i32, i32) {
    %c0_i32 = arith.constant 0 : i32
    %c0_i32_0 = arith.constant 0 : i32
    return %arg0, %c0_i32 : i32, i32
  }
  func.func @transform_1(%arg0: i32) -> (i32, i32) {
    %c0_i32 = arith.constant 0 : i32
    %c0_i32_0 = arith.constant 0 : i32
    %c0_i32_1 = arith.constant 0 : i32
    return %c0_i32, %c0_i32_0 : i32, i32
  }
  func.func @transform_2(%arg0: i32) -> (i32, i32) {
    %c0_i32 = arith.constant 0 : i32
    %c0_i32_0 = arith.constant 0 : i32
    %c0_i32_1 = arith.constant 0 : i32
    return %c0_i32, %c0_i32_0 : i32, i32
  }
  func.func @transform_3(%arg0: i32) -> (i32, i32) {
    %c0_i32 = arith.constant 0 : i32
    %c0_i32_0 = arith.constant 0 : i32
    return %arg0, %c0_i32 : i32, i32
  }
}

module attributes {stable_mosaic.version = 11 : i64} {
  func.func @kernel(%arg0: i32, %arg1: memref<64x4xf32, #tpu.memory_space<vmem>>, %arg2: memref<4x32xf32, #tpu.memory_space<vmem>>, %arg3: memref<1x32xf32, #tpu.memory_space<vmem>>, %arg4: memref<64x32xf32, #tpu.memory_space<vmem>>) attributes {dimension_semantics = [#tpu.dimension_semantics<parallel>], iteration_bounds = array<i64: 2>, scalar_prefetch = 0 : i64, scratch_operands = 0 : i64, tpu.core_type = #tpu.core_type<tc>, window_params = [{transform_indices = @transform_0, window_bounds = array<i64: 64, 4>}, {pipeline_mode = #tpu.pipeline_mode<synchronous>, transform_indices = @transform_1, window_bounds = array<i64: 4, 32>}, {pipeline_mode = #tpu.pipeline_mode<synchronous>, transform_indices = @transform_2, window_bounds = array<i64: 1, 32>}, {transform_indices = @transform_3, window_bounds = array<i64: 64, 32>}]} {
    %c0 = arith.constant 0 : index
    %c0_0 = arith.constant 0 : index
    %0 = vector.load %arg1[%c0, %c0_0] : memref<64x4xf32, #tpu.memory_space<vmem>>, vector<64x4xf32>
    %c0_1 = arith.constant 0 : index
    %c0_2 = arith.constant 0 : index
    %1 = vector.load %arg2[%c0_1, %c0_2] : memref<4x32xf32, #tpu.memory_space<vmem>>, vector<4x32xf32>
    %cst = arith.constant dense<0.000000e+00> : vector<64x32xf32>
    %2 = tpu.matmul %0, %1, %cst {dimension_numbers = #tpu.dot_dimension_numbers<[1], [0], [0], [1], [0, 0, 1, 1], [], []>} : vector<64x4xf32>, vector<4x32xf32>, vector<64x32xf32> -> vector<64x32xf32>
    %c0_3 = arith.constant 0 : index
    %c0_4 = arith.constant 0 : index
    %3 = vector.load %arg3[%c0_3, %c0_4] : memref<1x32xf32, #tpu.memory_space<vmem>>, vector<1x32xf32>
    %4 = vector.broadcast %3 : vector<1x32xf32> to vector<64x32xf32>
    %5 = arith.addf %2, %4 : vector<64x32xf32>
    %c0_5 = arith.constant 0 : index
    %c0_6 = arith.constant 0 : index
    %6 = vector.load %arg4[%c0_5, %c0_6] : memref<64x32xf32, #tpu.memory_space<vmem>>, vector<64x32xf32>
    tpu.vector_store %arg4[%c0_5, %c0_6], %5 {strides = array<i32>} : memref<64x32xf32, #tpu.memory_space<vmem>>, vector<64x32xf32>,
    return
  }
  func.func @transform_0(%arg0: i32) -> (i32, i32) {
    %c0_i32 = arith.constant 0 : i32
    %c0_i32_0 = arith.constant 0 : i32
    return %arg0, %c0_i32 : i32, i32
  }
  func.func @transform_1(%arg0: i32) -> (i32, i32) {
    %c0_i32 = arith.constant 0 : i32
    %c0_i32_0 = arith.constant 0 : i32
    %c0_i32_1 = arith.constant 0 : i32
    return %c0_i32, %c0_i32_0 : i32, i32
  }
  func.func @transform_2(%arg0: i32) -> (i32, i32) {
    %c0_i32 = arith.constant 0 : i32
    %c0_i32_0 = arith.constant 0 : i32
    %c0_i32_1 = arith.constant 0 : i32
    return %c0_i32, %c0_i32_0 : i32, i32
  }
  func.func @transform_3(%arg0: i32) -> (i32, i32) {
    %c0_i32 = arith.constant 0 : i32
    %c0_i32_0 = arith.constant 0 : i32
    return %arg0, %c0_i32 : i32, i32
  }
}

</mosaic_0001>

<bundles_post_ra>
// kernel: _raft_forward.13
= control target key start
LH: loop header
LB: loop body
LE: loop exit
PB: predicated region body
PF: predicated region fallthrough
CT: control target
= control target key end

     0   :  { %8 = vsyncpa [#allocation3], 0  ;;  %s1574_s0 = inlined_call_operand.vmem [shape: f32[1024,8], index: 0, kind: input, shape index: {}]   ;;  %s1575_s1 = inlined_call_operand.hbm [shape: bf16[8,32], index: 1, kind: input, shape index: {}]   ;;  %s1576_s2 = inlined_call_operand.hbm [shape: f32[1,32], index: 2, kind: input, shape index: {}]   ;;  %s1577_s3 = inlined_call_operand.vmem [shape: f32[1024,32], index: 3, kind: output, shape index: {}]  }
   0x1   :  { %9 = vsyncpa [#allocation5], 0  ;;  %s1176_s12 = smov 0  }
   0x2 LB: > { %s902_s13 = sadd.s32 4294967295, %s1152_s12   ;;  %p904_p0 = scmp.ge.s32.totalorder %s1152_s12, 1  ;;  %s1152_s12 = sphi %s1176_s12, %s15_s12  }
   0x3   : > { %p114_p1 = scmp.lt.s32.totalorder %s1152_s12, 3  ;;  %p1186_p2 = scmp.eq.s32.totalorder %s902_s13, 0 }
   0x4   : > { %s1154_s16 = smov [#allocation2]   ;;  %s1155_s18 = smov [#allocation4]  }
   0x5   : > { %s1581_s14 = scalar_select %p1186_p2, 1, 0 }
   0x6   : > { %p1190_p3 = pnand %p904_p0, %p114_p1  ;;  %s127_s17 = sshll.u32 %s1154_s16, 4  ;;  %s128_s17 = int_to_ptr.vmem [resolvable:$true] %s127_s17 }
   0x7   : > { %s138_s19 = sshll.u32 %s1155_s18, 4  ;;  %s1082_s23 = scalar_lea.hbm %s1575_s1, 64  ;;  %s1202_s19 = int_to_ptr.vmem [resolvable:$true] %s138_s19 }
   0x8   : > { %s1582_s15 = scalar_select %p1190_p3, 1, 0 }
   0x9   : > { %p1061_p4 = pneg %p1190_p3  ;;  %p1083_p6 = scmp.ne.s32.totalorder %s1575_s1, %s1082_s23 }
   0xa   : > { %p1089_p10 = scmp.lt.u32.totalorder %s1082_s23, %s1575_s1 }
   0xb   : > { %p1198_p5 = pnand %p1186_p2, %p1061_p4 }
   0xd   : > { %p1084_p7 = pneg %p1198_p5 }
   0xf   : > { %p1085_p8 = pnand %p1084_p7, %p1083_p6 }
  0x11   : > { %p1086_p9 = pneg %p1085_p8 }
  0x13   : > { %p1091_p11 = pnand %p1089_p10, %p1086_p9 }
  0x15   : > { %1094 = shalt.err (!%p1091_p11)
}
  0x16   : > { %s1095_s28 = scalar_lea.vmem %s128_s17, 64  ;;  %p1103_p1 = scmp.lt.s32.totalorder %s128_s17, %s128_s17 }
  0x17   : > { %p1096_p12 = scmp.ne.s32.totalorder %s128_s17, %s1095_s28  ;;  %p1104_p4 = scmp.lt.s32.totalorder %s1095_s28, %s1095_s28 }
  0x19   : > { %p1098_p13 = pnand %p1096_p12, %p1084_p7  ;;  %p1105_p2 = por %p1104_p4, %p1103_p1 }
  0x1b   : > { %p1099_p0 = pneg %p1098_p13 }
  0x1d   : > { %p1106_p3 = pnand %p1105_p2, %p1099_p0 }
  0x1f   : > { %1109 = shalt.err (!%p1106_p3)
}
  0x20   : > { %1064 = dma.hbm_to_vmem [thread:$0]  (!%p1198_p5), %s1575_s1, 64, %s128_s17, [#allocation3]  }
  0x21   : > { %s1110_s6 = scalar_lea.hbm %s1576_s2, 16 }
  0x22   : > { %p1111_p6 = scmp.ne.s32.totalorder %s1576_s2, %s1110_s6  ;;  %p1117_p3 = scmp.lt.u32.totalorder %s1110_s6, %s1576_s2 }
  0x24   : > { %p1113_p8 = pnand %p1111_p6, %p1084_p7 }
  0x26   : > { %p1114_p2 = pneg %p1113_p8 }
  0x28   : > { %p1119_p9 = pnand %p1117_p3, %p1114_p2 }
  0x2a   : > { %1122 = shalt.err (!%p1119_p9)
}
  0x2b   : > { %s1123_s11 = scalar_lea.vmem %s1202_s19, 16  ;;  %s1130_s16 = scalar_lea.vmem %s1202_s19, 32 }
  0x2c   : > { %p1124_p10 = scmp.ne.s32.totalorder %s1202_s19, %s1123_s11  ;;  %p1131_p13 = scmp.lt.s32.totalorder %s1202_s19, %s1202_s19 }
  0x2d   : > { %p1132_p0 = scmp.lt.s32.totalorder %s1130_s16, %s1123_s11 }
  0x2e   : > { %p1126_p11 = pnand %p1124_p10, %p1084_p7 }
  0x2f   : > { %p1133_p1 = por %p1132_p0, %p1131_p13 }
  0x30   : > { %p1127_p12 = pneg %p1126_p11 }
  0x32   : > { %p1134_p4 = pnand %p1133_p1, %p1127_p12 }
  0x34   : > { %1137 = shalt.err (!%p1134_p4)
}
  0x35   : > { %1067 = dma.hbm_to_vmem [thread:$0]  (!%p1198_p5), %s1576_s2, 16, %s1202_s19, [#allocation5]  }
  0x36   : > { %p1584_p6 = scmp.ne.s32.totalorder %s1582_s15, 0 }
  0x37   : > { %p1585_p7 = scmp.ne.s32.totalorder (!%p1584_p6), %s1581_s14, 0 }
  0x38   : > { %160 = sbr.rel (%p1584_p6) target bundleno = 353 (0x161), region = 32 }
  0x3f   : > { %1143 = dma.done.wait (%p1585_p7), [#allocation3], 64  }
  0x40   : > { %1145 = vsyncadd (%p1585_p7), [#allocation3], 4294967232 }
  0x41   : > { %1147 = dma.done.wait (%p1585_p7), [#allocation5], 16  }
  0x42   : > { %1149 = vsyncadd (%p1585_p7), [#allocation5], 4294967280  ;;  %s911_s20 = sshll.u32 %s902_s13, 6  ;;  %vm402_vm0 = vcmask 1043456   ;;  %v297_v0 = vld [vmem:[#allocation2] sm:$0xf] }
  0x43   : > { %p189_p8 = scmp.lt.s32.totalorder %s911_s20, 127  ;;  %vm305_vm1 = vcmask 64512   ;;  %1051 = vmatprep.subr.msk.bf16.mxu0 %vm402_vm0, %v297_v0  ;;  %1052 = vmatprep.subr.msk.bf16.mxu1 %vm402_vm0, %v297_v0  ;;  %v404_v3 = vsel %vm402_vm0, %v297_v0, 0  ;;  %vm759_vm2 = vcmask 261120  }
  0x44   : > { %984 = vmatpush3.bf16.msra.mxu0 %v404_v3  ;;  %1050 = vmatpush3.bf16.msra.mxu1 %v404_v3 }
  0x45   : > { %s1587_s20 = smov (!%p189_p8, %s911_s20), 127 }
  0x46   : > { %s912_s15 = sshll.u32 %s1587_s20, 3 }
  0x47   : > { %s1272_s22 = scalar_lea.vmem %s1574_s0, %s912_s15  ;;  %s1379_s23 = scalar_lea.vmem %s1577_s3, %s912_s15 }
  0x48   : > { %v201_v1 = vld [vmem:[%s1272_s22] sm:$0xff]  ;;  %v202_v2 = vld [vmem:[%s1272_s22 + $0x8] sm:$0xff]  ;;  %v203_v7 = vld [vmem:[%s1272_s22 + $0x10] sm:$0xff] }
  0x49   : > { %v265_v4 = vpack.c.bf16 %v202_v2, %v201_v1  ;;  %v233_v5 = vld [vmem:[%s1272_s22 + $0x100] sm:$0xff]  ;;  %v234_v6 = vld [vmem:[%s1272_s22 + $0x108] sm:$0xff]  ;;  %v204_v9 = vld [vmem:[%s1272_s22 + $0x18] sm:$0xff] }
  0x4a   : > { %v281_v8 = vpack.c.bf16 %v234_v6, %v233_v5  ;;  %v235_v10 = vld [vmem:[%s1272_s22 + $0x110] sm:$0xff]  ;;  %v236_v11 = vld [vmem:[%s1272_s22 + $0x118] sm:$0xff]  ;;  %v266_v12 = vpack.c.bf16 %v204_v9, %v203_v7  ;;  %v205_v14 = vld [vmem:[%s1272_s22 + $0x20] sm:$0xff] }
  0x4b   : > { %985 = vmatprep.mubr.msk.bf16.mxu0 %vm305_vm1, %v265_v4  ;;  %v282_v13 = vpack.c.bf16 %v236_v11, %v235_v10  ;;  %v206_v15 = vld [vmem:[%s1272_s22 + $0x28] sm:$0xff]  ;;  %v237_v16 = vld [vmem:[%s1272_s22 + $0x120] sm:$0xff]  ;;  %v207_v20 = vld [vmem:[%s1272_s22 + $0x30] sm:$0xff] }
  0x4c   : > { %1017 = vmatprep.mubr.msk.bf16.mxu1 %vm305_vm1, %v281_v8  ;;  %v267_v17 = vpack.c.bf16 %v206_v15, %v205_v14  ;;  %v238_v18 = vld [vmem:[%s1272_s22 + $0x128] sm:$0xff]  ;;  %986 = vmatmul.mubr.msk.bf16.vlgmr.msra.gmra.mrb[0].mxu0 %vm305_vm1, %v266_v12  ;;  %v208_v21 = vld [vmem:[%s1272_s22 + $0x38] sm:$0xff]  ;;  %v239_v22 = vld [vmem:[%s1272_s22 + $0x130] sm:$0xff] }
  0x4d   : > { %1018 = vmatmul.mubr.msk.bf16.vlgmr.msra.gmra.mrb[0].mxu1 %vm305_vm1, %v282_v13  ;;  %v283_v19 = vpack.c.bf16 %v238_v18, %v237_v16  ;;  %v240_v23 = vld [vmem:[%s1272_s22 + $0x138] sm:$0xff]  ;;  %v209_v24 = vld [vmem:[%s1272_s22 + $0x40] sm:$0xff]  ;;  %v210_v25 = vld [vmem:[%s1272_s22 + $0x48] sm:$0xff]  ;;  %v268_v28 = vpack.c.bf16 %v208_v21, %v207_v20 }
  0x4e   : > { %989 = vmatprep.mubr.msk.bf16.mxu0 %vm305_vm1, %v267_v17  ;;  %v241_v26 = vld [vmem:[%s1272_s22 + $0x140] sm:$0xff]  ;;  %v242_v27 = vld [vmem:[%s1272_s22 + $0x148] sm:$0xff]  ;;  %v284_v29 = vpack.c.bf16 %v240_v23, %v239_v22  ;;  %v269_v30 = vpack.c.bf16 %v210_v25, %v209_v24  ;;  %v211_v32 = vld [vmem:[%s1272_s22 + $0x50] sm:$0xff] }
  0x4f   : > { %1021 = vmatprep.mubr.msk.bf16.mxu1 %vm305_vm1, %v283_v19  ;;  %v285_v31 = vpack.c.bf16 %v242_v27, %v241_v26  ;;  %v212_v33 = vld [vmem:[%s1272_s22 + $0x58] sm:$0xff]  ;;  %v243_v34 = vld [vmem:[%s1272_s22 + $0x150] sm:$0xff]  ;;  %v213_v36 = vld [vmem:[%s1272_s22 + $0x60] sm:$0xff] }
  0x50   : > { %v244_v35 = vld [vmem:[%s1272_s22 + $0x158] sm:$0xff]  ;;  %v214_v37 = vld [vmem:[%s1272_s22 + $0x68] sm:$0xff]  ;;  %v245_v38 = vld [vmem:[%s1272_s22 + $0x160] sm:$0xff]  ;;  %v270_v40 = vpack.c.bf16 %v212_v33, %v211_v32 }
  0x51   : > { %v246_v39 = vld [vmem:[%s1272_s22 + $0x168] sm:$0xff]  ;;  %v286_v41 = vpack.c.bf16 %v244_v35, %v243_v34  ;;  %v271_v42 = vpack.c.bf16 %v214_v37, %v213_v36  ;;  %v215_v44 = vld [vmem:[%s1272_s22 + $0x70] sm:$0xff]  ;;  %v216_v45 = vld [vmem:[%s1272_s22 + $0x78] sm:$0xff] }
  0x52   : > { %v287_v43 = vpack.c.bf16 %v246_v39, %v245_v38  ;;  %v247_v46 = vld [vmem:[%s1272_s22 + $0x170] sm:$0xff]  ;;  %v248_v47 = vld [vmem:[%s1272_s22 + $0x178] sm:$0xff]  ;;  %v217_v48 = vld [vmem:[%s1272_s22 + $0x80] sm:$0xff]  ;;  %v272_v52 = vpack.c.bf16 %v216_v45, %v215_v44 }
  0x53   : > { %v218_v49 = vld [vmem:[%s1272_s22 + $0x88] sm:$0xff]  ;;  %v249_v50 = vld [vmem:[%s1272_s22 + $0x180] sm:$0xff]  ;;  %v288_v53 = vpack.c.bf16 %v248_v47, %v247_v46  ;;  %v219_v56 = vld [vmem:[%s1272_s22 + $0x90] sm:$0xff] }
  0x54   : > { %990 = vmatmul.mubr.msk.bf16.gmra.mrb[4].mxu0 %vm305_vm1, %v268_v28  ;;  %v250_v51 = vld [vmem:[%s1272_s22 + $0x188] sm:$0xff]  ;;  %v273_v54 = vpack.c.bf16 %v218_v49, %v217_v48  ;;  %v220_v57 = vld [vmem:[%s1272_s22 + $0x98] sm:$0xff]  ;;  %v251_v58 = vld [vmem:[%s1272_s22 + $0x190] sm:$0xff] }
  0x55   : > { %1022 = vmatmul.mubr.msk.bf16.gmra.mrb[4].mxu1 %vm305_vm1, %v284_v29  ;;  %993 = vmatprep.mubr.msk.bf16.mxu0 %vm305_vm1, %v269_v30  ;;  %v289_v55 = vpack.c.bf16 %v250_v51, %v249_v50  ;;  %v252_v59 = vld [vmem:[%s1272_s22 + $0x198] sm:$0xff]  ;;  %v221_v60 = vld [vmem:[%s1272_s22 + $0xa0] sm:$0xff]  ;;  %v222_v61 = vld [vmem:[%s1272_s22 + $0xa8] sm:$0xff]  ;;  %v274_v0 = vpack.c.bf16 %v220_v57, %v219_v56 }
  0x56   : > { %1025 = vmatprep.mubr.msk.bf16.mxu1 %vm305_vm1, %v285_v31  ;;  %v253_v62 = vld [vmem:[%s1272_s22 + $0x1a0] sm:$0xff]  ;;  %v254_v63 = vld [vmem:[%s1272_s22 + $0x1a8] sm:$0xff]  ;;  %v290_v1 = vpack.c.bf16 %v252_v59, %v251_v58  ;;  %v275_v2 = vpack.c.bf16 %v222_v61, %v221_v60  ;;  %v223_v4 = vld [vmem:[%s1272_s22 + $0xb0] sm:$0xff] }
  0x57   : > { %v291_v3 = vpack.c.bf16 %v254_v63, %v253_v62  ;;  %v224_v5 = vld [vmem:[%s1272_s22 + $0xb8] sm:$0xff]  ;;  %v255_v6 = vld [vmem:[%s1272_s22 + $0x1b0] sm:$0xff]  ;;  %v225_v8 = vld [vmem:[%s1272_s22 + $0xc0] sm:$0xff] }
  0x58   : > { %v256_v7 = vld [vmem:[%s1272_s22 + $0x1b8] sm:$0xff]  ;;  %v226_v9 = vld [vmem:[%s1272_s22 + $0xc8] sm:$0xff]  ;;  %v257_v10 = vld [vmem:[%s1272_s22 + $0x1c0] sm:$0xff]  ;;  %v276_v12 = vpack.c.bf16 %v224_v5, %v223_v4 }
  0x59   : > { %v258_v11 = vld [vmem:[%s1272_s22 + $0x1c8] sm:$0xff]  ;;  %v292_v13 = vpack.c.bf16 %v256_v7, %v255_v6  ;;  %v277_v14 = vpack.c.bf16 %v226_v9, %v225_v8  ;;  %v227_v16 = vld [vmem:[%s1272_s22 + $0xd0] sm:$0xff]  ;;  %v228_v17 = vld [vmem:[%s1272_s22 + $0xd8] sm:$0xff] }
  0x5a   : > { %v293_v15 = vpack.c.bf16 %v258_v11, %v257_v10  ;;  %v259_v18 = vld [vmem:[%s1272_s22 + $0x1d0] sm:$0xff]  ;;  %v260_v19 = vld [vmem:[%s1272_s22 + $0x1d8] sm:$0xff]  ;;  %v229_v20 = vld [vmem:[%s1272_s22 + $0xe0] sm:$0xff]  ;;  %v278_v24 = vpack.c.bf16 %v228_v17, %v227_v16 }
  0x5b   : > { %v230_v21 = vld [vmem:[%s1272_s22 + $0xe8] sm:$0xff]  ;;  %v261_v22 = vld [vmem:[%s1272_s22 + $0x1e0] sm:$0xff]  ;;  %v294_v25 = vpack.c.bf16 %v260_v19, %v259_v18  ;;  %v231_v28 = vld [vmem:[%s1272_s22 + $0xf0] sm:$0xff] }
  0x5c   : > { %994 = vmatmul.mubr.msk.bf16.gmra.mrb[8].mxu0 %vm305_vm1, %v270_v40  ;;  %v262_v23 = vld [vmem:[%s1272_s22 + $0x1e8] sm:$0xff]  ;;  %v279_v26 = vpack.c.bf16 %v230_v21, %v229_v20  ;;  %v232_v29 = vld [vmem:[%s1272_s22 + $0xf8] sm:$0xff]  ;;  %v263_v30 = vld [vmem:[%s1272_s22 + $0x1f0] sm:$0xff] }
  0x5d   : > { %1026 = vmatmul.mubr.msk.bf16.gmra.mrb[8].mxu1 %vm305_vm1, %v286_v41  ;;  %997 = vmatprep.mubr.msk.bf16.mxu0 %vm305_vm1, %v271_v42  ;;  %v295_v27 = vpack.c.bf16 %v262_v23, %v261_v22  ;;  %v264_v31 = vld [vmem:[%s1272_s22 + $0x1f8] sm:$0xff]  ;;  %v280_v32 = vpack.c.bf16 %v232_v29, %v231_v28  ;;  %v1370_v34 = vld [vmem:[#allocation4] ss:$0 sm:$0xff] }
  0x5e   : > { %1029 = vmatprep.mubr.msk.bf16.mxu1 %vm305_vm1, %v287_v43  ;;  %v296_v33 = vpack.c.bf16 %v264_v31, %v263_v30 }
  0x64   : > { %998 = vmatmul.mubr.msk.bf16.gmra.mrb[12].mxu0 %vm305_vm1, %v272_v52 }
  0x65   : > { %1030 = vmatmul.mubr.msk.bf16.gmra.mrb[12].mxu1 %vm305_vm1, %v288_v53  ;;  %1001 = vmatprep.mubr.msk.bf16.mxu0 %vm305_vm1, %v273_v54 }
  0x66   : > { %1033 = vmatprep.mubr.msk.bf16.mxu1 %vm305_vm1, %v289_v55 }
  0x6c   : > { %1002 = vmatmul.mubr.msk.bf16.gmra.mrb[16].mxu0 %vm305_vm1, %v274_v0 }
  0x6d   : > { %1034 = vmatmul.mubr.msk.bf16.gmra.mrb[16].mxu1 %vm305_vm1, %v290_v1  ;;  %1005 = vmatprep.mubr.msk.bf16.mxu0 %vm305_vm1, %v275_v2 }
  0x6e   : > { %1037 = vmatprep.mubr.msk.bf16.mxu1 %vm305_vm1, %v291_v3 }
  0x74   : > { %1006 = vmatmul.mubr.msk.bf16.gmra.mrb[20].mxu0 %vm305_vm1, %v276_v12 }
  0x75   : > { %1038 = vmatmul.mubr.msk.bf16.gmra.mrb[20].mxu1 %vm305_vm1, %v292_v13  ;;  %1009 = vmatprep.mubr.msk.bf16.mxu0 %vm305_vm1, %v277_v14 }
  0x76   : > { %1041 = vmatprep.mubr.msk.bf16.mxu1 %vm305_vm1, %v293_v15 }
  0x7c   : > { %1010 = vmatmul.mubr.msk.bf16.gmra.mrb[24].mxu0 %vm305_vm1, %v278_v24 }
  0x7d   : > { %1042 = vmatmul.mubr.msk.bf16.gmra.mrb[24].mxu1 %vm305_vm1, %v294_v25  ;;  %1013 = vmatprep.mubr.msk.bf16.mxu0 %vm305_vm1, %v279_v26 }
  0x7e   : > { %1045 = vmatprep.mubr.msk.bf16.mxu1 %vm305_vm1, %v295_v27 }
  0x84   : > { %1014 = vmatmul.mubr.msk.bf16.gmra.mrb[28].mxu0 %vm305_vm1, %v280_v32 }
  0x85   : > { %1046 = vmatmul.mubr.msk.bf16.gmra.mrb[28].mxu1 %vm305_vm1, %v296_v33 }
 0x11f   : > { %v987_v35 = vpop.f32.mrb[0].mxu0 }
 0x120   : > { %v1019_v36 = vpop.f32.mrb[0].mxu1  ;;  %v449_v37 = vadd.f32 %v987_v35, %v1370_v34  ;;  %v440_v39 = vpop.f32.mrb[1].mxu0 }
 0x121   : > { %v577_v38 = vadd.f32 %v1019_v36, %v1370_v34  ;;  %v568_v40 = vpop.f32.mrb[1].mxu1  ;;  %v441_v41 = vadd.f32 %v1370_v34, %v440_v39  ;;  %v988_v43 = vpop.f32.mrb[2].mxu0 }
 0x122   : > { %v569_v42 = vadd.f32 %v1370_v34, %v568_v40  ;;  %v1020_v44 = vpop.f32.mrb[2].mxu1  ;;  %v697_v45 = vmax.f32 %v449_v37, 0.0  ;;  %v452_v47 = vadd.f32 %v988_v43, %v1370_v34  ;;  %v443_v49 = vpop.f32.mrb[3].mxu0 }
 0x123   : > { %v729_v46 = vmax.f32 %v577_v38, 0.0  ;;  %v580_v48 = vadd.f32 %v1020_v44, %v1370_v34  ;;  %v571_v50 = vpop.f32.mrb[3].mxu1  ;;  %v695_v51 = vmax.f32 %v441_v41, 0.0  ;;  %v444_v53 = vadd.f32 %v1370_v34, %v443_v49 }
 0x124   : > { %v727_v52 = vmax.f32 %v569_v42, 0.0  ;;  %v572_v54 = vadd.f32 %v1370_v34, %v571_v50  ;;  %762 = vst.msk [vmem:[%s1379_s23 + $0x10] sm:$0xff] %vm759_vm2, %v697_v45  ;;  %v698_v55 = vmax.f32 %v452_v47, 0.0 }
 0x125   : > { %794 = vst.msk [vmem:[%s1379_s23 + $0x110] sm:$0xff] %vm759_vm2, %v729_v46  ;;  %v730_v56 = vmax.f32 %v580_v48, 0.0  ;;  %760 = vst.msk [vmem:[%s1379_s23] sm:$0xff] %vm759_vm2, %v695_v51  ;;  %v696_v57 = vmax.f32 %v444_v53, 0.0 }
 0x126   : > { %792 = vst.msk [vmem:[%s1379_s23 + $0x100] sm:$0xff] %vm759_vm2, %v727_v52  ;;  %v728_v58 = vmax.f32 %v572_v54, 0.0  ;;  %763 = vst.msk [vmem:[%s1379_s23 + $0x18] sm:$0xff] %vm759_vm2, %v698_v55 }
 0x127   : > { %795 = vst.msk [vmem:[%s1379_s23 + $0x118] sm:$0xff] %vm759_vm2, %v730_v56  ;;  %761 = vst.msk [vmem:[%s1379_s23 + $0x8] sm:$0xff] %vm759_vm2, %v696_v57  ;;  %v991_v59 = vpop.f32.mrb[4].mxu0 }
 0x128   : > { %793 = vst.msk [vmem:[%s1379_s23 + $0x108] sm:$0xff] %vm759_vm2, %v728_v58  ;;  %v1023_v60 = vpop.f32.mrb[4].mxu1  ;;  %v465_v61 = vadd.f32 %v991_v59, %v1370_v34  ;;  %v456_v63 = vpop.f32.mrb[5].mxu0 }
 0x129   : > { %v593_v62 = vadd.f32 %v1023_v60, %v1370_v34  ;;  %v584_v0 = vpop.f32.mrb[5].mxu1  ;;  %v457_v1 = vadd.f32 %v1370_v34, %v456_v63  ;;  %v992_v3 = vpop.f32.mrb[6].mxu0 }
 0x12a   : > { %v585_v2 = vadd.f32 %v1370_v34, %v584_v0  ;;  %v1024_v4 = vpop.f32.mrb[6].mxu1  ;;  %v701_v5 = vmax.f32 %v465_v61, 0.0  ;;  %v468_v7 = vadd.f32 %v992_v3, %v1370_v34  ;;  %v459_v9 = vpop.f32.mrb[7].mxu0 }
 0x12b   : > { %v733_v6 = vmax.f32 %v593_v62, 0.0  ;;  %v596_v8 = vadd.f32 %v1024_v4, %v1370_v34  ;;  %v587_v10 = vpop.f32.mrb[7].mxu1  ;;  %v699_v11 = vmax.f32 %v457_v1, 0.0  ;;  %v460_v13 = vadd.f32 %v1370_v34, %v459_v9 }
 0x12c   : > { %v731_v12 = vmax.f32 %v585_v2, 0.0  ;;  %v588_v14 = vadd.f32 %v1370_v34, %v587_v10  ;;  %766 = vst.msk [vmem:[%s1379_s23 + $0x30] sm:$0xff] %vm759_vm2, %v701_v5  ;;  %v702_v15 = vmax.f32 %v468_v7, 0.0 }
 0x12d   : > { %798 = vst.msk [vmem:[%s1379_s23 + $0x130] sm:$0xff] %vm759_vm2, %v733_v6  ;;  %v734_v16 = vmax.f32 %v596_v8, 0.0  ;;  %764 = vst.msk [vmem:[%s1379_s23 + $0x20] sm:$0xff] %vm759_vm2, %v699_v11  ;;  %v700_v17 = vmax.f32 %v460_v13, 0.0 }
 0x12e   : > { %796 = vst.msk [vmem:[%s1379_s23 + $0x120] sm:$0xff] %vm759_vm2, %v731_v12  ;;  %v732_v18 = vmax.f32 %v588_v14, 0.0  ;;  %767 = vst.msk [vmem:[%s1379_s23 + $0x38] sm:$0xff] %vm759_vm2, %v702_v15 }
 0x12f   : > { %799 = vst.msk [vmem:[%s1379_s23 + $0x138] sm:$0xff] %vm759_vm2, %v734_v16  ;;  %765 = vst.msk [vmem:[%s1379_s23 + $0x28] sm:$0xff] %vm759_vm2, %v700_v17  ;;  %v995_v19 = vpop.f32.mrb[8].mxu0 }
 0x130   : > { %797 = vst.msk [vmem:[%s1379_s23 + $0x128] sm:$0xff] %vm759_vm2, %v732_v18  ;;  %v1027_v20 = vpop.f32.mrb[8].mxu1  ;;  %v481_v21 = vadd.f32 %v995_v19, %v1370_v34  ;;  %v472_v23 = vpop.f32.mrb[9].mxu0 }
 0x131   : > { %v609_v22 = vadd.f32 %v1027_v20, %v1370_v34  ;;  %v600_v24 = vpop.f32.mrb[9].mxu1  ;;  %v473_v25 = vadd.f32 %v1370_v34, %v472_v23  ;;  %v996_v27 = vpop.f32.mrb[10].mxu0 }
 0x132   : > { %v601_v26 = vadd.f32 %v1370_v34, %v600_v24  ;;  %v1028_v28 = vpop.f32.mrb[10].mxu1  ;;  %v705_v29 = vmax.f32 %v481_v21, 0.0  ;;  %v484_v31 = vadd.f32 %v996_v27, %v1370_v34  ;;  %v475_v33 = vpop.f32.mrb[11].mxu0 }
 0x133   : > { %v737_v30 = vmax.f32 %v609_v22, 0.0  ;;  %v612_v32 = vadd.f32 %v1028_v28, %v1370_v34  ;;  %v603_v35 = vpop.f32.mrb[11].mxu1  ;;  %v703_v36 = vmax.f32 %v473_v25, 0.0  ;;  %v476_v38 = vadd.f32 %v1370_v34, %v475_v33 }
 0x134   : > { %v735_v37 = vmax.f32 %v601_v26, 0.0  ;;  %v604_v39 = vadd.f32 %v1370_v34, %v603_v35  ;;  %770 = vst.msk [vmem:[%s1379_s23 + $0x50] sm:$0xff] %vm759_vm2, %v705_v29  ;;  %v706_v40 = vmax.f32 %v484_v31, 0.0 }
 0x135   : > { %802 = vst.msk [vmem:[%s1379_s23 + $0x150] sm:$0xff] %vm759_vm2, %v737_v30  ;;  %v738_v41 = vmax.f32 %v612_v32, 0.0  ;;  %768 = vst.msk [vmem:[%s1379_s23 + $0x40] sm:$0xff] %vm759_vm2, %v703_v36  ;;  %v704_v42 = vmax.f32 %v476_v38, 0.0 }
 0x136   : > { %800 = vst.msk [vmem:[%s1379_s23 + $0x140] sm:$0xff] %vm759_vm2, %v735_v37  ;;  %v736_v43 = vmax.f32 %v604_v39, 0.0  ;;  %771 = vst.msk [vmem:[%s1379_s23 + $0x58] sm:$0xff] %vm759_vm2, %v706_v40 }
 0x137   : > { %803 = vst.msk [vmem:[%s1379_s23 + $0x158] sm:$0xff] %vm759_vm2, %v738_v41  ;;  %769 = vst.msk [vmem:[%s1379_s23 + $0x48] sm:$0xff] %vm759_vm2, %v704_v42  ;;  %v999_v44 = vpop.f32.mrb[12].mxu0 }
 0x138   : > { %801 = vst.msk [vmem:[%s1379_s23 + $0x148] sm:$0xff] %vm759_vm2, %v736_v43  ;;  %v1031_v45 = vpop.f32.mrb[12].mxu1  ;;  %v497_v46 = vadd.f32 %v999_v44, %v1370_v34  ;;  %v488_v48 = vpop.f32.mrb[13].mxu0 }
 0x139   : > { %v625_v47 = vadd.f32 %v1031_v45, %v1370_v34  ;;  %v616_v49 = vpop.f32.mrb[13].mxu1  ;;  %v489_v50 = vadd.f32 %v1370_v34, %v488_v48  ;;  %v1000_v52 = vpop.f32.mrb[14].mxu0 }
 0x13a   : > { %v617_v51 = vadd.f32 %v1370_v34, %v616_v49  ;;  %v1032_v53 = vpop.f32.mrb[14].mxu1  ;;  %v709_v54 = vmax.f32 %v497_v46, 0.0  ;;  %v500_v56 = vadd.f32 %v1000_v52, %v1370_v34  ;;  %v491_v58 = vpop.f32.mrb[15].mxu0 }
 0x13b   : > { %v741_v55 = vmax.f32 %v625_v47, 0.0  ;;  %v628_v57 = vadd.f32 %v1032_v53, %v1370_v34  ;;  %v619_v59 = vpop.f32.mrb[15].mxu1  ;;  %v707_v60 = vmax.f32 %v489_v50, 0.0  ;;  %v492_v62 = vadd.f32 %v1370_v34, %v491_v58 }
 0x13c   : > { %v739_v61 = vmax.f32 %v617_v51, 0.0  ;;  %v620_v63 = vadd.f32 %v1370_v34, %v619_v59  ;;  %774 = vst.msk [vmem:[%s1379_s23 + $0x70] sm:$0xff] %vm759_vm2, %v709_v54  ;;  %v710_v0 = vmax.f32 %v500_v56, 0.0 }
 0x13d   : > { %806 = vst.msk [vmem:[%s1379_s23 + $0x170] sm:$0xff] %vm759_vm2, %v741_v55  ;;  %v742_v1 = vmax.f32 %v628_v57, 0.0  ;;  %772 = vst.msk [vmem:[%s1379_s23 + $0x60] sm:$0xff] %vm759_vm2, %v707_v60  ;;  %v708_v2 = vmax.f32 %v492_v62, 0.0 }
 0x13e   : > { %804 = vst.msk [vmem:[%s1379_s23 + $0x160] sm:$0xff] %vm759_vm2, %v739_v61  ;;  %v740_v3 = vmax.f32 %v620_v63, 0.0  ;;  %775 = vst.msk [vmem:[%s1379_s23 + $0x78] sm:$0xff] %vm759_vm2, %v710_v0 }
 0x13f   : > { %807 = vst.msk [vmem:[%s1379_s23 + $0x178] sm:$0xff] %vm759_vm2, %v742_v1  ;;  %773 = vst.msk [vmem:[%s1379_s23 + $0x68] sm:$0xff] %vm759_vm2, %v708_v2  ;;  %v1003_v4 = vpop.f32.mrb[16].mxu0 }
 0x140   : > { %805 = vst.msk [vmem:[%s1379_s23 + $0x168] sm:$0xff] %vm759_vm2, %v740_v3  ;;  %v1035_v5 = vpop.f32.mrb[16].mxu1  ;;  %v513_v6 = vadd.f32 %v1003_v4, %v1370_v34  ;;  %v504_v8 = vpop.f32.mrb[17].mxu0 }
 0x141   : > { %v641_v7 = vadd.f32 %v1035_v5, %v1370_v34  ;;  %v632_v9 = vpop.f32.mrb[17].mxu1  ;;  %v505_v10 = vadd.f32 %v1370_v34, %v504_v8  ;;  %v1004_v12 = vpop.f32.mrb[18].mxu0 }
 0x142   : > { %v633_v11 = vadd.f32 %v1370_v34, %v632_v9  ;;  %v1036_v13 = vpop.f32.mrb[18].mxu1  ;;  %v713_v14 = vmax.f32 %v513_v6, 0.0  ;;  %v516_v16 = vadd.f32 %v1004_v12, %v1370_v34  ;;  %v507_v18 = vpop.f32.mrb[19].mxu0 }
 0x143   : > { %v745_v15 = vmax.f32 %v641_v7, 0.0  ;;  %v644_v17 = vadd.f32 %v1036_v13, %v1370_v34  ;;  %v635_v19 = vpop.f32.mrb[19].mxu1  ;;  %v711_v20 = vmax.f32 %v505_v10, 0.0  ;;  %v508_v22 = vadd.f32 %v1370_v34, %v507_v18 }
 0x144   : > { %v743_v21 = vmax.f32 %v633_v11, 0.0  ;;  %v636_v23 = vadd.f32 %v1370_v34, %v635_v19  ;;  %778 = vst.msk [vmem:[%s1379_s23 + $0x90] sm:$0xff] %vm759_vm2, %v713_v14  ;;  %v714_v24 = vmax.f32 %v516_v16, 0.0 }
 0x145   : > { %810 = vst.msk [vmem:[%s1379_s23 + $0x190] sm:$0xff] %vm759_vm2, %v745_v15  ;;  %v746_v25 = vmax.f32 %v644_v17, 0.0  ;;  %776 = vst.msk [vmem:[%s1379_s23 + $0x80] sm:$0xff] %vm759_vm2, %v711_v20  ;;  %v712_v26 = vmax.f32 %v508_v22, 0.0 }
 0x146   : > { %808 = vst.msk [vmem:[%s1379_s23 + $0x180] sm:$0xff] %vm759_vm2, %v743_v21  ;;  %v744_v27 = vmax.f32 %v636_v23, 0.0  ;;  %779 = vst.msk [vmem:[%s1379_s23 + $0x98] sm:$0xff] %vm759_vm2, %v714_v24 }
 0x147   : > { %811 = vst.msk [vmem:[%s1379_s23 + $0x198] sm:$0xff] %vm759_vm2, %v746_v25  ;;  %777 = vst.msk [vmem:[%s1379_s23 + $0x88] sm:$0xff] %vm759_vm2, %v712_v26  ;;  %v1007_v28 = vpop.f32.mrb[20].mxu0 }
 0x148   : > { %809 = vst.msk [vmem:[%s1379_s23 + $0x188] sm:$0xff] %vm759_vm2, %v744_v27  ;;  %v1039_v29 = vpop.f32.mrb[20].mxu1  ;;  %v529_v30 = vadd.f32 %v1007_v28, %v1370_v34  ;;  %v520_v32 = vpop.f32.mrb[21].mxu0 }
 0x149   : > { %v657_v31 = vadd.f32 %v1039_v29, %v1370_v34  ;;  %v648_v33 = vpop.f32.mrb[21].mxu1  ;;  %v521_v35 = vadd.f32 %v1370_v34, %v520_v32  ;;  %v1008_v37 = vpop.f32.mrb[22].mxu0 }
 0x14a   : > { %v649_v36 = vadd.f32 %v1370_v34, %v648_v33  ;;  %v1040_v38 = vpop.f32.mrb[22].mxu1  ;;  %v717_v39 = vmax.f32 %v529_v30, 0.0  ;;  %v532_v41 = vadd.f32 %v1008_v37, %v1370_v34  ;;  %v523_v43 = vpop.f32.mrb[23].mxu0 }
 0x14b   : > { %v749_v40 = vmax.f32 %v657_v31, 0.0  ;;  %v660_v42 = vadd.f32 %v1040_v38, %v1370_v34  ;;  %v651_v44 = vpop.f32.mrb[23].mxu1  ;;  %v715_v45 = vmax.f32 %v521_v35, 0.0  ;;  %v524_v47 = vadd.f32 %v1370_v34, %v523_v43 }
 0x14c   : > { %v747_v46 = vmax.f32 %v649_v36, 0.0  ;;  %v652_v48 = vadd.f32 %v1370_v34, %v651_v44  ;;  %782 = vst.msk [vmem:[%s1379_s23 + $0xb0] sm:$0xff] %vm759_vm2, %v717_v39  ;;  %v718_v49 = vmax.f32 %v532_v41, 0.0 }
 0x14d   : > { %814 = vst.msk [vmem:[%s1379_s23 + $0x1b0] sm:$0xff] %vm759_vm2, %v749_v40  ;;  %v750_v50 = vmax.f32 %v660_v42, 0.0  ;;  %780 = vst.msk [vmem:[%s1379_s23 + $0xa0] sm:$0xff] %vm759_vm2, %v715_v45  ;;  %v716_v51 = vmax.f32 %v524_v47, 0.0 }
 0x14e   : > { %812 = vst.msk [vmem:[%s1379_s23 + $0x1a0] sm:$0xff] %vm759_vm2, %v747_v46  ;;  %v748_v52 = vmax.f32 %v652_v48, 0.0  ;;  %783 = vst.msk [vmem:[%s1379_s23 + $0xb8] sm:$0xff] %vm759_vm2, %v718_v49 }
 0x14f   : > { %815 = vst.msk [vmem:[%s1379_s23 + $0x1b8] sm:$0xff] %vm759_vm2, %v750_v50  ;;  %781 = vst.msk [vmem:[%s1379_s23 + $0xa8] sm:$0xff] %vm759_vm2, %v716_v51  ;;  %v1011_v53 = vpop.f32.mrb[24].mxu0 }
 0x150   : > { %813 = vst.msk [vmem:[%s1379_s23 + $0x1a8] sm:$0xff] %vm759_vm2, %v748_v52  ;;  %v1043_v54 = vpop.f32.mrb[24].mxu1  ;;  %v545_v55 = vadd.f32 %v1011_v53, %v1370_v34  ;;  %v536_v57 = vpop.f32.mrb[25].mxu0 }
 0x151   : > { %v673_v56 = vadd.f32 %v1043_v54, %v1370_v34  ;;  %v664_v58 = vpop.f32.mrb[25].mxu1  ;;  %v537_v59 = vadd.f32 %v1370_v34, %v536_v57  ;;  %v1012_v61 = vpop.f32.mrb[26].mxu0 }
 0x152   : > { %v665_v60 = vadd.f32 %v1370_v34, %v664_v58  ;;  %v1044_v62 = vpop.f32.mrb[26].mxu1  ;;  %v721_v63 = vmax.f32 %v545_v55, 0.0  ;;  %v548_v1 = vadd.f32 %v1012_v61, %v1370_v34  ;;  %v539_v3 = vpop.f32.mrb[27].mxu0 }
 0x153   : > { %v753_v0 = vmax.f32 %v673_v56, 0.0  ;;  %v676_v2 = vadd.f32 %v1044_v62, %v1370_v34  ;;  %v667_v4 = vpop.f32.mrb[27].mxu1  ;;  %v719_v5 = vmax.f32 %v537_v59, 0.0  ;;  %v540_v7 = vadd.f32 %v1370_v34, %v539_v3 }
 0x154   : > { %v751_v6 = vmax.f32 %v665_v60, 0.0  ;;  %v668_v8 = vadd.f32 %v1370_v34, %v667_v4  ;;  %786 = vst.msk [vmem:[%s1379_s23 + $0xd0] sm:$0xff] %vm759_vm2, %v721_v63  ;;  %v722_v9 = vmax.f32 %v548_v1, 0.0 }
 0x155   : > { %818 = vst.msk [vmem:[%s1379_s23 + $0x1d0] sm:$0xff] %vm759_vm2, %v753_v0  ;;  %v754_v10 = vmax.f32 %v676_v2, 0.0  ;;  %784 = vst.msk [vmem:[%s1379_s23 + $0xc0] sm:$0xff] %vm759_vm2, %v719_v5  ;;  %v720_v11 = vmax.f32 %v540_v7, 0.0 }
 0x156   : > { %816 = vst.msk [vmem:[%s1379_s23 + $0x1c0] sm:$0xff] %vm759_vm2, %v751_v6  ;;  %v752_v12 = vmax.f32 %v668_v8, 0.0  ;;  %787 = vst.msk [vmem:[%s1379_s23 + $0xd8] sm:$0xff] %vm759_vm2, %v722_v9 }
 0x157   : > { %819 = vst.msk [vmem:[%s1379_s23 + $0x1d8] sm:$0xff] %vm759_vm2, %v754_v10  ;;  %785 = vst.msk [vmem:[%s1379_s23 + $0xc8] sm:$0xff] %vm759_vm2, %v720_v11  ;;  %v1015_v13 = vpop.f32.mrb[28].mxu0 }
 0x158   : > { %817 = vst.msk [vmem:[%s1379_s23 + $0x1c8] sm:$0xff] %vm759_vm2, %v752_v12  ;;  %v1047_v14 = vpop.f32.mrb[28].mxu1  ;;  %v561_v15 = vadd.f32 %v1015_v13, %v1370_v34  ;;  %v552_v17 = vpop.f32.mrb[29].mxu0 }
 0x159   : > { %v689_v16 = vadd.f32 %v1047_v14, %v1370_v34  ;;  %v680_v18 = vpop.f32.mrb[29].mxu1  ;;  %v553_v19 = vadd.f32 %v1370_v34, %v552_v17  ;;  %v1016_v21 = vpop.f32.mrb[30].mxu0 }
 0x15a   : > { %v681_v20 = vadd.f32 %v1370_v34, %v680_v18  ;;  %v1048_v22 = vpop.f32.mrb[30].mxu1  ;;  %v725_v23 = vmax.f32 %v561_v15, 0.0  ;;  %v564_v25 = vadd.f32 %v1016_v21, %v1370_v34  ;;  %v555_v27 = vpop.f32.mrb[31].mxu0 }
 0x15b   : > { %v757_v24 = vmax.f32 %v689_v16, 0.0  ;;  %v692_v26 = vadd.f32 %v1048_v22, %v1370_v34  ;;  %v683_v28 = vpop.f32.mrb[31].mxu1  ;;  %v723_v29 = vmax.f32 %v553_v19, 0.0  ;;  %v556_v31 = vadd.f32 %v1370_v34, %v555_v27 }
 0x15c   : > { %v755_v30 = vmax.f32 %v681_v20, 0.0  ;;  %v684_v32 = vadd.f32 %v1370_v34, %v683_v28  ;;  %790 = vst.msk [vmem:[%s1379_s23 + $0xf0] sm:$0xff] %vm759_vm2, %v725_v23  ;;  %v726_v33 = vmax.f32 %v564_v25, 0.0 }
 0x15d   : > { %822 = vst.msk [vmem:[%s1379_s23 + $0x1f0] sm:$0xff] %vm759_vm2, %v757_v24  ;;  %v758_v35 = vmax.f32 %v692_v26, 0.0  ;;  %788 = vst.msk [vmem:[%s1379_s23 + $0xe0] sm:$0xff] %vm759_vm2, %v723_v29  ;;  %v724_v36 = vmax.f32 %v556_v31, 0.0 }
 0x15e   : > { %820 = vst.msk [vmem:[%s1379_s23 + $0x1e0] sm:$0xff] %vm759_vm2, %v755_v30  ;;  %v756_v37 = vmax.f32 %v684_v32, 0.0  ;;  %791 = vst.msk [vmem:[%s1379_s23 + $0xf8] sm:$0xff] %vm759_vm2, %v726_v33 }
 0x15f   : > { %823 = vst.msk [vmem:[%s1379_s23 + $0x1f8] sm:$0xff] %vm759_vm2, %v758_v35  ;;  %789 = vst.msk [vmem:[%s1379_s23 + $0xe8] sm:$0xff] %vm759_vm2, %v724_v36 }
 0x160   : > { %821 = vst.msk [vmem:[%s1379_s23 + $0x1e8] sm:$0xff] %vm759_vm2, %v756_v37 }
 0x161 PF: > { %s15_s12 = sadd.s32 1, %s1152_s12  }
 0x162   : > { %p12_p5 = scmp.ge.s32.totalorder %s15_s12, 4  }
 0x164   :  { %14 = sbr.rel (!%p12_p5) target bundleno = 2 (0x2), region = 71 }
 0x16b   :  { %846 = vsyncpa [#allocation3], 1 }
 0x16c   :  { %848 = vsyncpa [#allocation3 + $0x1], 1 }
 0x16d   :  { %849 = vsyncpa [#allocation5], 1 }

// kernel: _raft_forward.14
= control target key start
LH: loop header
LB: loop body
LE: loop exit
PB: predicated region body
PF: predicated region fallthrough
CT: control target
= control target key end

     0   :  { %s1037_s12 = smov 0   ;;  %s1361_s0 = inlined_call_operand.vmem [shape: f32[1024,8], index: 0, kind: input, shape index: {}]   ;;  %s1362_s1 = inlined_call_operand.vmem [shape: bf16[8,32], index: 1, kind: input, shape index: {}]   ;;  %s1363_s2 = inlined_call_operand.vmem [shape: f32[1,32], index: 2, kind: input, shape index: {}]   ;;  %s1364_s3 = inlined_call_operand.vmem [shape: f32[1024,32], index: 3, kind: output, shape index: {}]  }
   0x1 LB: > { %s854_s13 = sadd.s32 4294967295, %s1015_s12   ;;  %p858_p0 = scmp.ge.s32.totalorder %s1015_s12, 1  ;;  %s1015_s12 = sphi %s1037_s12, %s13_s12  }
   0x2   : > { %p138_p1 = scmp.lt.s32.totalorder %s1015_s12, 3 }
   0x4   : > { %p139_p2 = pnand %p858_p0, %p138_p1 }
   0x5   : > { %v271_v0 = vld [vmem:[%s1362_s1] sm:$0xf] (!%p139_p2)  ;;  %vm376_vm0 = vcmask (!%p139_p2), 1043456   ;;  %s859_s16 = sshll.u32 (!%p139_p2), %s854_s13, 6  ;;  %vm279_vm1 = vcmask (!%p139_p2), 64512   ;;  %vm733_vm2 = vcmask (!%p139_p2), 261120  }
   0x6   : > { %142 = sbr.rel (%p139_p2) target bundleno = 297 (0x129), region = 32  ;;  %999 = vmatprep.subr.msk.bf16.mxu0 (!%p139_p2), %vm376_vm0, %v271_v0  ;;  %1000 = vmatprep.subr.msk.bf16.mxu1 (!%p139_p2), %vm376_vm0, %v271_v0  ;;  %v378_v1 = vsel (!%p139_p2), %vm376_vm0, %v271_v0, 0  ;;  %p163_p3 = scmp.lt.s32.totalorder (!%p139_p2), %s859_s16, 127 }
   0x7   : > { %932 = vmatpush3.bf16.msra.mxu0 (!%p139_p2), %v378_v1  ;;  %998 = vmatpush3.bf16.msra.mxu1 (!%p139_p2), %v378_v1 }
   0xd   : > { %s1366_s16 = smov (!%p163_p3, %s859_s16), 127 }
   0xe   : > { %s860_s17 = sshll.u32 %s1366_s16, 3 }
   0xf   : > { %s1056_s20 = scalar_lea.vmem %s1361_s0, %s860_s17  ;;  %s1165_s25 = scalar_lea.vmem %s1364_s3, %s860_s17 }
  0x10   : > { %v175_v2 = vld [vmem:[%s1056_s20] sm:$0xff]  ;;  %v176_v3 = vld [vmem:[%s1056_s20 + $0x8] sm:$0xff]  ;;  %v177_v7 = vld [vmem:[%s1056_s20 + $0x10] sm:$0xff] }
  0x11   : > { %v207_v4 = vld [vmem:[%s1056_s20 + $0x100] sm:$0xff]  ;;  %v239_v5 = vpack.c.bf16 %v176_v3, %v175_v2  ;;  %v208_v6 = vld [vmem:[%s1056_s20 + $0x108] sm:$0xff]  ;;  %v178_v8 = vld [vmem:[%s1056_s20 + $0x18] sm:$0xff] }
  0x12   : > { %v255_v9 = vpack.c.bf16 %v208_v6, %v207_v4  ;;  %v240_v10 = vpack.c.bf16 %v178_v8, %v177_v7  ;;  %v209_v11 = vld [vmem:[%s1056_s20 + $0x110] sm:$0xff]  ;;  %v210_v12 = vld [vmem:[%s1056_s20 + $0x118] sm:$0xff]  ;;  %v179_v13 = vld [vmem:[%s1056_s20 + $0x20] sm:$0xff] }
  0x13   : > { %933 = vmatprep.mubr.msk.bf16.mxu0 %vm279_vm1, %v239_v5  ;;  %v256_v14 = vpack.c.bf16 %v210_v12, %v209_v11  ;;  %v180_v15 = vld [vmem:[%s1056_s20 + $0x28] sm:$0xff]  ;;  %v211_v16 = vld [vmem:[%s1056_s20 + $0x120] sm:$0xff]  ;;  %v181_v20 = vld [vmem:[%s1056_s20 + $0x30] sm:$0xff] }
  0x14   : > { %v212_v17 = vld [vmem:[%s1056_s20 + $0x128] sm:$0xff]  ;;  %965 = vmatprep.mubr.msk.bf16.mxu1 %vm279_vm1, %v255_v9  ;;  %934 = vmatmul.mubr.msk.bf16.vlgmr.msra.gmra.mrb[0].mxu0 %vm279_vm1, %v240_v10  ;;  %v241_v18 = vpack.c.bf16 %v180_v15, %v179_v13  ;;  %v182_v21 = vld [vmem:[%s1056_s20 + $0x38] sm:$0xff]  ;;  %v213_v22 = vld [vmem:[%s1056_s20 + $0x130] sm:$0xff] }
  0x15   : > { %v257_v19 = vpack.c.bf16 %v212_v17, %v211_v16  ;;  %966 = vmatmul.mubr.msk.bf16.vlgmr.msra.gmra.mrb[0].mxu1 %vm279_vm1, %v256_v14  ;;  %v214_v23 = vld [vmem:[%s1056_s20 + $0x138] sm:$0xff]  ;;  %v183_v24 = vld [vmem:[%s1056_s20 + $0x40] sm:$0xff]  ;;  %v184_v25 = vld [vmem:[%s1056_s20 + $0x48] sm:$0xff]  ;;  %v242_v28 = vpack.c.bf16 %v182_v21, %v181_v20 }
  0x16   : > { %937 = vmatprep.mubr.msk.bf16.mxu0 %vm279_vm1, %v241_v18  ;;  %v215_v26 = vld [vmem:[%s1056_s20 + $0x140] sm:$0xff]  ;;  %v216_v27 = vld [vmem:[%s1056_s20 + $0x148] sm:$0xff]  ;;  %v258_v29 = vpack.c.bf16 %v214_v23, %v213_v22  ;;  %v243_v30 = vpack.c.bf16 %v184_v25, %v183_v24  ;;  %v185_v32 = vld [vmem:[%s1056_s20 + $0x50] sm:$0xff] }
  0x17   : > { %969 = vmatprep.mubr.msk.bf16.mxu1 %vm279_vm1, %v257_v19  ;;  %v259_v31 = vpack.c.bf16 %v216_v27, %v215_v26  ;;  %v186_v33 = vld [vmem:[%s1056_s20 + $0x58] sm:$0xff]  ;;  %v217_v34 = vld [vmem:[%s1056_s20 + $0x150] sm:$0xff]  ;;  %v187_v36 = vld [vmem:[%s1056_s20 + $0x60] sm:$0xff] }
  0x18   : > { %v218_v35 = vld [vmem:[%s1056_s20 + $0x158] sm:$0xff]  ;;  %v188_v37 = vld [vmem:[%s1056_s20 + $0x68] sm:$0xff]  ;;  %v219_v38 = vld [vmem:[%s1056_s20 + $0x160] sm:$0xff]  ;;  %v244_v40 = vpack.c.bf16 %v186_v33, %v185_v32 }
  0x19   : > { %v220_v39 = vld [vmem:[%s1056_s20 + $0x168] sm:$0xff]  ;;  %v260_v41 = vpack.c.bf16 %v218_v35, %v217_v34  ;;  %v245_v42 = vpack.c.bf16 %v188_v37, %v187_v36  ;;  %v189_v44 = vld [vmem:[%s1056_s20 + $0x70] sm:$0xff]  ;;  %v190_v45 = vld [vmem:[%s1056_s20 + $0x78] sm:$0xff] }
  0x1a   : > { %v261_v43 = vpack.c.bf16 %v220_v39, %v219_v38  ;;  %v221_v46 = vld [vmem:[%s1056_s20 + $0x170] sm:$0xff]  ;;  %v222_v47 = vld [vmem:[%s1056_s20 + $0x178] sm:$0xff]  ;;  %v191_v48 = vld [vmem:[%s1056_s20 + $0x80] sm:$0xff]  ;;  %v246_v52 = vpack.c.bf16 %v190_v45, %v189_v44 }
  0x1b   : > { %v192_v49 = vld [vmem:[%s1056_s20 + $0x88] sm:$0xff]  ;;  %v223_v50 = vld [vmem:[%s1056_s20 + $0x180] sm:$0xff]  ;;  %v262_v53 = vpack.c.bf16 %v222_v47, %v221_v46  ;;  %v193_v56 = vld [vmem:[%s1056_s20 + $0x90] sm:$0xff] }
  0x1c   : > { %938 = vmatmul.mubr.msk.bf16.gmra.mrb[4].mxu0 %vm279_vm1, %v242_v28  ;;  %v224_v51 = vld [vmem:[%s1056_s20 + $0x188] sm:$0xff]  ;;  %v247_v54 = vpack.c.bf16 %v192_v49, %v191_v48  ;;  %v194_v57 = vld [vmem:[%s1056_s20 + $0x98] sm:$0xff]  ;;  %v225_v58 = vld [vmem:[%s1056_s20 + $0x190] sm:$0xff] }
  0x1d   : > { %970 = vmatmul.mubr.msk.bf16.gmra.mrb[4].mxu1 %vm279_vm1, %v258_v29  ;;  %941 = vmatprep.mubr.msk.bf16.mxu0 %vm279_vm1, %v243_v30  ;;  %v263_v55 = vpack.c.bf16 %v224_v51, %v223_v50  ;;  %v226_v59 = vld [vmem:[%s1056_s20 + $0x198] sm:$0xff]  ;;  %v195_v60 = vld [vmem:[%s1056_s20 + $0xa0] sm:$0xff]  ;;  %v196_v61 = vld [vmem:[%s1056_s20 + $0xa8] sm:$0xff]  ;;  %v248_v0 = vpack.c.bf16 %v194_v57, %v193_v56 }
  0x1e   : > { %973 = vmatprep.mubr.msk.bf16.mxu1 %vm279_vm1, %v259_v31  ;;  %v227_v62 = vld [vmem:[%s1056_s20 + $0x1a0] sm:$0xff]  ;;  %v228_v63 = vld [vmem:[%s1056_s20 + $0x1a8] sm:$0xff]  ;;  %v264_v1 = vpack.c.bf16 %v226_v59, %v225_v58  ;;  %v249_v2 = vpack.c.bf16 %v196_v61, %v195_v60  ;;  %v197_v4 = vld [vmem:[%s1056_s20 + $0xb0] sm:$0xff] }
  0x1f   : > { %v265_v3 = vpack.c.bf16 %v228_v63, %v227_v62  ;;  %v198_v5 = vld [vmem:[%s1056_s20 + $0xb8] sm:$0xff]  ;;  %v229_v6 = vld [vmem:[%s1056_s20 + $0x1b0] sm:$0xff]  ;;  %v199_v8 = vld [vmem:[%s1056_s20 + $0xc0] sm:$0xff] }
  0x20   : > { %v230_v7 = vld [vmem:[%s1056_s20 + $0x1b8] sm:$0xff]  ;;  %v200_v9 = vld [vmem:[%s1056_s20 + $0xc8] sm:$0xff]  ;;  %v231_v10 = vld [vmem:[%s1056_s20 + $0x1c0] sm:$0xff]  ;;  %v250_v12 = vpack.c.bf16 %v198_v5, %v197_v4 }
  0x21   : > { %v232_v11 = vld [vmem:[%s1056_s20 + $0x1c8] sm:$0xff]  ;;  %v266_v13 = vpack.c.bf16 %v230_v7, %v229_v6  ;;  %v251_v14 = vpack.c.bf16 %v200_v9, %v199_v8  ;;  %v201_v16 = vld [vmem:[%s1056_s20 + $0xd0] sm:$0xff]  ;;  %v202_v17 = vld [vmem:[%s1056_s20 + $0xd8] sm:$0xff] }
  0x22   : > { %v267_v15 = vpack.c.bf16 %v232_v11, %v231_v10  ;;  %v233_v18 = vld [vmem:[%s1056_s20 + $0x1d0] sm:$0xff]  ;;  %v234_v19 = vld [vmem:[%s1056_s20 + $0x1d8] sm:$0xff]  ;;  %v203_v20 = vld [vmem:[%s1056_s20 + $0xe0] sm:$0xff]  ;;  %v252_v24 = vpack.c.bf16 %v202_v17, %v201_v16 }
  0x23   : > { %v204_v21 = vld [vmem:[%s1056_s20 + $0xe8] sm:$0xff]  ;;  %v235_v22 = vld [vmem:[%s1056_s20 + $0x1e0] sm:$0xff]  ;;  %v268_v25 = vpack.c.bf16 %v234_v19, %v233_v18  ;;  %v205_v28 = vld [vmem:[%s1056_s20 + $0xf0] sm:$0xff] }
  0x24   : > { %942 = vmatmul.mubr.msk.bf16.gmra.mrb[8].mxu0 %vm279_vm1, %v244_v40  ;;  %v236_v23 = vld [vmem:[%s1056_s20 + $0x1e8] sm:$0xff]  ;;  %v253_v26 = vpack.c.bf16 %v204_v21, %v203_v20  ;;  %v206_v29 = vld [vmem:[%s1056_s20 + $0xf8] sm:$0xff]  ;;  %v237_v30 = vld [vmem:[%s1056_s20 + $0x1f0] sm:$0xff] }
  0x25   : > { %974 = vmatmul.mubr.msk.bf16.gmra.mrb[8].mxu1 %vm279_vm1, %v260_v41  ;;  %945 = vmatprep.mubr.msk.bf16.mxu0 %vm279_vm1, %v245_v42  ;;  %v269_v27 = vpack.c.bf16 %v236_v23, %v235_v22  ;;  %v238_v31 = vld [vmem:[%s1056_s20 + $0x1f8] sm:$0xff]  ;;  %v254_v32 = vpack.c.bf16 %v206_v29, %v205_v28  ;;  %v1157_v34 = vld [vmem:[%s1363_s2] ss:$0 sm:$0xff] }
  0x26   : > { %977 = vmatprep.mubr.msk.bf16.mxu1 %vm279_vm1, %v261_v43  ;;  %v270_v33 = vpack.c.bf16 %v238_v31, %v237_v30 }
  0x2c   : > { %946 = vmatmul.mubr.msk.bf16.gmra.mrb[12].mxu0 %vm279_vm1, %v246_v52 }
  0x2d   : > { %978 = vmatmul.mubr.msk.bf16.gmra.mrb[12].mxu1 %vm279_vm1, %v262_v53  ;;  %949 = vmatprep.mubr.msk.bf16.mxu0 %vm279_vm1, %v247_v54 }
  0x2e   : > { %981 = vmatprep.mubr.msk.bf16.mxu1 %vm279_vm1, %v263_v55 }
  0x34   : > { %950 = vmatmul.mubr.msk.bf16.gmra.mrb[16].mxu0 %vm279_vm1, %v248_v0 }
  0x35   : > { %982 = vmatmul.mubr.msk.bf16.gmra.mrb[16].mxu1 %vm279_vm1, %v264_v1  ;;  %953 = vmatprep.mubr.msk.bf16.mxu0 %vm279_vm1, %v249_v2 }
  0x36   : > { %985 = vmatprep.mubr.msk.bf16.mxu1 %vm279_vm1, %v265_v3 }
  0x3c   : > { %954 = vmatmul.mubr.msk.bf16.gmra.mrb[20].mxu0 %vm279_vm1, %v250_v12 }
  0x3d   : > { %986 = vmatmul.mubr.msk.bf16.gmra.mrb[20].mxu1 %vm279_vm1, %v266_v13  ;;  %957 = vmatprep.mubr.msk.bf16.mxu0 %vm279_vm1, %v251_v14 }
  0x3e   : > { %989 = vmatprep.mubr.msk.bf16.mxu1 %vm279_vm1, %v267_v15 }
  0x44   : > { %958 = vmatmul.mubr.msk.bf16.gmra.mrb[24].mxu0 %vm279_vm1, %v252_v24 }
  0x45   : > { %990 = vmatmul.mubr.msk.bf16.gmra.mrb[24].mxu1 %vm279_vm1, %v268_v25  ;;  %961 = vmatprep.mubr.msk.bf16.mxu0 %vm279_vm1, %v253_v26 }
  0x46   : > { %993 = vmatprep.mubr.msk.bf16.mxu1 %vm279_vm1, %v269_v27 }
  0x4c   : > { %962 = vmatmul.mubr.msk.bf16.gmra.mrb[28].mxu0 %vm279_vm1, %v254_v32 }
  0x4d   : > { %994 = vmatmul.mubr.msk.bf16.gmra.mrb[28].mxu1 %vm279_vm1, %v270_v33 }
  0xe7   : > { %v935_v35 = vpop.f32.mrb[0].mxu0 }
  0xe8   : > { %v423_v36 = vadd.f32 %v935_v35, %v1157_v34  ;;  %v967_v37 = vpop.f32.mrb[0].mxu1  ;;  %v414_v38 = vpop.f32.mrb[1].mxu0 }
  0xe9   : > { %v551_v39 = vadd.f32 %v967_v37, %v1157_v34  ;;  %v415_v40 = vadd.f32 %v1157_v34, %v414_v38  ;;  %v542_v41 = vpop.f32.mrb[1].mxu1  ;;  %v936_v42 = vpop.f32.mrb[2].mxu0 }
  0xea   : > { %v671_v43 = vmax.f32 %v423_v36, 0.0  ;;  %v543_v44 = vadd.f32 %v1157_v34, %v542_v41  ;;  %v426_v45 = vadd.f32 %v936_v42, %v1157_v34  ;;  %v968_v46 = vpop.f32.mrb[2].mxu1  ;;  %v417_v47 = vpop.f32.mrb[3].mxu0 }
  0xeb   : > { %v703_v48 = vmax.f32 %v551_v39, 0.0  ;;  %v669_v49 = vmax.f32 %v415_v40, 0.0  ;;  %v554_v50 = vadd.f32 %v968_v46, %v1157_v34  ;;  %v418_v51 = vadd.f32 %v1157_v34, %v417_v47  ;;  %v545_v52 = vpop.f32.mrb[3].mxu1 }
  0xec   : > { %736 = vst.msk [vmem:[%s1165_s25 + $0x10] sm:$0xff] %vm733_vm2, %v671_v43  ;;  %v701_v53 = vmax.f32 %v543_v44, 0.0  ;;  %v672_v54 = vmax.f32 %v426_v45, 0.0  ;;  %v546_v55 = vadd.f32 %v1157_v34, %v545_v52 }
  0xed   : > { %768 = vst.msk [vmem:[%s1165_s25 + $0x110] sm:$0xff] %vm733_vm2, %v703_v48  ;;  %734 = vst.msk [vmem:[%s1165_s25] sm:$0xff] %vm733_vm2, %v669_v49  ;;  %v704_v56 = vmax.f32 %v554_v50, 0.0  ;;  %v670_v57 = vmax.f32 %v418_v51, 0.0 }
  0xee   : > { %766 = vst.msk [vmem:[%s1165_s25 + $0x100] sm:$0xff] %vm733_vm2, %v701_v53  ;;  %737 = vst.msk [vmem:[%s1165_s25 + $0x18] sm:$0xff] %vm733_vm2, %v672_v54  ;;  %v702_v58 = vmax.f32 %v546_v55, 0.0 }
  0xef   : > { %769 = vst.msk [vmem:[%s1165_s25 + $0x118] sm:$0xff] %vm733_vm2, %v704_v56  ;;  %735 = vst.msk [vmem:[%s1165_s25 + $0x8] sm:$0xff] %vm733_vm2, %v670_v57  ;;  %v939_v59 = vpop.f32.mrb[4].mxu0 }
  0xf0   : > { %767 = vst.msk [vmem:[%s1165_s25 + $0x108] sm:$0xff] %vm733_vm2, %v702_v58  ;;  %v439_v60 = vadd.f32 %v939_v59, %v1157_v34  ;;  %v971_v61 = vpop.f32.mrb[4].mxu1  ;;  %v430_v62 = vpop.f32.mrb[5].mxu0 }
  0xf1   : > { %v567_v63 = vadd.f32 %v971_v61, %v1157_v34  ;;  %v431_v0 = vadd.f32 %v1157_v34, %v430_v62  ;;  %v558_v1 = vpop.f32.mrb[5].mxu1  ;;  %v940_v2 = vpop.f32.mrb[6].mxu0 }
  0xf2   : > { %v675_v3 = vmax.f32 %v439_v60, 0.0  ;;  %v559_v4 = vadd.f32 %v1157_v34, %v558_v1  ;;  %v442_v5 = vadd.f32 %v940_v2, %v1157_v34  ;;  %v972_v6 = vpop.f32.mrb[6].mxu1  ;;  %v433_v7 = vpop.f32.mrb[7].mxu0 }
  0xf3   : > { %v707_v8 = vmax.f32 %v567_v63, 0.0  ;;  %v673_v9 = vmax.f32 %v431_v0, 0.0  ;;  %v570_v10 = vadd.f32 %v972_v6, %v1157_v34  ;;  %v434_v11 = vadd.f32 %v1157_v34, %v433_v7  ;;  %v561_v12 = vpop.f32.mrb[7].mxu1 }
  0xf4   : > { %740 = vst.msk [vmem:[%s1165_s25 + $0x30] sm:$0xff] %vm733_vm2, %v675_v3  ;;  %v705_v13 = vmax.f32 %v559_v4, 0.0  ;;  %v676_v14 = vmax.f32 %v442_v5, 0.0  ;;  %v562_v15 = vadd.f32 %v1157_v34, %v561_v12 }
  0xf5   : > { %772 = vst.msk [vmem:[%s1165_s25 + $0x130] sm:$0xff] %vm733_vm2, %v707_v8  ;;  %738 = vst.msk [vmem:[%s1165_s25 + $0x20] sm:$0xff] %vm733_vm2, %v673_v9  ;;  %v708_v16 = vmax.f32 %v570_v10, 0.0  ;;  %v674_v17 = vmax.f32 %v434_v11, 0.0 }
  0xf6   : > { %770 = vst.msk [vmem:[%s1165_s25 + $0x120] sm:$0xff] %vm733_vm2, %v705_v13  ;;  %741 = vst.msk [vmem:[%s1165_s25 + $0x38] sm:$0xff] %vm733_vm2, %v676_v14  ;;  %v706_v18 = vmax.f32 %v562_v15, 0.0 }
  0xf7   : > { %773 = vst.msk [vmem:[%s1165_s25 + $0x138] sm:$0xff] %vm733_vm2, %v708_v16  ;;  %739 = vst.msk [vmem:[%s1165_s25 + $0x28] sm:$0xff] %vm733_vm2, %v674_v17  ;;  %v943_v19 = vpop.f32.mrb[8].mxu0 }
  0xf8   : > { %771 = vst.msk [vmem:[%s1165_s25 + $0x128] sm:$0xff] %vm733_vm2, %v706_v18  ;;  %v455_v20 = vadd.f32 %v943_v19, %v1157_v34  ;;  %v975_v21 = vpop.f32.mrb[8].mxu1  ;;  %v446_v22 = vpop.f32.mrb[9].mxu0 }
  0xf9   : > { %v583_v23 = vadd.f32 %v975_v21, %v1157_v34  ;;  %v447_v24 = vadd.f32 %v1157_v34, %v446_v22  ;;  %v574_v25 = vpop.f32.mrb[9].mxu1  ;;  %v944_v26 = vpop.f32.mrb[10].mxu0 }
  0xfa   : > { %v679_v27 = vmax.f32 %v455_v20, 0.0  ;;  %v575_v28 = vadd.f32 %v1157_v34, %v574_v25  ;;  %v458_v29 = vadd.f32 %v944_v26, %v1157_v34  ;;  %v976_v30 = vpop.f32.mrb[10].mxu1  ;;  %v449_v31 = vpop.f32.mrb[11].mxu0 }
  0xfb   : > { %v711_v32 = vmax.f32 %v583_v23, 0.0  ;;  %v677_v33 = vmax.f32 %v447_v24, 0.0  ;;  %v586_v35 = vadd.f32 %v976_v30, %v1157_v34  ;;  %v450_v36 = vadd.f32 %v1157_v34, %v449_v31  ;;  %v577_v37 = vpop.f32.mrb[11].mxu1 }
  0xfc   : > { %744 = vst.msk [vmem:[%s1165_s25 + $0x50] sm:$0xff] %vm733_vm2, %v679_v27  ;;  %v709_v38 = vmax.f32 %v575_v28, 0.0  ;;  %v680_v39 = vmax.f32 %v458_v29, 0.0  ;;  %v578_v40 = vadd.f32 %v1157_v34, %v577_v37 }
  0xfd   : > { %776 = vst.msk [vmem:[%s1165_s25 + $0x150] sm:$0xff] %vm733_vm2, %v711_v32  ;;  %742 = vst.msk [vmem:[%s1165_s25 + $0x40] sm:$0xff] %vm733_vm2, %v677_v33  ;;  %v712_v41 = vmax.f32 %v586_v35, 0.0  ;;  %v678_v42 = vmax.f32 %v450_v36, 0.0 }
  0xfe   : > { %774 = vst.msk [vmem:[%s1165_s25 + $0x140] sm:$0xff] %vm733_vm2, %v709_v38  ;;  %745 = vst.msk [vmem:[%s1165_s25 + $0x58] sm:$0xff] %vm733_vm2, %v680_v39  ;;  %v710_v43 = vmax.f32 %v578_v40, 0.0 }
  0xff   : > { %777 = vst.msk [vmem:[%s1165_s25 + $0x158] sm:$0xff] %vm733_vm2, %v712_v41  ;;  %743 = vst.msk [vmem:[%s1165_s25 + $0x48] sm:$0xff] %vm733_vm2, %v678_v42  ;;  %v947_v44 = vpop.f32.mrb[12].mxu0 }
 0x100   : > { %775 = vst.msk [vmem:[%s1165_s25 + $0x148] sm:$0xff] %vm733_vm2, %v710_v43  ;;  %v471_v45 = vadd.f32 %v947_v44, %v1157_v34  ;;  %v979_v46 = vpop.f32.mrb[12].mxu1  ;;  %v462_v47 = vpop.f32.mrb[13].mxu0 }
 0x101   : > { %v599_v48 = vadd.f32 %v979_v46, %v1157_v34  ;;  %v463_v49 = vadd.f32 %v1157_v34, %v462_v47  ;;  %v590_v50 = vpop.f32.mrb[13].mxu1  ;;  %v948_v51 = vpop.f32.mrb[14].mxu0 }
 0x102   : > { %v683_v52 = vmax.f32 %v471_v45, 0.0  ;;  %v591_v53 = vadd.f32 %v1157_v34, %v590_v50  ;;  %v474_v54 = vadd.f32 %v948_v51, %v1157_v34  ;;  %v980_v55 = vpop.f32.mrb[14].mxu1  ;;  %v465_v56 = vpop.f32.mrb[15].mxu0 }
 0x103   : > { %v715_v57 = vmax.f32 %v599_v48, 0.0  ;;  %v681_v58 = vmax.f32 %v463_v49, 0.0  ;;  %v602_v59 = vadd.f32 %v980_v55, %v1157_v34  ;;  %v466_v60 = vadd.f32 %v1157_v34, %v465_v56  ;;  %v593_v61 = vpop.f32.mrb[15].mxu1 }
 0x104   : > { %748 = vst.msk [vmem:[%s1165_s25 + $0x70] sm:$0xff] %vm733_vm2, %v683_v52  ;;  %v713_v62 = vmax.f32 %v591_v53, 0.0  ;;  %v684_v63 = vmax.f32 %v474_v54, 0.0  ;;  %v594_v0 = vadd.f32 %v1157_v34, %v593_v61 }
 0x105   : > { %780 = vst.msk [vmem:[%s1165_s25 + $0x170] sm:$0xff] %vm733_vm2, %v715_v57  ;;  %746 = vst.msk [vmem:[%s1165_s25 + $0x60] sm:$0xff] %vm733_vm2, %v681_v58  ;;  %v716_v1 = vmax.f32 %v602_v59, 0.0  ;;  %v682_v2 = vmax.f32 %v466_v60, 0.0 }
 0x106   : > { %778 = vst.msk [vmem:[%s1165_s25 + $0x160] sm:$0xff] %vm733_vm2, %v713_v62  ;;  %749 = vst.msk [vmem:[%s1165_s25 + $0x78] sm:$0xff] %vm733_vm2, %v684_v63  ;;  %v714_v3 = vmax.f32 %v594_v0, 0.0 }
 0x107   : > { %781 = vst.msk [vmem:[%s1165_s25 + $0x178] sm:$0xff] %vm733_vm2, %v716_v1  ;;  %747 = vst.msk [vmem:[%s1165_s25 + $0x68] sm:$0xff] %vm733_vm2, %v682_v2  ;;  %v951_v4 = vpop.f32.mrb[16].mxu0 }
 0x108   : > { %779 = vst.msk [vmem:[%s1165_s25 + $0x168] sm:$0xff] %vm733_vm2, %v714_v3  ;;  %v487_v5 = vadd.f32 %v951_v4, %v1157_v34  ;;  %v983_v6 = vpop.f32.mrb[16].mxu1  ;;  %v478_v7 = vpop.f32.mrb[17].mxu0 }
 0x109   : > { %v615_v8 = vadd.f32 %v983_v6, %v1157_v34  ;;  %v479_v9 = vadd.f32 %v1157_v34, %v478_v7  ;;  %v606_v10 = vpop.f32.mrb[17].mxu1  ;;  %v952_v11 = vpop.f32.mrb[18].mxu0 }
 0x10a   : > { %v687_v12 = vmax.f32 %v487_v5, 0.0  ;;  %v607_v13 = vadd.f32 %v1157_v34, %v606_v10  ;;  %v490_v14 = vadd.f32 %v952_v11, %v1157_v34  ;;  %v984_v15 = vpop.f32.mrb[18].mxu1  ;;  %v481_v16 = vpop.f32.mrb[19].mxu0 }
 0x10b   : > { %v719_v17 = vmax.f32 %v615_v8, 0.0  ;;  %v685_v18 = vmax.f32 %v479_v9, 0.0  ;;  %v618_v19 = vadd.f32 %v984_v15, %v1157_v34  ;;  %v482_v20 = vadd.f32 %v1157_v34, %v481_v16  ;;  %v609_v21 = vpop.f32.mrb[19].mxu1 }
 0x10c   : > { %752 = vst.msk [vmem:[%s1165_s25 + $0x90] sm:$0xff] %vm733_vm2, %v687_v12  ;;  %v717_v22 = vmax.f32 %v607_v13, 0.0  ;;  %v688_v23 = vmax.f32 %v490_v14, 0.0  ;;  %v610_v24 = vadd.f32 %v1157_v34, %v609_v21 }
 0x10d   : > { %784 = vst.msk [vmem:[%s1165_s25 + $0x190] sm:$0xff] %vm733_vm2, %v719_v17  ;;  %750 = vst.msk [vmem:[%s1165_s25 + $0x80] sm:$0xff] %vm733_vm2, %v685_v18  ;;  %v720_v25 = vmax.f32 %v618_v19, 0.0  ;;  %v686_v26 = vmax.f32 %v482_v20, 0.0 }
 0x10e   : > { %782 = vst.msk [vmem:[%s1165_s25 + $0x180] sm:$0xff] %vm733_vm2, %v717_v22  ;;  %753 = vst.msk [vmem:[%s1165_s25 + $0x98] sm:$0xff] %vm733_vm2, %v688_v23  ;;  %v718_v27 = vmax.f32 %v610_v24, 0.0 }
 0x10f   : > { %785 = vst.msk [vmem:[%s1165_s25 + $0x198] sm:$0xff] %vm733_vm2, %v720_v25  ;;  %751 = vst.msk [vmem:[%s1165_s25 + $0x88] sm:$0xff] %vm733_vm2, %v686_v26  ;;  %v955_v28 = vpop.f32.mrb[20].mxu0 }
 0x110   : > { %783 = vst.msk [vmem:[%s1165_s25 + $0x188] sm:$0xff] %vm733_vm2, %v718_v27  ;;  %v503_v29 = vadd.f32 %v955_v28, %v1157_v34  ;;  %v987_v30 = vpop.f32.mrb[20].mxu1  ;;  %v494_v31 = vpop.f32.mrb[21].mxu0 }
 0x111   : > { %v631_v32 = vadd.f32 %v987_v30, %v1157_v34  ;;  %v495_v33 = vadd.f32 %v1157_v34, %v494_v31  ;;  %v622_v35 = vpop.f32.mrb[21].mxu1  ;;  %v956_v36 = vpop.f32.mrb[22].mxu0 }
 0x112   : > { %v691_v37 = vmax.f32 %v503_v29, 0.0  ;;  %v623_v38 = vadd.f32 %v1157_v34, %v622_v35  ;;  %v506_v39 = vadd.f32 %v956_v36, %v1157_v34  ;;  %v988_v40 = vpop.f32.mrb[22].mxu1  ;;  %v497_v41 = vpop.f32.mrb[23].mxu0 }
 0x113   : > { %v723_v42 = vmax.f32 %v631_v32, 0.0  ;;  %v689_v43 = vmax.f32 %v495_v33, 0.0  ;;  %v634_v44 = vadd.f32 %v988_v40, %v1157_v34  ;;  %v498_v45 = vadd.f32 %v1157_v34, %v497_v41  ;;  %v625_v46 = vpop.f32.mrb[23].mxu1 }
 0x114   : > { %756 = vst.msk [vmem:[%s1165_s25 + $0xb0] sm:$0xff] %vm733_vm2, %v691_v37  ;;  %v721_v47 = vmax.f32 %v623_v38, 0.0  ;;  %v692_v48 = vmax.f32 %v506_v39, 0.0  ;;  %v626_v49 = vadd.f32 %v1157_v34, %v625_v46 }
 0x115   : > { %788 = vst.msk [vmem:[%s1165_s25 + $0x1b0] sm:$0xff] %vm733_vm2, %v723_v42  ;;  %754 = vst.msk [vmem:[%s1165_s25 + $0xa0] sm:$0xff] %vm733_vm2, %v689_v43  ;;  %v724_v50 = vmax.f32 %v634_v44, 0.0  ;;  %v690_v51 = vmax.f32 %v498_v45, 0.0 }
 0x116   : > { %786 = vst.msk [vmem:[%s1165_s25 + $0x1a0] sm:$0xff] %vm733_vm2, %v721_v47  ;;  %757 = vst.msk [vmem:[%s1165_s25 + $0xb8] sm:$0xff] %vm733_vm2, %v692_v48  ;;  %v722_v52 = vmax.f32 %v626_v49, 0.0 }
 0x117   : > { %789 = vst.msk [vmem:[%s1165_s25 + $0x1b8] sm:$0xff] %vm733_vm2, %v724_v50  ;;  %755 = vst.msk [vmem:[%s1165_s25 + $0xa8] sm:$0xff] %vm733_vm2, %v690_v51  ;;  %v959_v53 = vpop.f32.mrb[24].mxu0 }
 0x118   : > { %787 = vst.msk [vmem:[%s1165_s25 + $0x1a8] sm:$0xff] %vm733_vm2, %v722_v52  ;;  %v519_v54 = vadd.f32 %v959_v53, %v1157_v34  ;;  %v991_v55 = vpop.f32.mrb[24].mxu1  ;;  %v510_v56 = vpop.f32.mrb[25].mxu0 }
 0x119   : > { %v647_v57 = vadd.f32 %v991_v55, %v1157_v34  ;;  %v511_v58 = vadd.f32 %v1157_v34, %v510_v56  ;;  %v638_v59 = vpop.f32.mrb[25].mxu1  ;;  %v960_v60 = vpop.f32.mrb[26].mxu0 }
 0x11a   : > { %v695_v61 = vmax.f32 %v519_v54, 0.0  ;;  %v639_v62 = vadd.f32 %v1157_v34, %v638_v59  ;;  %v522_v63 = vadd.f32 %v960_v60, %v1157_v34  ;;  %v992_v0 = vpop.f32.mrb[26].mxu1  ;;  %v513_v1 = vpop.f32.mrb[27].mxu0 }
 0x11b   : > { %v727_v2 = vmax.f32 %v647_v57, 0.0  ;;  %v693_v3 = vmax.f32 %v511_v58, 0.0  ;;  %v650_v4 = vadd.f32 %v992_v0, %v1157_v34  ;;  %v514_v5 = vadd.f32 %v1157_v34, %v513_v1  ;;  %v641_v6 = vpop.f32.mrb[27].mxu1 }
 0x11c   : > { %760 = vst.msk [vmem:[%s1165_s25 + $0xd0] sm:$0xff] %vm733_vm2, %v695_v61  ;;  %v725_v7 = vmax.f32 %v639_v62, 0.0  ;;  %v696_v8 = vmax.f32 %v522_v63, 0.0  ;;  %v642_v9 = vadd.f32 %v1157_v34, %v641_v6 }
 0x11d   : > { %792 = vst.msk [vmem:[%s1165_s25 + $0x1d0] sm:$0xff] %vm733_vm2, %v727_v2  ;;  %758 = vst.msk [vmem:[%s1165_s25 + $0xc0] sm:$0xff] %vm733_vm2, %v693_v3  ;;  %v728_v10 = vmax.f32 %v650_v4, 0.0  ;;  %v694_v11 = vmax.f32 %v514_v5, 0.0 }
 0x11e   : > { %790 = vst.msk [vmem:[%s1165_s25 + $0x1c0] sm:$0xff] %vm733_vm2, %v725_v7  ;;  %761 = vst.msk [vmem:[%s1165_s25 + $0xd8] sm:$0xff] %vm733_vm2, %v696_v8  ;;  %v726_v12 = vmax.f32 %v642_v9, 0.0 }
 0x11f   : > { %793 = vst.msk [vmem:[%s1165_s25 + $0x1d8] sm:$0xff] %vm733_vm2, %v728_v10  ;;  %759 = vst.msk [vmem:[%s1165_s25 + $0xc8] sm:$0xff] %vm733_vm2, %v694_v11  ;;  %v963_v13 = vpop.f32.mrb[28].mxu0 }
 0x120   : > { %791 = vst.msk [vmem:[%s1165_s25 + $0x1c8] sm:$0xff] %vm733_vm2, %v726_v12  ;;  %v535_v14 = vadd.f32 %v963_v13, %v1157_v34  ;;  %v995_v15 = vpop.f32.mrb[28].mxu1  ;;  %v526_v16 = vpop.f32.mrb[29].mxu0 }
 0x121   : > { %v663_v17 = vadd.f32 %v995_v15, %v1157_v34  ;;  %v527_v18 = vadd.f32 %v1157_v34, %v526_v16  ;;  %v654_v19 = vpop.f32.mrb[29].mxu1  ;;  %v964_v20 = vpop.f32.mrb[30].mxu0 }
 0x122   : > { %v699_v21 = vmax.f32 %v535_v14, 0.0  ;;  %v655_v22 = vadd.f32 %v1157_v34, %v654_v19  ;;  %v538_v23 = vadd.f32 %v964_v20, %v1157_v34  ;;  %v996_v24 = vpop.f32.mrb[30].mxu1  ;;  %v529_v25 = vpop.f32.mrb[31].mxu0 }
 0x123   : > { %v731_v26 = vmax.f32 %v663_v17, 0.0  ;;  %v697_v27 = vmax.f32 %v527_v18, 0.0  ;;  %v666_v28 = vadd.f32 %v996_v24, %v1157_v34  ;;  %v530_v29 = vadd.f32 %v1157_v34, %v529_v25  ;;  %v657_v30 = vpop.f32.mrb[31].mxu1 }
 0x124   : > { %764 = vst.msk [vmem:[%s1165_s25 + $0xf0] sm:$0xff] %vm733_vm2, %v699_v21  ;;  %v729_v31 = vmax.f32 %v655_v22, 0.0  ;;  %v700_v32 = vmax.f32 %v538_v23, 0.0  ;;  %v658_v33 = vadd.f32 %v1157_v34, %v657_v30 }
 0x125   : > { %796 = vst.msk [vmem:[%s1165_s25 + $0x1f0] sm:$0xff] %vm733_vm2, %v731_v26  ;;  %762 = vst.msk [vmem:[%s1165_s25 + $0xe0] sm:$0xff] %vm733_vm2, %v697_v27  ;;  %v732_v35 = vmax.f32 %v666_v28, 0.0  ;;  %v698_v36 = vmax.f32 %v530_v29, 0.0 }
 0x126   : > { %794 = vst.msk [vmem:[%s1165_s25 + $0x1e0] sm:$0xff] %vm733_vm2, %v729_v31  ;;  %765 = vst.msk [vmem:[%s1165_s25 + $0xf8] sm:$0xff] %vm733_vm2, %v700_v32  ;;  %v730_v37 = vmax.f32 %v658_v33, 0.0 }
 0x127   : > { %797 = vst.msk [vmem:[%s1165_s25 + $0x1f8] sm:$0xff] %vm733_vm2, %v732_v35  ;;  %763 = vst.msk [vmem:[%s1165_s25 + $0xe8] sm:$0xff] %vm733_vm2, %v698_v36 }
 0x128   : > { %795 = vst.msk [vmem:[%s1165_s25 + $0x1e8] sm:$0xff] %vm733_vm2, %v730_v37 }
 0x129 PF: > { %s13_s12 = sadd.s32 1, %s1015_s12  }
 0x12a   : > { %p10_p4 = scmp.ge.s32.totalorder %s13_s12, 4  }
 0x12c   :  { %12 = sbr.rel (!%p10_p4) target bundleno = 1 (0x1), region = 62 }

// kernel: _raft_forward.15
= control target key start
LH: loop header
LB: loop body
LE: loop exit
PB: predicated region body
PF: predicated region fallthrough
CT: control target
= control target key end

     0   :  { %s4959_s18 = smov 0   ;;  %s6282_s0 = inlined_call_operand.vmem [shape: bf16[32,2048], index: 0, kind: input, shape index: {}]   ;;  %s6283_s1 = inlined_call_operand.vmem [shape: bf16[2048,384], index: 1, kind: input, shape index: {}]   ;;  %s6284_s2 = inlined_call_operand.vmem [shape: f32[1,384], index: 2, kind: input, shape index: {}]   ;;  %s6285_s3 = inlined_call_operand.vmem [shape: bf16[32,128], index: 3, kind: output, shape index: {0}]   ;;  %s6286_s4 = inlined_call_operand.vmem [shape: f32[32,128], index: 4, kind: output, shape index: {1}]   ;;  %s6287_s5 = inlined_call_operand.vmem [shape: bf16[32,128], index: 5, kind: output, shape index: {2}]  }
   0x1 LB: > { %s3754_s19 = sadd.s32 4294967295, %s4927_s18   ;;  %p3758_p0 = scmp.ge.s32.totalorder %s4927_s18, 1  ;;  %s4927_s18 = sphi %s4959_s18, %s16_s18  }
   0x2   : > { %p194_p1 = scmp.lt.s32.totalorder %s4927_s18, 3 }
   0x4   : > { %p195_p2 = pnand %p3758_p0, %p194_p1 }
   0x5   : > { %v4405_v0 = vld [vmem:[%s6283_s1 + $0x4] ss:$12 sps:$4 sm:$0xff] (!%p195_p2)   ;;  %v4409_v2 = vld [vmem:[%s6283_s1] ss:$12 sps:$4 sm:$0xff] (!%p195_p2)   ;;  %v4411_v4 = vld [vmem:[%s6283_s1 + $0x1c] ss:$12 sps:$4 sm:$0xff] (!%p195_p2)  }
   0x6   : > { %198 = sbr.rel (%p195_p2) target bundleno = 620 (0x26c), region = 32  ;;  %v4407_v1 = vld [vmem:[%s6283_s1 + $0x304] ss:$12 sps:$4 sm:$0xff] (!%p195_p2)   ;;  %2932 = vmatprep.subr.bf16.mxu1 (!%p195_p2), %v4405_v0  ;;  %v4410_v3 = vld [vmem:[%s6283_s1 + $0x300] ss:$12 sps:$4 sm:$0xff] (!%p195_p2)   ;;  %s3759_s9 = sshll.u32 (!%p195_p2), %s3754_s19, 1 }
   0x7   : > { %3018 = vmatprep.subr.bf16.mxu0 (!%p195_p2), %v4407_v1  ;;  %2933 = vmatpush1.bf16.msra.mxu1 (!%p195_p2), %v4409_v2  ;;  %v4413_v5 = vld [vmem:[%s6283_s1 + $0x31c] ss:$12 sps:$4 sm:$0xff] (!%p195_p2)   ;;  %v4415_v6 = vld [vmem:[%s6283_s1 + $0x18] ss:$12 sps:$4 sm:$0xff] (!%p195_p2)   ;;  %v4417_v8 = vld [vmem:[%s6283_s1 + $0x34] ss:$12 sps:$4 sm:$0xff] (!%p195_p2)  }
   0x8   : > { %3019 = vmatpush1.bf16.msra.mxu0 (!%p195_p2), %v4410_v3  ;;  %2934 = vmatprep.subr.bf16.mxu1 (!%p195_p2), %v4411_v4  ;;  %v4416_v7 = vld [vmem:[%s6283_s1 + $0x318] ss:$12 sps:$4 sm:$0xff] (!%p195_p2)   ;;  %v4419_v9 = vld [vmem:[%s6283_s1 + $0x334] ss:$12 sps:$4 sm:$0xff] (!%p195_p2)   ;;  %v4421_v10 = vld [vmem:[%s6283_s1 + $0x30] ss:$12 sps:$4 sm:$0xff] (!%p195_p2)  }
   0x9   : > { %3020 = vmatprep.subr.bf16.mxu0 (!%p195_p2), %v4413_v5  ;;  %v4422_v11 = vld [vmem:[%s6283_s1 + $0x330] ss:$12 sps:$4 sm:$0xff] (!%p195_p2)   ;;  %v4423_v12 = vld [vmem:[%s6283_s1 + $0x4c] ss:$12 sps:$4 sm:$0xff] (!%p195_p2)   ;;  %v4427_v14 = vld [vmem:[%s6283_s1 + $0x48] ss:$12 sps:$4 sm:$0xff] (!%p195_p2)  }
   0xa   : > { %v4425_v13 = vld [vmem:[%s6283_s1 + $0x34c] ss:$12 sps:$4 sm:$0xff] (!%p195_p2)   ;;  %v4428_v15 = vld [vmem:[%s6283_s1 + $0x348] ss:$12 sps:$4 sm:$0xff] (!%p195_p2)   ;;  %v4429_v16 = vld [vmem:[%s6283_s1 + $0x64] ss:$12 sps:$4 sm:$0xff] (!%p195_p2)  }
   0xb   : > { %2935 = vmatpush1.bf16.msra.mxu1 (!%p195_p2), %v4415_v6  ;;  %v4431_v17 = vld [vmem:[%s6283_s1 + $0x364] ss:$12 sps:$4 sm:$0xff] (!%p195_p2)   ;;  %v4433_v18 = vld [vmem:[%s6283_s1 + $0x60] ss:$12 sps:$4 sm:$0xff] (!%p195_p2)   ;;  %v4435_v20 = vld [vmem:[%s6283_s1 + $0x7c] ss:$12 sps:$4 sm:$0xff] (!%p195_p2)  }
   0xc   : > { %3021 = vmatpush1.bf16.msra.mxu0 (!%p195_p2), %v4416_v7  ;;  %2936 = vmatprep.subr.bf16.mxu1 (!%p195_p2), %v4417_v8  ;;  %v4434_v19 = vld [vmem:[%s6283_s1 + $0x360] ss:$12 sps:$4 sm:$0xff] (!%p195_p2)   ;;  %v4437_v21 = vld [vmem:[%s6283_s1 + $0x37c] ss:$12 sps:$4 sm:$0xff] (!%p195_p2)   ;;  %v4439_v22 = vld [vmem:[%s6283_s1 + $0x78] ss:$12 sps:$4 sm:$0xff] (!%p195_p2)  }
   0xd   : > { %3022 = vmatprep.subr.bf16.mxu0 %v4419_v9  ;;  %v4440_v23 = vld [vmem:[%s6283_s1 + $0x378] ss:$12 sps:$4 sm:$0xff]   ;;  %v4441_v24 = vld [vmem:[%s6283_s1 + $0x94] ss:$12 sps:$4 sm:$0xff]   ;;  %v4445_v26 = vld [vmem:[%s6283_s1 + $0x90] ss:$12 sps:$4 sm:$0xff]  }
   0xe   : > { %v4443_v25 = vld [vmem:[%s6283_s1 + $0x394] ss:$12 sps:$4 sm:$0xff]   ;;  %v4446_v27 = vld [vmem:[%s6283_s1 + $0x390] ss:$12 sps:$4 sm:$0xff]   ;;  %v4447_v28 = vld [vmem:[%s6283_s1 + $0xac] ss:$12 sps:$4 sm:$0xff]  }
   0xf   : > { %2937 = vmatpush1.bf16.msra.mxu1 %v4421_v10  ;;  %v4449_v29 = vld [vmem:[%s6283_s1 + $0x3ac] ss:$12 sps:$4 sm:$0xff]   ;;  %v4451_v30 = vld [vmem:[%s6283_s1 + $0xa8] ss:$12 sps:$4 sm:$0xff]   ;;  %v4453_v32 = vld [vmem:[%s6283_s1 + $0xc4] ss:$12 sps:$4 sm:$0xff]  }
  0x10   : > { %3023 = vmatpush1.bf16.msra.mxu0 %v4422_v11  ;;  %2938 = vmatprep.subr.bf16.mxu1 %v4423_v12  ;;  %v4452_v31 = vld [vmem:[%s6283_s1 + $0x3a8] ss:$12 sps:$4 sm:$0xff]   ;;  %p234_p3 = scmp.lt.s32.totalorder %s3759_s9, 3  ;;  %v4455_v33 = vld [vmem:[%s6283_s1 + $0x3c4] ss:$12 sps:$4 sm:$0xff]  }
  0x11   : > { %3024 = vmatprep.subr.bf16.mxu0 %v4425_v13  ;;  %v4457_v34 = vld [vmem:[%s6283_s1 + $0xc0] ss:$12 sps:$4 sm:$0xff]   ;;  %v4459_v36 = vld [vmem:[%s6283_s1 + $0xdc] ss:$12 sps:$4 sm:$0xff]   ;;  %v4463_v38 = vld [vmem:[%s6283_s1 + $0xd8] ss:$12 sps:$4 sm:$0xff]  }
  0x12   : > { %v4458_v35 = vld [vmem:[%s6283_s1 + $0x3c0] ss:$12 sps:$4 sm:$0xff]   ;;  %s6289_s9 = smov (!%p234_p3, %s3759_s9), 3  ;;  %v4461_v37 = vld [vmem:[%s6283_s1 + $0x3dc] ss:$12 sps:$4 sm:$0xff]  }
  0x13   : > { %2939 = vmatpush1.bf16.msra.mxu1 %v4427_v14  ;;  %v4464_v39 = vld [vmem:[%s6283_s1 + $0x3d8] ss:$12 sps:$4 sm:$0xff]   ;;  %v4465_v40 = vld [vmem:[%s6283_s1 + $0xf4] ss:$12 sps:$4 sm:$0xff]   ;;  %s4174_s8 = sshll.u32 %s6289_s9, 6  ;;  %s3763_s12 = sshll.u32 %s6289_s9, 2 }
  0x14   : > { %3025 = vmatpush1.bf16.msra.mxu0 %v4428_v15  ;;  %2940 = vmatprep.subr.bf16.mxu1 %v4429_v16  ;;  %v4467_v41 = vld [vmem:[%s6283_s1 + $0x3f4] ss:$12 sps:$4 sm:$0xff]   ;;  %v4469_v42 = vld [vmem:[%s6283_s1 + $0xf0] ss:$12 sps:$4 sm:$0xff]   ;;  %s5107_s19 = scalar_lea.vmem %s6282_s0, %s4174_s8  ;;  %v4471_v44 = vld [vmem:[%s6283_s1 + $0x10c] ss:$12 sps:$4 sm:$0xff]   ;;  %s244_s15 = scalar_lea.vmem %s6285_s3, %s3763_s12 }
  0x15   : > { %3026 = vmatprep.subr.bf16.mxu0 %v4431_v17  ;;  %v4470_v43 = vld [vmem:[%s6283_s1 + $0x3f0] ss:$12 sps:$4 sm:$0xff]   ;;  %v4473_v45 = vld [vmem:[%s6283_s1 + $0x40c] ss:$12 sps:$4 sm:$0xff]   ;;  %v4475_v46 = vld [vmem:[%s6283_s1 + $0x108] ss:$12 sps:$4 sm:$0xff]   ;;  %s256_s21 = scalar_lea.vmem %s6287_s5, %s3763_s12 }
  0x16   : > { %v4476_v47 = vld [vmem:[%s6283_s1 + $0x408] ss:$12 sps:$4 sm:$0xff]   ;;  %v259_v48 = vld [vmem:[%s5107_s19] sm:$0xff]  ;;  %v4493_v0 = vld [vmem:[%s6283_s1 + $0x150] ss:$12 sps:$4 sm:$0xff]   ;;  %s3765_s16 = sshll.u32 %s6289_s9, 3 }
  0x17   : > { %2941 = vmatpush1.bf16.msra.mxu1 %v4433_v18  ;;  %v267_v49 = vld [vmem:[%s5107_s19 + $0x40] sm:$0xff]  ;;  %v261_v53 = vld [vmem:[%s5107_s19 + $0x10] sm:$0xff]  ;;  %v4483_v58 = vld [vmem:[%s6283_s1 + $0x13c] ss:$12 sps:$4 sm:$0xff]   ;;  %s250_s24 = scalar_lea.vmem %s6286_s4, %s3765_s16 }
  0x18   : > { %3027 = vmatpush1.bf16.msra.mxu0 %v4434_v19  ;;  %2942 = vmatprep.subr.bf16.mxu1 %v4435_v20  ;;  %v4477_v50 = vld [vmem:[%s6283_s1 + $0x124] ss:$12 sps:$4 sm:$0xff]   ;;  %v5129_v52 = vcombine.high %v259_v48, %v267_v49  ;;  %v4481_v56 = vld [vmem:[%s6283_s1 + $0x120] ss:$12 sps:$4 sm:$0xff]   ;;  %v4485_v59 = vld [vmem:[%s6283_s1 + $0x43c] ss:$12 sps:$4 sm:$0xff]   ;;  %v5185_v8 = vcombine.low %v259_v48, %v267_v49 }
  0x19   : > { %3028 = vmatprep.subr.bf16.mxu0 %v4437_v21  ;;  %v4479_v51 = vld [vmem:[%s6283_s1 + $0x424] ss:$12 sps:$4 sm:$0xff]   ;;  %v4482_v57 = vld [vmem:[%s6283_s1 + $0x420] ss:$12 sps:$4 sm:$0xff]   ;;  %v4499_v4 = vld [vmem:[%s6283_s1 + $0x168] ss:$12 sps:$4 sm:$0xff]  }
  0x1a   : > { %v269_v54 = vld [vmem:[%s5107_s19 + $0x50] sm:$0xff]  ;;  %2964 = vmatprep.mubr.bf16.mxu1 %v5129_v52  ;;  %v4487_v60 = vld [vmem:[%s6283_s1 + $0x138] ss:$12 sps:$4 sm:$0xff]   ;;  %v4501_v9 = vld [vmem:[%s6283_s1 + $0x180] ss:$12 sps:$4 sm:$0xff]  }
  0x1b   : > { %2943 = vmatpush1.bf16.msra.mxu1 %v4439_v22  ;;  %v5134_v55 = vcombine.high %v261_v53, %v269_v54  ;;  %v4488_v61 = vld [vmem:[%s6283_s1 + $0x438] ss:$12 sps:$4 sm:$0xff]   ;;  %v4489_v62 = vld [vmem:[%s6283_s1 + $0x154] ss:$12 sps:$4 sm:$0xff]   ;;  %v4494_v1 = vld [vmem:[%s6283_s1 + $0x450] ss:$12 sps:$4 sm:$0xff]   ;;  %v5190_v10 = vcombine.low %v261_v53, %v269_v54 }
  0x1c   : > { %3029 = vmatpush1.bf16.msra.mxu0 %v4440_v23  ;;  %2944 = vmatprep.subr.bf16.mxu1 %v4441_v24  ;;  %v4491_v63 = vld [vmem:[%s6283_s1 + $0x454] ss:$12 sps:$4 sm:$0xff]   ;;  %v4495_v2 = vld [vmem:[%s6283_s1 + $0x16c] ss:$12 sps:$4 sm:$0xff]   ;;  %v4503_v6 = vld [vmem:[%s6283_s1 + $0x184] ss:$12 sps:$4 sm:$0xff]  }
  0x1d   : > { %3030 = vmatprep.subr.bf16.mxu0 %v4443_v25  ;;  %3050 = vmatprep.mubr.bf16.mxu0 %v5134_v55  ;;  %v4497_v3 = vld [vmem:[%s6283_s1 + $0x46c] ss:$12 sps:$4 sm:$0xff]   ;;  %v4500_v5 = vld [vmem:[%s6283_s1 + $0x468] ss:$12 sps:$4 sm:$0xff]   ;;  %v4506_v7 = vld [vmem:[%s6283_s1 + $0x484] ss:$12 sps:$4 sm:$0xff]  }
  0x1e   : > { %v4504_v11 = vld [vmem:[%s6283_s1 + $0x480] ss:$12 sps:$4 sm:$0xff]   ;;  %v4509_v12 = vld [vmem:[%s6283_s1 + $0x19c] ss:$12 sps:$4 sm:$0xff]   ;;  %v4507_v14 = vld [vmem:[%s6283_s1 + $0x198] ss:$12 sps:$4 sm:$0xff]  }
  0x1f   : > { %2945 = vmatpush1.bf16.msra.mxu1 %v4445_v26  ;;  %v4512_v13 = vld [vmem:[%s6283_s1 + $0x49c] ss:$12 sps:$4 sm:$0xff]   ;;  %v4510_v15 = vld [vmem:[%s6283_s1 + $0x498] ss:$12 sps:$4 sm:$0xff]   ;;  %v4515_v16 = vld [vmem:[%s6283_s1 + $0x1b4] ss:$12 sps:$4 sm:$0xff]  }
  0x20   : > { %3031 = vmatpush1.bf16.msra.mxu0 %v4446_v27  ;;  %2946 = vmatprep.subr.bf16.mxu1 %v4447_v28  ;;  %v4518_v17 = vld [vmem:[%s6283_s1 + $0x4b4] ss:$12 sps:$4 sm:$0xff]   ;;  %v4513_v18 = vld [vmem:[%s6283_s1 + $0x1b0] ss:$12 sps:$4 sm:$0xff]   ;;  %v4521_v20 = vld [vmem:[%s6283_s1 + $0x1cc] ss:$12 sps:$4 sm:$0xff]  }
  0x21   : > { %3032 = vmatprep.subr.bf16.mxu0 %v4449_v29  ;;  %v4516_v19 = vld [vmem:[%s6283_s1 + $0x4b0] ss:$12 sps:$4 sm:$0xff]   ;;  %v4524_v21 = vld [vmem:[%s6283_s1 + $0x4cc] ss:$12 sps:$4 sm:$0xff]   ;;  %v4519_v22 = vld [vmem:[%s6283_s1 + $0x1c8] ss:$12 sps:$4 sm:$0xff]  }
  0x22   : > { %v4522_v23 = vld [vmem:[%s6283_s1 + $0x4c8] ss:$12 sps:$4 sm:$0xff]   ;;  %v4527_v24 = vld [vmem:[%s6283_s1 + $0x1e4] ss:$12 sps:$4 sm:$0xff]   ;;  %v4525_v26 = vld [vmem:[%s6283_s1 + $0x1e0] ss:$12 sps:$4 sm:$0xff]  }
  0x23   : > { %2947 = vmatpush1.bf16.msra.mxu1 %v4451_v30  ;;  %v4530_v25 = vld [vmem:[%s6283_s1 + $0x4e4] ss:$12 sps:$4 sm:$0xff]   ;;  %v4528_v27 = vld [vmem:[%s6283_s1 + $0x4e0] ss:$12 sps:$4 sm:$0xff]   ;;  %v4533_v28 = vld [vmem:[%s6283_s1 + $0x1fc] ss:$12 sps:$4 sm:$0xff]  }
  0x24   : > { %3033 = vmatpush1.bf16.msra.mxu0 %v4452_v31  ;;  %2948 = vmatprep.subr.bf16.mxu1 %v4453_v32  ;;  %v4536_v29 = vld [vmem:[%s6283_s1 + $0x4fc] ss:$12 sps:$4 sm:$0xff]   ;;  %v4531_v30 = vld [vmem:[%s6283_s1 + $0x1f8] ss:$12 sps:$4 sm:$0xff]   ;;  %v4539_v32 = vld [vmem:[%s6283_s1 + $0x214] ss:$12 sps:$4 sm:$0xff]  }
  0x25   : > { %3034 = vmatprep.subr.bf16.mxu0 %v4455_v33  ;;  %v4534_v31 = vld [vmem:[%s6283_s1 + $0x4f8] ss:$12 sps:$4 sm:$0xff]   ;;  %v4542_v33 = vld [vmem:[%s6283_s1 + $0x514] ss:$12 sps:$4 sm:$0xff]  }
  0x26   : > { %v4549_v48 = vld [vmem:[%s6283_s1 + $0x240] ss:$12 sps:$4 sm:$0xff]   ;;  %v4555_v53 = vld [vmem:[%s6283_s1 + $0x258] ss:$12 sps:$4 sm:$0xff]  }
  0x27   : > { %2949 = vmatpush1.bf16.msra.mxu1 %v4457_v34  ;;  %v4537_v34 = vld [vmem:[%s6283_s1 + $0x210] ss:$12 sps:$4 sm:$0xff]   ;;  %v4552_v49 = vld [vmem:[%s6283_s1 + $0x540] ss:$12 sps:$4 sm:$0xff]   ;;  %v4558_v54 = vld [vmem:[%s6283_s1 + $0x558] ss:$12 sps:$4 sm:$0xff]  }
  0x28   : > { %3035 = vmatpush1.bf16.msra.mxu0 %v4458_v35  ;;  %2950 = vmatprep.subr.bf16.mxu1 %v4459_v36  ;;  %v4540_v35 = vld [vmem:[%s6283_s1 + $0x510] ss:$12 sps:$4 sm:$0xff]   ;;  %v5270_v36 = vld [vmem:[%s5107_s19 + $0x8] sm:$0xff] }
  0x29   : > { %3036 = vmatprep.subr.bf16.mxu0 %v4461_v37  ;;  %v5273_v37 = vld [vmem:[%s5107_s19 + $0x48] sm:$0xff] }
  0x2b   : > { %2951 = vmatpush1.bf16.msra.mxu1 %v4463_v38  ;;  %v5276_v38 = vld [vmem:[%s5107_s19 + $0x18] sm:$0xff] }
  0x2c   : > { %3037 = vmatpush1.bf16.msra.mxu0 %v4464_v39  ;;  %2952 = vmatprep.subr.bf16.mxu1 %v4465_v40  ;;  %v5279_v39 = vld [vmem:[%s5107_s19 + $0x58] sm:$0xff] }
  0x2d   : > { %3038 = vmatprep.subr.bf16.mxu0 %v4467_v41  ;;  %v4545_v40 = vld [vmem:[%s6283_s1 + $0x22c] ss:$12 sps:$4 sm:$0xff]   ;;  %v5286_v41 = vcombine.high %v5270_v36, %v5273_v37 }
  0x2f   : > { %2953 = vmatpush1.bf16.msra.mxu1 %v4469_v42  ;;  %v4548_v42 = vld [vmem:[%s6283_s1 + $0x52c] ss:$12 sps:$4 sm:$0xff]  }
  0x30   : > { %3039 = vmatpush1.bf16.msra.mxu0 %v4470_v43  ;;  %2954 = vmatprep.subr.bf16.mxu1 %v4471_v44  ;;  %v5293_v43 = vcombine.high %v5276_v38, %v5279_v39  ;;  %v4543_v44 = vld [vmem:[%s6283_s1 + $0x228] ss:$12 sps:$4 sm:$0xff]  }
  0x31   : > { %3040 = vmatprep.subr.bf16.mxu0 %v4473_v45  ;;  %v4546_v45 = vld [vmem:[%s6283_s1 + $0x528] ss:$12 sps:$4 sm:$0xff]  }
  0x33   : > { %2955 = vmatpush1.bf16.msra.mxu1 %v4475_v46  ;;  %v4551_v46 = vld [vmem:[%s6283_s1 + $0x244] ss:$12 sps:$4 sm:$0xff]  }
  0x34   : > { %3041 = vmatpush1.bf16.msra.mxu0 %v4476_v47  ;;  %2956 = vmatprep.subr.bf16.mxu1 %v4477_v50  ;;  %v4554_v47 = vld [vmem:[%s6283_s1 + $0x544] ss:$12 sps:$4 sm:$0xff]   ;;  %v4557_v50 = vld [vmem:[%s6283_s1 + $0x25c] ss:$12 sps:$4 sm:$0xff]  }
  0x35   : > { %3042 = vmatprep.subr.bf16.mxu0 %v4479_v51  ;;  %v4560_v51 = vld [vmem:[%s6283_s1 + $0x55c] ss:$12 sps:$4 sm:$0xff]  }
  0x37   : > { %2957 = vmatpush1.bf16.msra.mxu1 %v4481_v56  ;;  %v4563_v56 = vld [vmem:[%s6283_s1 + $0x274] ss:$12 sps:$4 sm:$0xff]  }
  0x38   : > { %3043 = vmatpush1.bf16.msra.mxu0 %v4482_v57  ;;  %2958 = vmatprep.subr.bf16.mxu1 %v4483_v58  ;;  %v4566_v57 = vld [vmem:[%s6283_s1 + $0x574] ss:$12 sps:$4 sm:$0xff]   ;;  %v4561_v58 = vld [vmem:[%s6283_s1 + $0x270] ss:$12 sps:$4 sm:$0xff]  }
  0x39   : > { %3044 = vmatprep.subr.bf16.mxu0 %v4485_v59  ;;  %v4564_v59 = vld [vmem:[%s6283_s1 + $0x570] ss:$12 sps:$4 sm:$0xff]  }
  0x3b   : > { %2959 = vmatpush1.bf16.msra.mxu1 %v4487_v60  ;;  %v4569_v60 = vld [vmem:[%s6283_s1 + $0x28c] ss:$12 sps:$4 sm:$0xff]  }
  0x3c   : > { %3045 = vmatpush1.bf16.msra.mxu0 %v4488_v61  ;;  %2960 = vmatprep.subr.bf16.mxu1 %v4489_v62  ;;  %v4572_v61 = vld [vmem:[%s6283_s1 + $0x58c] ss:$12 sps:$4 sm:$0xff]   ;;  %v4567_v62 = vld [vmem:[%s6283_s1 + $0x288] ss:$12 sps:$4 sm:$0xff]  }
  0x3d   : > { %3046 = vmatprep.subr.bf16.mxu0 %v4491_v63  ;;  %v4570_v63 = vld [vmem:[%s6283_s1 + $0x588] ss:$12 sps:$4 sm:$0xff]  }
  0x3f   : > { %2961 = vmatpush1.bf16.msra.mxu1 %v4493_v0  ;;  %v4575_v0 = vld [vmem:[%s6283_s1 + $0x2a4] ss:$12 sps:$4 sm:$0xff]  }
  0x40   : > { %3047 = vmatpush1.bf16.msra.mxu0 %v4494_v1  ;;  %2962 = vmatprep.subr.bf16.mxu1 %v4495_v2  ;;  %v4578_v1 = vld [vmem:[%s6283_s1 + $0x5a4] ss:$12 sps:$4 sm:$0xff]   ;;  %v4573_v2 = vld [vmem:[%s6283_s1 + $0x2a0] ss:$12 sps:$4 sm:$0xff]  }
  0x41   : > { %3048 = vmatprep.subr.bf16.mxu0 %v4497_v3  ;;  %v4576_v3 = vld [vmem:[%s6283_s1 + $0x5a0] ss:$12 sps:$4 sm:$0xff]  }
  0x43   : > { %2963 = vmatpush1.bf16.msra.mxu1 %v4499_v4  ;;  %v4581_v4 = vld [vmem:[%s6283_s1 + $0x2bc] ss:$12 sps:$4 sm:$0xff]  }
  0x44   : > { %3049 = vmatpush1.bf16.msra.mxu0 %v4500_v5  ;;  %2975 = vmatprep.subr.bf16.mxu1 %v4503_v6  ;;  %v4584_v5 = vld [vmem:[%s6283_s1 + $0x5bc] ss:$12 sps:$4 sm:$0xff]   ;;  %v4579_v6 = vld [vmem:[%s6283_s1 + $0x2b8] ss:$12 sps:$4 sm:$0xff]  }
  0x45   : > { %3061 = vmatprep.subr.bf16.mxu0 %v4506_v7  ;;  %v4582_v7 = vld [vmem:[%s6283_s1 + $0x5b8] ss:$12 sps:$4 sm:$0xff]  }
  0x46   : > { %2965 = vmatmul.mubr.bf16.vlgmr.msra.gmra.mrb[0].mxu1 %v5185_v8 }
  0x47   : > { %3051 = vmatmul.mubr.bf16.vlgmr.msra.gmra.mrb[0].mxu0 %v5190_v10  ;;  %2976 = vmatpush1.bf16.msra.mxu1 %v4501_v9  ;;  %v4587_v9 = vld [vmem:[%s6283_s1 + $0x2d4] ss:$12 sps:$4 sm:$0xff]  }
  0x48   : > { %3062 = vmatpush1.bf16.msra.mxu0 %v4504_v11  ;;  %2977 = vmatprep.subr.bf16.mxu1 %v4509_v12  ;;  %v4590_v11 = vld [vmem:[%s6283_s1 + $0x5d4] ss:$12 sps:$4 sm:$0xff]   ;;  %v4585_v12 = vld [vmem:[%s6283_s1 + $0x2d0] ss:$12 sps:$4 sm:$0xff]  }
  0x49   : > { %3063 = vmatprep.subr.bf16.mxu0 %v4512_v13  ;;  %3007 = vmatprep.mubr.bf16.mxu1 %v5286_v41  ;;  %v4588_v13 = vld [vmem:[%s6283_s1 + $0x5d0] ss:$12 sps:$4 sm:$0xff]  }
  0x4a   : > { %3093 = vmatprep.mubr.bf16.mxu0 %v5293_v43 }
  0x4b   : > { %2978 = vmatpush1.bf16.msra.mxu1 %v4507_v14  ;;  %v4593_v14 = vld [vmem:[%s6283_s1 + $0x2ec] ss:$12 sps:$4 sm:$0xff]  }
  0x4c   : > { %3064 = vmatpush1.bf16.msra.mxu0 %v4510_v15  ;;  %2979 = vmatprep.subr.bf16.mxu1 %v4515_v16  ;;  %v4596_v15 = vld [vmem:[%s6283_s1 + $0x5ec] ss:$12 sps:$4 sm:$0xff]   ;;  %v4591_v16 = vld [vmem:[%s6283_s1 + $0x2e8] ss:$12 sps:$4 sm:$0xff]  }
  0x4d   : > { %3065 = vmatprep.subr.bf16.mxu0 %v4518_v17  ;;  %v4594_v17 = vld [vmem:[%s6283_s1 + $0x5e8] ss:$12 sps:$4 sm:$0xff]  }
  0x4f   : > { %2980 = vmatpush1.bf16.msra.mxu1 %v4513_v18  ;;  %v4599_v18 = vld [vmem:[%s6283_s1 + $0x604] ss:$12 sps:$4 sm:$0xff]  }
  0x50   : > { %3066 = vmatpush1.bf16.msra.mxu0 %v4516_v19  ;;  %2981 = vmatprep.subr.bf16.mxu1 %v4521_v20  ;;  %v4600_v19 = vld [vmem:[%s6283_s1 + $0xc8] ss:$12 sps:$4 sm:$0xff]   ;;  %v4597_v20 = vld [vmem:[%s6283_s1 + $0x600] ss:$12 sps:$4 sm:$0xff]  }
  0x51   : > { %3067 = vmatprep.subr.bf16.mxu0 %v4524_v21  ;;  %v5410_v21 = vcombine.low %v5270_v36, %v5273_v37  ;;  %v4620_v36 = vld [vmem:[%s6283_s1 + $0x128] ss:$12 sps:$4 sm:$0xff]   ;;  %v5465_v37 = vld [vmem:[%s5107_s19 + $0x20] sm:$0xff] }
  0x53   : > { %2982 = vmatpush1.bf16.msra.mxu1 %v4519_v22  ;;  %v5414_v22 = vcombine.low %v5276_v38, %v5279_v39  ;;  %v5468_v38 = vld [vmem:[%s5107_s19 + $0x60] sm:$0xff] }
  0x54   : > { %3068 = vmatpush1.bf16.msra.mxu0 %v4522_v23  ;;  %2983 = vmatprep.subr.bf16.mxu1 %v4527_v24  ;;  %v4601_v23 = vld [vmem:[%s6283_s1 + $0x8] ss:$12 sps:$4 sm:$0xff]   ;;  %v4617_v39 = vld [vmem:[%s6283_s1 + $0x660] ss:$12 sps:$4 sm:$0xff]  }
  0x55   : > { %3069 = vmatprep.subr.bf16.mxu0 %v4530_v25  ;;  %v4604_v24 = vld [vmem:[%s6283_s1 + $0x61c] ss:$12 sps:$4 sm:$0xff]   ;;  %v4605_v25 = vld [vmem:[%s6283_s1 + $0xe0] ss:$12 sps:$4 sm:$0xff]  }
  0x57   : > { %2984 = vmatpush1.bf16.msra.mxu1 %v4525_v26  ;;  %v4602_v26 = vld [vmem:[%s6283_s1 + $0x618] ss:$12 sps:$4 sm:$0xff]  }
  0x58   : > { %3070 = vmatpush1.bf16.msra.mxu0 %v4528_v27  ;;  %2985 = vmatprep.subr.bf16.mxu1 %v4533_v28  ;;  %v4606_v27 = vld [vmem:[%s6283_s1 + $0x20] ss:$12 sps:$4 sm:$0xff]  }
  0x59   : > { %3071 = vmatprep.subr.bf16.mxu0 %v4536_v29  ;;  %v4609_v28 = vld [vmem:[%s6283_s1 + $0x634] ss:$12 sps:$4 sm:$0xff]   ;;  %v4610_v29 = vld [vmem:[%s6283_s1 + $0xf8] ss:$12 sps:$4 sm:$0xff]  }
  0x5b   : > { %2986 = vmatpush1.bf16.msra.mxu1 %v4531_v30  ;;  %v4607_v30 = vld [vmem:[%s6283_s1 + $0x630] ss:$12 sps:$4 sm:$0xff]  }
  0x5c   : > { %3072 = vmatpush1.bf16.msra.mxu0 %v4534_v31  ;;  %2987 = vmatprep.subr.bf16.mxu1 %v4539_v32  ;;  %v4611_v31 = vld [vmem:[%s6283_s1 + $0x38] ss:$12 sps:$4 sm:$0xff]  }
  0x5d   : > { %3073 = vmatprep.subr.bf16.mxu0 %v4542_v33  ;;  %v4614_v32 = vld [vmem:[%s6283_s1 + $0x64c] ss:$12 sps:$4 sm:$0xff]   ;;  %v4612_v33 = vld [vmem:[%s6283_s1 + $0x648] ss:$12 sps:$4 sm:$0xff]  }
  0x5f   : > { %2988 = vmatpush1.bf16.msra.mxu1 %v4537_v34  ;;  %v4616_v34 = vld [vmem:[%s6283_s1 + $0x50] ss:$12 sps:$4 sm:$0xff]  }
  0x60   : > { %3074 = vmatpush1.bf16.msra.mxu0 %v4540_v35  ;;  %2989 = vmatprep.subr.bf16.mxu1 %v4545_v40  ;;  %v4619_v35 = vld [vmem:[%s6283_s1 + $0x664] ss:$12 sps:$4 sm:$0xff]   ;;  %v5475_v40 = vcombine.high %v5465_v37, %v5468_v38 }
  0x61   : > { %3075 = vmatprep.subr.bf16.mxu0 %v4548_v42  ;;  %v4621_v42 = vld [vmem:[%s6283_s1 + $0x68] ss:$12 sps:$4 sm:$0xff]  }
  0x63   : > { %2990 = vmatpush1.bf16.msra.mxu1 %v4543_v44  ;;  %v4624_v44 = vld [vmem:[%s6283_s1 + $0x67c] ss:$12 sps:$4 sm:$0xff]  }
  0x64   : > { %3076 = vmatpush1.bf16.msra.mxu0 %v4546_v45  ;;  %2991 = vmatprep.subr.bf16.mxu1 %v4551_v46  ;;  %v4625_v45 = vld [vmem:[%s6283_s1 + $0x140] ss:$12 sps:$4 sm:$0xff]   ;;  %v4622_v46 = vld [vmem:[%s6283_s1 + $0x678] ss:$12 sps:$4 sm:$0xff]  }
  0x65   : > { %3077 = vmatprep.subr.bf16.mxu0 %v4554_v47  ;;  %v4626_v47 = vld [vmem:[%s6283_s1 + $0x80] ss:$12 sps:$4 sm:$0xff]  }
  0x67   : > { %2992 = vmatpush1.bf16.msra.mxu1 %v4549_v48  ;;  %v4629_v48 = vld [vmem:[%s6283_s1 + $0x694] ss:$12 sps:$4 sm:$0xff]  }
  0x68   : > { %3078 = vmatpush1.bf16.msra.mxu0 %v4552_v49  ;;  %2993 = vmatprep.subr.bf16.mxu1 %v4557_v50  ;;  %v4630_v49 = vld [vmem:[%s6283_s1 + $0x158] ss:$12 sps:$4 sm:$0xff]   ;;  %v4627_v50 = vld [vmem:[%s6283_s1 + $0x690] ss:$12 sps:$4 sm:$0xff]  }
  0x69   : > { %3079 = vmatprep.subr.bf16.mxu0 %v4560_v51  ;;  %v4631_v51 = vld [vmem:[%s6283_s1 + $0x98] ss:$12 sps:$4 sm:$0xff]  }
  0x6b   : > { %2994 = vmatpush1.bf16.msra.mxu1 %v4555_v53  ;;  %v4634_v53 = vld [vmem:[%s6283_s1 + $0x6ac] ss:$12 sps:$4 sm:$0xff]  }
  0x6c   : > { %3080 = vmatpush1.bf16.msra.mxu0 %v4558_v54  ;;  %2995 = vmatprep.subr.bf16.mxu1 %v4563_v56  ;;  %v4635_v54 = vld [vmem:[%s6283_s1 + $0x170] ss:$12 sps:$4 sm:$0xff]   ;;  %v4632_v56 = vld [vmem:[%s6283_s1 + $0x6a8] ss:$12 sps:$4 sm:$0xff]  }
  0x6d   : > { %3081 = vmatprep.subr.bf16.mxu0 %v4566_v57  ;;  %v4636_v57 = vld [vmem:[%s6283_s1 + $0xb0] ss:$12 sps:$4 sm:$0xff]  }
  0x6f   : > { %2996 = vmatpush1.bf16.msra.mxu1 %v4561_v58  ;;  %v4639_v58 = vld [vmem:[%s6283_s1 + $0x6c4] ss:$12 sps:$4 sm:$0xff]  }
  0x70   : > { %3082 = vmatpush1.bf16.msra.mxu0 %v4564_v59  ;;  %2997 = vmatprep.subr.bf16.mxu1 %v4569_v60  ;;  %v4640_v59 = vld [vmem:[%s6283_s1 + $0x248] ss:$12 sps:$4 sm:$0xff]   ;;  %v4637_v60 = vld [vmem:[%s6283_s1 + $0x6c0] ss:$12 sps:$4 sm:$0xff]  }
  0x71   : > { %3083 = vmatprep.subr.bf16.mxu0 %v4572_v61  ;;  %v4641_v61 = vld [vmem:[%s6283_s1 + $0x188] ss:$12 sps:$4 sm:$0xff]  }
  0x73   : > { %2998 = vmatpush1.bf16.msra.mxu1 %v4567_v62  ;;  %v4644_v62 = vld [vmem:[%s6283_s1 + $0x6dc] ss:$12 sps:$4 sm:$0xff]  }
  0x74   : > { %3084 = vmatpush1.bf16.msra.mxu0 %v4570_v63  ;;  %2999 = vmatprep.subr.bf16.mxu1 %v4575_v0  ;;  %v4645_v63 = vld [vmem:[%s6283_s1 + $0x260] ss:$12 sps:$4 sm:$0xff]   ;;  %v4642_v0 = vld [vmem:[%s6283_s1 + $0x6d8] ss:$12 sps:$4 sm:$0xff]  }
  0x75   : > { %3085 = vmatprep.subr.bf16.mxu0 %v4578_v1  ;;  %v4646_v1 = vld [vmem:[%s6283_s1 + $0x1a0] ss:$12 sps:$4 sm:$0xff]  }
  0x77   : > { %3000 = vmatpush1.bf16.msra.mxu1 %v4573_v2  ;;  %v4649_v2 = vld [vmem:[%s6283_s1 + $0x6f4] ss:$12 sps:$4 sm:$0xff]  }
  0x78   : > { %3086 = vmatpush1.bf16.msra.mxu0 %v4576_v3  ;;  %3001 = vmatprep.subr.bf16.mxu1 %v4581_v4  ;;  %v4650_v3 = vld [vmem:[%s6283_s1 + $0x278] ss:$12 sps:$4 sm:$0xff]  }
  0x79   : > { %3087 = vmatprep.subr.bf16.mxu0 %v4584_v5  ;;  %v4651_v4 = vld [vmem:[%s6283_s1 + $0x1b8] ss:$12 sps:$4 sm:$0xff]  }
  0x7a   : > { %v4654_v5 = vld [vmem:[%s6283_s1 + $0x70c] ss:$12 sps:$4 sm:$0xff]  }
  0x7b   : > { %3002 = vmatpush1.bf16.msra.mxu1 %v4579_v6  ;;  %v4652_v6 = vld [vmem:[%s6283_s1 + $0x708] ss:$12 sps:$4 sm:$0xff]  }
  0x7c   : > { %3088 = vmatpush1.bf16.msra.mxu0 %v4582_v7  ;;  %3003 = vmatprep.subr.bf16.mxu1 %v4587_v9  ;;  %v4656_v7 = vld [vmem:[%s6283_s1 + $0x1d0] ss:$12 sps:$4 sm:$0xff]  }
  0x7d   : > { %3089 = vmatprep.subr.bf16.mxu0 %v4590_v11  ;;  %v4659_v9 = vld [vmem:[%s6283_s1 + $0x724] ss:$12 sps:$4 sm:$0xff]   ;;  %v4660_v11 = vld [vmem:[%s6283_s1 + $0x2a8] ss:$12 sps:$4 sm:$0xff]  }
  0x7f   : > { %3004 = vmatpush1.bf16.msra.mxu1 %v4585_v12  ;;  %v4657_v12 = vld [vmem:[%s6283_s1 + $0x720] ss:$12 sps:$4 sm:$0xff]  }
  0x80   : > { %3090 = vmatpush1.bf16.msra.mxu0 %v4588_v13  ;;  %3005 = vmatprep.subr.bf16.mxu1 %v4593_v14  ;;  %v4661_v13 = vld [vmem:[%s6283_s1 + $0x1e8] ss:$12 sps:$4 sm:$0xff]  }
  0x81   : > { %3091 = vmatprep.subr.bf16.mxu0 %v4596_v15  ;;  %v4664_v14 = vld [vmem:[%s6283_s1 + $0x73c] ss:$12 sps:$4 sm:$0xff]   ;;  %v4665_v15 = vld [vmem:[%s6283_s1 + $0x2c0] ss:$12 sps:$4 sm:$0xff]  }
  0x83   : > { %3006 = vmatpush1.bf16.msra.mxu1 %v4591_v16  ;;  %v4662_v16 = vld [vmem:[%s6283_s1 + $0x738] ss:$12 sps:$4 sm:$0xff]  }
  0x84   : > { %3092 = vmatpush1.bf16.msra.mxu0 %v4594_v17  ;;  %4189 = vmatprep.subr.bf16.mxu1 %v4600_v19  ;;  %v4666_v17 = vld [vmem:[%s6283_s1 + $0x200] ss:$12 sps:$4 sm:$0xff]   ;;  %v4670_v19 = vld [vmem:[%s6283_s1 + $0x2d8] ss:$12 sps:$4 sm:$0xff]  }
  0x85   : > { %3104 = vmatprep.subr.bf16.mxu0 %v4599_v18  ;;  %v4669_v18 = vld [vmem:[%s6283_s1 + $0x754] ss:$12 sps:$4 sm:$0xff]  }
  0x86   : > { %3008 = vmatmul.mubr.bf16.vlgmr.msra.gmra.mrb[0].mxu1 %v5410_v21 }
  0x87   : > { %3094 = vmatmul.mubr.bf16.vlgmr.msra.gmra.mrb[0].mxu0 %v5414_v22  ;;  %4190 = vmatpush3.bf16.msra.mxu1 %v4601_v23  ;;  %v4671_v23 = vld [vmem:[%s6283_s1 + $0x218] ss:$12 sps:$4 sm:$0xff]  }
  0x88   : > { %3105 = vmatpush1.bf16.msra.mxu0 %v4597_v20  ;;  %4191 = vmatprep.subr.bf16.mxu1 %v4605_v25  ;;  %v4667_v20 = vld [vmem:[%s6283_s1 + $0x750] ss:$12 sps:$4 sm:$0xff]  }
  0x89   : > { %3106 = vmatprep.subr.bf16.mxu0 %v4604_v24  ;;  %3308 = vmatprep.mubr.bf16.mxu1 %v5129_v52  ;;  %v4615_v52 = vld [vmem:[%s6283_s1 + $0x110] ss:$12 sps:$4 sm:$0xff]   ;;  %v4674_v24 = vld [vmem:[%s6283_s1 + $0x76c] ss:$12 sps:$4 sm:$0xff]  }
  0x8a   : > { %3136 = vmatprep.mubr.bf16.mxu0 %v5475_v40  ;;  %v4675_v25 = vld [vmem:[%s6283_s1 + $0x2f0] ss:$12 sps:$4 sm:$0xff]  }
  0x8b   : > { %4192 = vmatpush3.bf16.msra.mxu1 %v4606_v27  ;;  %v4676_v27 = vld [vmem:[%s6283_s1 + $0x230] ss:$12 sps:$4 sm:$0xff]  }
  0x8c   : > { %3107 = vmatpush1.bf16.msra.mxu0 %v4602_v26  ;;  %4193 = vmatprep.subr.bf16.mxu1 %v4610_v29  ;;  %v4672_v26 = vld [vmem:[%s6283_s1 + $0x768] ss:$12 sps:$4 sm:$0xff]  }
  0x8d   : > { %3108 = vmatprep.subr.bf16.mxu0 %v4609_v28  ;;  %v4679_v28 = vld [vmem:[%s6283_s1 + $0x784] ss:$12 sps:$4 sm:$0xff]   ;;  %v4680_v29 = vld [vmem:[%s6283_s1 + $0x3c8] ss:$12 sps:$4 sm:$0xff]  }
  0x8f   : > { %4194 = vmatpush3.bf16.msra.mxu1 %v4611_v31  ;;  %v5626_v31 = vcombine.low %v5465_v37, %v5468_v38  ;;  %v5649_v37 = vld [vmem:[%s5107_s19 + $0x68] sm:$0xff]  ;;  %v4689_v38 = vld [vmem:[%s6283_s1 + $0x7b4] ss:$12 sps:$4 sm:$0xff]  }
  0x90   : > { %3109 = vmatpush1.bf16.msra.mxu0 %v4607_v30  ;;  %4195 = vmatprep.subr.bf16.mxu1 %v4615_v52  ;;  %v4677_v30 = vld [vmem:[%s6283_s1 + $0x780] ss:$12 sps:$4 sm:$0xff]   ;;  %v4684_v52 = vld [vmem:[%s6283_s1 + $0x79c] ss:$12 sps:$4 sm:$0xff]  }
  0x91   : > { %3110 = vmatprep.subr.bf16.mxu0 %v4614_v32  ;;  %v4681_v32 = vld [vmem:[%s6283_s1 + $0x308] ss:$12 sps:$4 sm:$0xff]  }
  0x93   : > { %4196 = vmatpush3.bf16.msra.mxu1 %v4616_v34  ;;  %v4682_v34 = vld [vmem:[%s6283_s1 + $0x798] ss:$12 sps:$4 sm:$0xff]  }
  0x94   : > { %3111 = vmatpush1.bf16.msra.mxu0 %v4612_v33  ;;  %4197 = vmatprep.subr.bf16.mxu1 %v4620_v36  ;;  %v4685_v33 = vld [vmem:[%s6283_s1 + $0x3e0] ss:$12 sps:$4 sm:$0xff]  }
  0x95   : > { %3112 = vmatprep.subr.bf16.mxu0 %v4619_v35  ;;  %v4686_v35 = vld [vmem:[%s6283_s1 + $0x320] ss:$12 sps:$4 sm:$0xff]  }
  0x96   : > { %v5646_v36 = vld [vmem:[%s5107_s19 + $0x28] sm:$0xff] }
  0x97   : > { %4198 = vmatpush3.bf16.msra.mxu1 %v4621_v42  ;;  %v4687_v42 = vld [vmem:[%s6283_s1 + $0x7b0] ss:$12 sps:$4 sm:$0xff]  }
  0x98   : > { %3113 = vmatpush1.bf16.msra.mxu0 %v4617_v39  ;;  %4199 = vmatprep.subr.bf16.mxu1 %v4625_v45  ;;  %v5656_v39 = vcombine.high %v5646_v36, %v5649_v37  ;;  %v4694_v45 = vld [vmem:[%s6283_s1 + $0x7cc] ss:$12 sps:$4 sm:$0xff]  }
  0x99   : > { %3114 = vmatprep.subr.bf16.mxu0 %v4624_v44  ;;  %v4691_v44 = vld [vmem:[%s6283_s1 + $0x338] ss:$12 sps:$4 sm:$0xff]  }
  0x9b   : > { %4200 = vmatpush3.bf16.msra.mxu1 %v4626_v47  ;;  %v4696_v47 = vld [vmem:[%s6283_s1 + $0x350] ss:$12 sps:$4 sm:$0xff]  }
  0x9c   : > { %3115 = vmatpush1.bf16.msra.mxu0 %v4622_v46  ;;  %4201 = vmatprep.subr.bf16.mxu1 %v4630_v49  ;;  %v4692_v46 = vld [vmem:[%s6283_s1 + $0x7c8] ss:$12 sps:$4 sm:$0xff]  }
  0x9d   : > { %3116 = vmatprep.subr.bf16.mxu0 %v4629_v48  ;;  %v4699_v48 = vld [vmem:[%s6283_s1 + $0x7e4] ss:$12 sps:$4 sm:$0xff]   ;;  %v4700_v49 = vld [vmem:[%s6283_s1 + $0x428] ss:$12 sps:$4 sm:$0xff]  }
  0x9f   : > { %4202 = vmatpush3.bf16.msra.mxu1 %v4631_v51  ;;  %v4701_v51 = vld [vmem:[%s6283_s1 + $0x368] ss:$12 sps:$4 sm:$0xff]  }
  0xa0   : > { %3117 = vmatpush1.bf16.msra.mxu0 %v4627_v50  ;;  %4203 = vmatprep.subr.bf16.mxu1 %v4635_v54  ;;  %v4697_v50 = vld [vmem:[%s6283_s1 + $0x7e0] ss:$12 sps:$4 sm:$0xff]  }
  0xa1   : > { %3118 = vmatprep.subr.bf16.mxu0 %v4634_v53  ;;  %v4704_v53 = vld [vmem:[%s6283_s1 + $0x7fc] ss:$12 sps:$4 sm:$0xff]   ;;  %v4705_v54 = vld [vmem:[%s6283_s1 + $0x440] ss:$12 sps:$4 sm:$0xff]  }
  0xa3   : > { %4204 = vmatpush3.bf16.msra.mxu1 %v4636_v57  ;;  %v4706_v57 = vld [vmem:[%s6283_s1 + $0x380] ss:$12 sps:$4 sm:$0xff]  }
  0xa4   : > { %3119 = vmatpush1.bf16.msra.mxu0 %v4632_v56  ;;  %4211 = vmatprep.subr.bf16.mxu1 %v4640_v59  ;;  %v4702_v56 = vld [vmem:[%s6283_s1 + $0x7f8] ss:$12 sps:$4 sm:$0xff]  }
  0xa5   : > { %3120 = vmatprep.subr.bf16.mxu0 %v4639_v58  ;;  %v4709_v58 = vld [vmem:[%s6283_s1 + $0x814] ss:$12 sps:$4 sm:$0xff]   ;;  %v4710_v59 = vld [vmem:[%s6283_s1 + $0x458] ss:$12 sps:$4 sm:$0xff]  }
  0xa6   : > { %3309 = vmatmul.mubr.bf16.vlgmr.msra.gmra.mrb[4].mxu1 %v5185_v8  ;;  %v4647_v8 = vld [vmem:[%s6283_s1 + $0x6f0] ss:$12 sps:$4 sm:$0xff]  }
  0xa7   : > { %4212 = vmatpush3.bf16.msra.mxu1 %v4641_v61  ;;  %3349 = vmatprep.mubr.bf16.mxu1 %v5286_v41  ;;  %v4655_v41 = vld [vmem:[%s6283_s1 + $0x290] ss:$12 sps:$4 sm:$0xff]   ;;  %v4711_v61 = vld [vmem:[%s6283_s1 + $0x398] ss:$12 sps:$4 sm:$0xff]  }
  0xa8   : > { %3121 = vmatpush1.bf16.msra.mxu0 %v4637_v60  ;;  %4213 = vmatprep.subr.bf16.mxu1 %v4645_v63  ;;  %v4707_v60 = vld [vmem:[%s6283_s1 + $0x810] ss:$12 sps:$4 sm:$0xff]  }
  0xa9   : > { %3122 = vmatprep.subr.bf16.mxu0 %v4644_v62  ;;  %v4714_v62 = vld [vmem:[%s6283_s1 + $0x82c] ss:$12 sps:$4 sm:$0xff]   ;;  %v4715_v63 = vld [vmem:[%s6283_s1 + $0x470] ss:$12 sps:$4 sm:$0xff]  }
  0xab   : > { %4214 = vmatpush3.bf16.msra.mxu1 %v4646_v1  ;;  %v4716_v1 = vld [vmem:[%s6283_s1 + $0x3b0] ss:$12 sps:$4 sm:$0xff]  }
  0xac   : > { %3123 = vmatpush1.bf16.msra.mxu0 %v4642_v0  ;;  %4215 = vmatprep.subr.bf16.mxu1 %v4650_v3  ;;  %v4712_v0 = vld [vmem:[%s6283_s1 + $0x828] ss:$12 sps:$4 sm:$0xff]  }
  0xad   : > { %3124 = vmatprep.subr.bf16.mxu0 %v4649_v2  ;;  %v4719_v2 = vld [vmem:[%s6283_s1 + $0x844] ss:$12 sps:$4 sm:$0xff]   ;;  %v4720_v3 = vld [vmem:[%s6283_s1 + $0x548] ss:$12 sps:$4 sm:$0xff]  }
  0xaf   : > { %4216 = vmatpush3.bf16.msra.mxu1 %v4651_v4  ;;  %v4721_v4 = vld [vmem:[%s6283_s1 + $0x488] ss:$12 sps:$4 sm:$0xff]  }
  0xb0   : > { %3125 = vmatpush1.bf16.msra.mxu0 %v4647_v8  ;;  %4217 = vmatprep.subr.bf16.mxu1 %v4655_v41  ;;  %v4717_v8 = vld [vmem:[%s6283_s1 + $0x840] ss:$12 sps:$4 sm:$0xff]  }
  0xb1   : > { %3126 = vmatprep.subr.bf16.mxu0 %v4654_v5  ;;  %v4724_v5 = vld [vmem:[%s6283_s1 + $0x85c] ss:$12 sps:$4 sm:$0xff]   ;;  %v4725_v41 = vld [vmem:[%s6283_s1 + $0x560] ss:$12 sps:$4 sm:$0xff]  }
  0xb3   : > { %4218 = vmatpush3.bf16.msra.mxu1 %v4656_v7  ;;  %v4726_v7 = vld [vmem:[%s6283_s1 + $0x4a0] ss:$12 sps:$4 sm:$0xff]  }
  0xb4   : > { %3127 = vmatpush1.bf16.msra.mxu0 %v4652_v6  ;;  %4219 = vmatprep.subr.bf16.mxu1 %v4660_v11  ;;  %v4722_v6 = vld [vmem:[%s6283_s1 + $0x858] ss:$12 sps:$4 sm:$0xff]  }
  0xb5   : > { %3128 = vmatprep.subr.bf16.mxu0 %v4659_v9  ;;  %v4729_v9 = vld [vmem:[%s6283_s1 + $0x874] ss:$12 sps:$4 sm:$0xff]   ;;  %v4730_v11 = vld [vmem:[%s6283_s1 + $0x578] ss:$12 sps:$4 sm:$0xff]  }
  0xb7   : > { %4220 = vmatpush3.bf16.msra.mxu1 %v4661_v13  ;;  %v4734_v13 = vld [vmem:[%s6283_s1 + $0x88c] ss:$12 sps:$4 sm:$0xff]  }
  0xb8   : > { %3129 = vmatpush1.bf16.msra.mxu0 %v4657_v12  ;;  %4221 = vmatprep.subr.bf16.mxu1 %v4665_v15  ;;  %v4731_v12 = vld [vmem:[%s6283_s1 + $0x4b8] ss:$12 sps:$4 sm:$0xff]   ;;  %v4736_v15 = vld [vmem:[%s6283_s1 + $0x4d0] ss:$12 sps:$4 sm:$0xff]  }
  0xb9   : > { %3130 = vmatprep.subr.bf16.mxu0 %v4664_v14  ;;  %v4732_v14 = vld [vmem:[%s6283_s1 + $0x888] ss:$12 sps:$4 sm:$0xff]  }
  0xbb   : > { %4222 = vmatpush3.bf16.msra.mxu1 %v4666_v17  ;;  %v4740_v17 = vld [vmem:[%s6283_s1 + $0x5a8] ss:$12 sps:$4 sm:$0xff]  }
  0xbc   : > { %3131 = vmatpush1.bf16.msra.mxu0 %v4662_v16  ;;  %4223 = vmatprep.subr.bf16.mxu1 %v4670_v19  ;;  %v4739_v16 = vld [vmem:[%s6283_s1 + $0x8a4] ss:$12 sps:$4 sm:$0xff]   ;;  %v4741_v19 = vld [vmem:[%s6283_s1 + $0x4e8] ss:$12 sps:$4 sm:$0xff]  }
  0xbd   : > { %3132 = vmatprep.subr.bf16.mxu0 %v4669_v18  ;;  %v4737_v18 = vld [vmem:[%s6283_s1 + $0x8a0] ss:$12 sps:$4 sm:$0xff]  }
  0xbf   : > { %4224 = vmatpush3.bf16.msra.mxu1 %v4671_v23  ;;  %v4745_v23 = vld [vmem:[%s6283_s1 + $0x5c0] ss:$12 sps:$4 sm:$0xff]  }
  0xc0   : > { %3133 = vmatpush1.bf16.msra.mxu0 %v4667_v20  ;;  %4225 = vmatprep.subr.bf16.mxu1 %v4675_v25  ;;  %v4744_v20 = vld [vmem:[%s6283_s1 + $0x8bc] ss:$12 sps:$4 sm:$0xff]   ;;  %v4746_v25 = vld [vmem:[%s6283_s1 + $0x500] ss:$12 sps:$4 sm:$0xff]  }
  0xc1   : > { %3134 = vmatprep.subr.bf16.mxu0 %v4674_v24  ;;  %v4742_v24 = vld [vmem:[%s6283_s1 + $0x8b8] ss:$12 sps:$4 sm:$0xff]  }
  0xc3   : > { %4226 = vmatpush3.bf16.msra.mxu1 %v4676_v27  ;;  %v4750_v27 = vld [vmem:[%s6283_s1 + $0x5d8] ss:$12 sps:$4 sm:$0xff]  }
  0xc4   : > { %3135 = vmatpush1.bf16.msra.mxu0 %v4672_v26  ;;  %4233 = vmatprep.subr.bf16.mxu1 %v4680_v29  ;;  %v4749_v26 = vld [vmem:[%s6283_s1 + $0x8d4] ss:$12 sps:$4 sm:$0xff]   ;;  %v4751_v29 = vld [vmem:[%s6283_s1 + $0x518] ss:$12 sps:$4 sm:$0xff]  }
  0xc5   : > { %3147 = vmatprep.subr.bf16.mxu0 %v4679_v28  ;;  %v4747_v28 = vld [vmem:[%s6283_s1 + $0x8d0] ss:$12 sps:$4 sm:$0xff]  }
  0xc6   : > { %3350 = vmatmul.mubr.bf16.vlgmr.msra.gmra.mrb[8].mxu1 %v5410_v21  ;;  %v4690_v21 = vld [vmem:[%s6283_s1 + $0x3f8] ss:$12 sps:$4 sm:$0xff]  }
  0xc7   : > { %3137 = vmatmul.mubr.bf16.vlgmr.msra.gmra.mrb[0].mxu0 %v5626_v31  ;;  %4234 = vmatpush3.bf16.msra.mxu1 %v4681_v32  ;;  %v4755_v32 = vld [vmem:[%s6283_s1 + $0x5f0] ss:$12 sps:$4 sm:$0xff]  }
  0xc8   : > { %3148 = vmatpush1.bf16.msra.mxu0 %v4677_v30  ;;  %4235 = vmatprep.subr.bf16.mxu1 %v4685_v33  ;;  %v4754_v30 = vld [vmem:[%s6283_s1 + $0x8ec] ss:$12 sps:$4 sm:$0xff]   ;;  %v4756_v33 = vld [vmem:[%s6283_s1 + $0x530] ss:$12 sps:$4 sm:$0xff]  }
  0xc9   : > { %3149 = vmatprep.subr.bf16.mxu0 %v4684_v52  ;;  %3390 = vmatprep.mubr.bf16.mxu1 %v5134_v55  ;;  %v4695_v55 = vld [vmem:[%s6283_s1 + $0x410] ss:$12 sps:$4 sm:$0xff]   ;;  %v4752_v52 = vld [vmem:[%s6283_s1 + $0x8e8] ss:$12 sps:$4 sm:$0xff]  }
  0xca   : > { %3179 = vmatprep.mubr.bf16.mxu0 %v5656_v39 }
  0xcb   : > { %4236 = vmatpush3.bf16.msra.mxu1 %v4686_v35  ;;  %v4760_v35 = vld [vmem:[%s6283_s1 + $0x6c8] ss:$12 sps:$4 sm:$0xff]  }
  0xcc   : > { %3150 = vmatpush1.bf16.msra.mxu0 %v4682_v34  ;;  %4237 = vmatprep.subr.bf16.mxu1 %v4690_v21  ;;  %v4759_v34 = vld [vmem:[%s6283_s1 + $0x904] ss:$12 sps:$4 sm:$0xff]  }
  0xcd   : > { %3151 = vmatprep.subr.bf16.mxu0 %v4689_v38  ;;  %v4757_v38 = vld [vmem:[%s6283_s1 + $0x900] ss:$12 sps:$4 sm:$0xff]   ;;  %v5837_v21 = vld [vmem:[%s5107_s19 + $0x30] sm:$0xff] }
  0xcf   : > { %4238 = vmatpush3.bf16.msra.mxu1 %v4691_v44  ;;  %v5844_v44 = vld [vmem:[%s5107_s19 + $0x70] sm:$0xff] }
  0xd0   : > { %3152 = vmatpush1.bf16.msra.mxu0 %v4687_v42  ;;  %4239 = vmatprep.subr.bf16.mxu1 %v4695_v55  ;;  %v5841_v42 = vcombine.low %v5646_v36, %v5649_v37  ;;  %v4764_v55 = vld [vmem:[%s6283_s1 + $0x91c] ss:$12 sps:$4 sm:$0xff]   ;;  %v4762_v36 = vld [vmem:[%s6283_s1 + $0x918] ss:$12 sps:$4 sm:$0xff]   ;;  %v5860_v37 = vcombine.high %v5837_v21, %v5844_v44 }
  0xd1   : > { %3153 = vmatprep.subr.bf16.mxu0 %v4694_v45  ;;  %v4761_v45 = vld [vmem:[%s6283_s1 + $0x608] ss:$12 sps:$4 sm:$0xff]  }
  0xd3   : > { %4240 = vmatpush3.bf16.msra.mxu1 %v4696_v47  ;;  %v4766_v47 = vld [vmem:[%s6283_s1 + $0x620] ss:$12 sps:$4 sm:$0xff]  }
  0xd4   : > { %3154 = vmatpush1.bf16.msra.mxu0 %v4692_v46  ;;  %4241 = vmatprep.subr.bf16.mxu1 %v4700_v49  ;;  %v4765_v46 = vld [vmem:[%s6283_s1 + $0x6e0] ss:$12 sps:$4 sm:$0xff]   ;;  %v4770_v49 = vld [vmem:[%s6283_s1 + $0x6f8] ss:$12 sps:$4 sm:$0xff]  }
  0xd5   : > { %3155 = vmatprep.subr.bf16.mxu0 %v4699_v48  ;;  %v4769_v48 = vld [vmem:[%s6283_s1 + $0x934] ss:$12 sps:$4 sm:$0xff]  }
  0xd7   : > { %4242 = vmatpush3.bf16.msra.mxu1 %v4701_v51  ;;  %v4774_v51 = vld [vmem:[%s6283_s1 + $0x94c] ss:$12 sps:$4 sm:$0xff]  }
  0xd8   : > { %3156 = vmatpush1.bf16.msra.mxu0 %v4697_v50  ;;  %4243 = vmatprep.subr.bf16.mxu1 %v4705_v54  ;;  %v4771_v50 = vld [vmem:[%s6283_s1 + $0x638] ss:$12 sps:$4 sm:$0xff]   ;;  %v4776_v54 = vld [vmem:[%s6283_s1 + $0x650] ss:$12 sps:$4 sm:$0xff]  }
  0xd9   : > { %3157 = vmatprep.subr.bf16.mxu0 %v4704_v53  ;;  %v4772_v53 = vld [vmem:[%s6283_s1 + $0x948] ss:$12 sps:$4 sm:$0xff]  }
  0xdb   : > { %4244 = vmatpush3.bf16.msra.mxu1 %v4706_v57  ;;  %v4780_v57 = vld [vmem:[%s6283_s1 + $0x728] ss:$12 sps:$4 sm:$0xff]  }
  0xdc   : > { %3158 = vmatpush1.bf16.msra.mxu0 %v4702_v56  ;;  %4245 = vmatprep.subr.bf16.mxu1 %v4710_v59  ;;  %v4779_v56 = vld [vmem:[%s6283_s1 + $0x964] ss:$12 sps:$4 sm:$0xff]   ;;  %v4781_v59 = vld [vmem:[%s6283_s1 + $0x668] ss:$12 sps:$4 sm:$0xff]  }
  0xdd   : > { %3159 = vmatprep.subr.bf16.mxu0 %v4709_v58  ;;  %v4777_v58 = vld [vmem:[%s6283_s1 + $0x960] ss:$12 sps:$4 sm:$0xff]  }
  0xdf   : > { %4246 = vmatpush3.bf16.msra.mxu1 %v4711_v61  ;;  %v4785_v61 = vld [vmem:[%s6283_s1 + $0x740] ss:$12 sps:$4 sm:$0xff]  }
  0xe0   : > { %3160 = vmatpush1.bf16.msra.mxu0 %v4707_v60  ;;  %4247 = vmatprep.subr.bf16.mxu1 %v4715_v63  ;;  %v4784_v60 = vld [vmem:[%s6283_s1 + $0x97c] ss:$12 sps:$4 sm:$0xff]   ;;  %v4786_v63 = vld [vmem:[%s6283_s1 + $0x680] ss:$12 sps:$4 sm:$0xff]  }
  0xe1   : > { %3161 = vmatprep.subr.bf16.mxu0 %v4714_v62  ;;  %v4782_v62 = vld [vmem:[%s6283_s1 + $0x978] ss:$12 sps:$4 sm:$0xff]  }
  0xe3   : > { %4248 = vmatpush3.bf16.msra.mxu1 %v4716_v1  ;;  %v4790_v1 = vld [vmem:[%s6283_s1 + $0x758] ss:$12 sps:$4 sm:$0xff]  }
  0xe4   : > { %3162 = vmatpush1.bf16.msra.mxu0 %v4712_v0  ;;  %4255 = vmatprep.subr.bf16.mxu1 %v4720_v3  ;;  %v4789_v0 = vld [vmem:[%s6283_s1 + $0x994] ss:$12 sps:$4 sm:$0xff]   ;;  %v4791_v3 = vld [vmem:[%s6283_s1 + $0x698] ss:$12 sps:$4 sm:$0xff]  }
  0xe5   : > { %3163 = vmatprep.subr.bf16.mxu0 %v4719_v2  ;;  %v4787_v2 = vld [vmem:[%s6283_s1 + $0x990] ss:$12 sps:$4 sm:$0xff]  }
  0xe6   : > { %3391 = vmatmul.mubr.bf16.vlgmr.msra.gmra.mrb[12].mxu1 %v5190_v10  ;;  %v4727_v10 = vld [vmem:[%s6283_s1 + $0x870] ss:$12 sps:$4 sm:$0xff]  }
  0xe7   : > { %4256 = vmatpush3.bf16.msra.mxu1 %v4721_v4  ;;  %3431 = vmatprep.mubr.bf16.mxu1 %v5293_v43  ;;  %v4735_v43 = vld [vmem:[%s6283_s1 + $0x590] ss:$12 sps:$4 sm:$0xff]  }
  0xe8   : > { %3164 = vmatpush1.bf16.msra.mxu0 %v4717_v8  ;;  %4257 = vmatprep.subr.bf16.mxu1 %v4725_v41  ;;  %v4794_v8 = vld [vmem:[%s6283_s1 + $0x9ac] ss:$12 sps:$4 sm:$0xff]   ;;  %v4795_v4 = vld [vmem:[%s6283_s1 + $0x770] ss:$12 sps:$4 sm:$0xff]  }
  0xe9   : > { %3165 = vmatprep.subr.bf16.mxu0 %v4724_v5  ;;  %v4792_v5 = vld [vmem:[%s6283_s1 + $0x9a8] ss:$12 sps:$4 sm:$0xff]   ;;  %v4796_v41 = vld [vmem:[%s6283_s1 + $0x6b0] ss:$12 sps:$4 sm:$0xff]  }
  0xeb   : > { %4258 = vmatpush3.bf16.msra.mxu1 %v4726_v7  ;;  %v4800_v7 = vld [vmem:[%s6283_s1 + $0x848] ss:$12 sps:$4 sm:$0xff]  }
  0xec   : > { %3166 = vmatpush1.bf16.msra.mxu0 %v4722_v6  ;;  %4259 = vmatprep.subr.bf16.mxu1 %v4730_v11  ;;  %v4799_v6 = vld [vmem:[%s6283_s1 + $0x9c4] ss:$12 sps:$4 sm:$0xff]   ;;  %v4801_v11 = vld [vmem:[%s6283_s1 + $0x788] ss:$12 sps:$4 sm:$0xff]  }
  0xed   : > { %3167 = vmatprep.subr.bf16.mxu0 %v4729_v9  ;;  %v4797_v9 = vld [vmem:[%s6283_s1 + $0x9c0] ss:$12 sps:$4 sm:$0xff]  }
  0xef   : > { %4260 = vmatpush3.bf16.msra.mxu1 %v4731_v12  ;;  %v4805_v12 = vld [vmem:[%s6283_s1 + $0x860] ss:$12 sps:$4 sm:$0xff]  }
  0xf0   : > { %3168 = vmatpush1.bf16.msra.mxu0 %v4727_v10  ;;  %4261 = vmatprep.subr.bf16.mxu1 %v4735_v43  ;;  %v4804_v10 = vld [vmem:[%s6283_s1 + $0x9dc] ss:$12 sps:$4 sm:$0xff]   ;;  %v4806_v43 = vld [vmem:[%s6283_s1 + $0x7a0] ss:$12 sps:$4 sm:$0xff]  }
  0xf1   : > { %3169 = vmatprep.subr.bf16.mxu0 %v4734_v13  ;;  %v4802_v13 = vld [vmem:[%s6283_s1 + $0x9d8] ss:$12 sps:$4 sm:$0xff]  }
  0xf3   : > { %4262 = vmatpush3.bf16.msra.mxu1 %v4736_v15  ;;  %v4807_v15 = vld [vmem:[%s6283_s1 + $0x9f0] ss:$12 sps:$4 sm:$0xff]  }
  0xf4   : > { %3170 = vmatpush1.bf16.msra.mxu0 %v4732_v14  ;;  %4263 = vmatprep.subr.bf16.mxu1 %v4740_v17  ;;  %v4809_v14 = vld [vmem:[%s6283_s1 + $0x9f4] ss:$12 sps:$4 sm:$0xff]   ;;  %v4814_v17 = vld [vmem:[%s6283_s1 + $0xa0c] ss:$12 sps:$4 sm:$0xff]  }
  0xf5   : > { %3171 = vmatprep.subr.bf16.mxu0 %v4739_v16  ;;  %v4811_v16 = vld [vmem:[%s6283_s1 + $0x7b8] ss:$12 sps:$4 sm:$0xff]  }
  0xf7   : > { %4264 = vmatpush3.bf16.msra.mxu1 %v4741_v19  ;;  %v4816_v19 = vld [vmem:[%s6283_s1 + $0x7d0] ss:$12 sps:$4 sm:$0xff]  }
  0xf8   : > { %3172 = vmatpush1.bf16.msra.mxu0 %v4737_v18  ;;  %4265 = vmatprep.subr.bf16.mxu1 %v4745_v23  ;;  %v4815_v18 = vld [vmem:[%s6283_s1 + $0x890] ss:$12 sps:$4 sm:$0xff]   ;;  %v4820_v23 = vld [vmem:[%s6283_s1 + $0x8a8] ss:$12 sps:$4 sm:$0xff]  }
  0xf9   : > { %3173 = vmatprep.subr.bf16.mxu0 %v4744_v20  ;;  %v4819_v20 = vld [vmem:[%s6283_s1 + $0xa24] ss:$12 sps:$4 sm:$0xff]  }
  0xfb   : > { %4266 = vmatpush3.bf16.msra.mxu1 %v4746_v25  ;;  %v4821_v25 = vld [vmem:[%s6283_s1 + $0x7e8] ss:$12 sps:$4 sm:$0xff]  }
  0xfc   : > { %3174 = vmatpush1.bf16.msra.mxu0 %v4742_v24  ;;  %4267 = vmatprep.subr.bf16.mxu1 %v4750_v27  ;;  %v4817_v24 = vld [vmem:[%s6283_s1 + $0xa20] ss:$12 sps:$4 sm:$0xff]  }
  0xfd   : > { %3175 = vmatprep.subr.bf16.mxu0 %v4749_v26  ;;  %v4824_v26 = vld [vmem:[%s6283_s1 + $0xa3c] ss:$12 sps:$4 sm:$0xff]   ;;  %v4825_v27 = vld [vmem:[%s6283_s1 + $0x8c0] ss:$12 sps:$4 sm:$0xff]  }
  0xff   : > { %4268 = vmatpush3.bf16.msra.mxu1 %v4751_v29  ;;  %v4826_v29 = vld [vmem:[%s6283_s1 + $0x800] ss:$12 sps:$4 sm:$0xff]  }
 0x100   : > { %3176 = vmatpush1.bf16.msra.mxu0 %v4747_v28  ;;  %4269 = vmatprep.subr.bf16.mxu1 %v4755_v32  ;;  %v4822_v28 = vld [vmem:[%s6283_s1 + $0xa38] ss:$12 sps:$4 sm:$0xff]  }
 0x101   : > { %3177 = vmatprep.subr.bf16.mxu0 %v4754_v30  ;;  %v4829_v30 = vld [vmem:[%s6283_s1 + $0xa54] ss:$12 sps:$4 sm:$0xff]   ;;  %v4830_v32 = vld [vmem:[%s6283_s1 + $0x8d8] ss:$12 sps:$4 sm:$0xff]  }
 0x103   : > { %4270 = vmatpush3.bf16.msra.mxu1 %v4756_v33  ;;  %v4831_v33 = vld [vmem:[%s6283_s1 + $0x818] ss:$12 sps:$4 sm:$0xff]  }
 0x104   : > { %3178 = vmatpush1.bf16.msra.mxu0 %v4752_v52  ;;  %4277 = vmatprep.subr.bf16.mxu1 %v4760_v35  ;;  %v4827_v52 = vld [vmem:[%s6283_s1 + $0xa50] ss:$12 sps:$4 sm:$0xff]  }
 0x105   : > { %3190 = vmatprep.subr.bf16.mxu0 %v4759_v34  ;;  %v4834_v34 = vld [vmem:[%s6283_s1 + $0xa6c] ss:$12 sps:$4 sm:$0xff]   ;;  %v4835_v35 = vld [vmem:[%s6283_s1 + $0x8f0] ss:$12 sps:$4 sm:$0xff]  }
 0x106   : > { %3432 = vmatmul.mubr.bf16.vlgmr.msra.gmra.mrb[16].mxu1 %v5414_v22  ;;  %v4767_v22 = vld [vmem:[%s6283_s1 + $0x930] ss:$12 sps:$4 sm:$0xff]  }
 0x107   : > { %3180 = vmatmul.mubr.bf16.vlgmr.msra.gmra.mrb[0].mxu0 %v5841_v42  ;;  %4278 = vmatpush3.bf16.msra.mxu1 %v4761_v45  ;;  %v4836_v45 = vld [vmem:[%s6283_s1 + $0x830] ss:$12 sps:$4 sm:$0xff]  }
 0x108   : > { %3191 = vmatpush1.bf16.msra.mxu0 %v4757_v38  ;;  %4279 = vmatprep.subr.bf16.mxu1 %v4765_v46  ;;  %v4832_v38 = vld [vmem:[%s6283_s1 + $0xa68] ss:$12 sps:$4 sm:$0xff]  }
 0x109   : > { %3192 = vmatprep.subr.bf16.mxu0 %v4764_v55  ;;  %3472 = vmatprep.mubr.bf16.mxu1 %v5475_v40  ;;  %v4775_v40 = vld [vmem:[%s6283_s1 + $0x710] ss:$12 sps:$4 sm:$0xff]   ;;  %v4840_v46 = vld [vmem:[%s6283_s1 + $0x9c8] ss:$12 sps:$4 sm:$0xff]  }
 0x10a   : > { %3222 = vmatprep.mubr.bf16.mxu0 %v5860_v37  ;;  %v4839_v55 = vld [vmem:[%s6283_s1 + $0xa84] ss:$12 sps:$4 sm:$0xff]  }
 0x10b   : > { %4280 = vmatpush3.bf16.msra.mxu1 %v4766_v47  ;;  %v6050_v47 = vld [vmem:[%s5107_s19 + $0x38] sm:$0xff] }
 0x10c   : > { %3193 = vmatpush1.bf16.msra.mxu0 %v4762_v36  ;;  %4281 = vmatprep.subr.bf16.mxu1 %v4770_v49  ;;  %v6047_v36 = vcombine.low %v5837_v21, %v5844_v44  ;;  %v4837_v49 = vld [vmem:[%s6283_s1 + $0xa80] ss:$12 sps:$4 sm:$0xff]   ;;  %v4844_v21 = vld [vmem:[%s6283_s1 + $0xa9c] ss:$12 sps:$4 sm:$0xff]  }
 0x10d   : > { %3194 = vmatprep.subr.bf16.mxu0 %v4769_v48  ;;  %v6053_v48 = vld [vmem:[%s5107_s19 + $0x78] sm:$0xff]  ;;  %v4845_v44 = vld [vmem:[%s6283_s1 + $0x9e0] ss:$12 sps:$4 sm:$0xff]  }
 0x10f   : > { %4282 = vmatpush3.bf16.msra.mxu1 %v4771_v50  ;;  %v6069_v50 = vcombine.high %v6050_v47, %v6053_v48 }
 0x110   : > { %3195 = vmatpush1.bf16.msra.mxu0 %v4767_v22  ;;  %4283 = vmatprep.subr.bf16.mxu1 %v4775_v40  ;;  %v4841_v22 = vld [vmem:[%s6283_s1 + $0x908] ss:$12 sps:$4 sm:$0xff]   ;;  %v4846_v40 = vld [vmem:[%s6283_s1 + $0x920] ss:$12 sps:$4 sm:$0xff]  }
 0x111   : > { %3196 = vmatprep.subr.bf16.mxu0 %v4774_v51  ;;  %v4842_v51 = vld [vmem:[%s6283_s1 + $0xa98] ss:$12 sps:$4 sm:$0xff]  }
 0x113   : > { %4284 = vmatpush3.bf16.msra.mxu1 %v4776_v54  ;;  %v4847_v54 = vld [vmem:[%s6283_s1 + $0xab0] ss:$12 sps:$4 sm:$0xff]  }
 0x114   : > { %3197 = vmatpush1.bf16.msra.mxu0 %v4772_v53  ;;  %4285 = vmatprep.subr.bf16.mxu1 %v4780_v57  ;;  %v4849_v53 = vld [vmem:[%s6283_s1 + $0xab4] ss:$12 sps:$4 sm:$0xff]   ;;  %v4854_v57 = vld [vmem:[%s6283_s1 + $0xacc] ss:$12 sps:$4 sm:$0xff]  }
 0x115   : > { %3198 = vmatprep.subr.bf16.mxu0 %v4779_v56  ;;  %v4851_v56 = vld [vmem:[%s6283_s1 + $0x938] ss:$12 sps:$4 sm:$0xff]  }
 0x117   : > { %4286 = vmatpush3.bf16.msra.mxu1 %v4781_v59  ;;  %v4856_v59 = vld [vmem:[%s6283_s1 + $0x950] ss:$12 sps:$4 sm:$0xff]  }
 0x118   : > { %3199 = vmatpush1.bf16.msra.mxu0 %v4777_v58  ;;  %4287 = vmatprep.subr.bf16.mxu1 %v4785_v61  ;;  %v4852_v58 = vld [vmem:[%s6283_s1 + $0xac8] ss:$12 sps:$4 sm:$0xff]  }
 0x119   : > { %3200 = vmatprep.subr.bf16.mxu0 %v4784_v60  ;;  %v4859_v60 = vld [vmem:[%s6283_s1 + $0xae4] ss:$12 sps:$4 sm:$0xff]   ;;  %v4860_v61 = vld [vmem:[%s6283_s1 + $0xa28] ss:$12 sps:$4 sm:$0xff]  }
 0x11b   : > { %4288 = vmatpush3.bf16.msra.mxu1 %v4786_v63  ;;  %v4861_v63 = vld [vmem:[%s6283_s1 + $0x968] ss:$12 sps:$4 sm:$0xff]  }
 0x11c   : > { %3201 = vmatpush1.bf16.msra.mxu0 %v4782_v62  ;;  %4289 = vmatprep.subr.bf16.mxu1 %v4790_v1  ;;  %v4857_v62 = vld [vmem:[%s6283_s1 + $0xae0] ss:$12 sps:$4 sm:$0xff]  }
 0x11d   : > { %3202 = vmatprep.subr.bf16.mxu0 %v4789_v0  ;;  %v4864_v0 = vld [vmem:[%s6283_s1 + $0xafc] ss:$12 sps:$4 sm:$0xff]   ;;  %v4865_v1 = vld [vmem:[%s6283_s1 + $0xa40] ss:$12 sps:$4 sm:$0xff]  }
 0x11f   : > { %4290 = vmatpush3.bf16.msra.mxu1 %v4791_v3  ;;  %v4866_v3 = vld [vmem:[%s6283_s1 + $0x980] ss:$12 sps:$4 sm:$0xff]  }
 0x120   : > { %3203 = vmatpush1.bf16.msra.mxu0 %v4787_v2  ;;  %4291 = vmatprep.subr.bf16.mxu1 %v4795_v4  ;;  %v4862_v2 = vld [vmem:[%s6283_s1 + $0xaf8] ss:$12 sps:$4 sm:$0xff]  }
 0x121   : > { %3204 = vmatprep.subr.bf16.mxu0 %v4794_v8  ;;  %v4869_v8 = vld [vmem:[%s6283_s1 + $0xb14] ss:$12 sps:$4 sm:$0xff]   ;;  %v4870_v4 = vld [vmem:[%s6283_s1 + $0xa58] ss:$12 sps:$4 sm:$0xff]  }
 0x123   : > { %4292 = vmatpush3.bf16.msra.mxu1 %v4796_v41 }
 0x124   : > { %3205 = vmatpush1.bf16.msra.mxu0 %v4792_v5  ;;  %4299 = vmatprep.subr.bf16.mxu1 %v4800_v7  ;;  %v4867_v7 = vld [vmem:[%s6283_s1 + $0xb10] ss:$12 sps:$4 sm:$0xff]  }
 0x125   : > { %3206 = vmatprep.subr.bf16.mxu0 %v4799_v6 }
 0x126   : > { %3473 = vmatmul.mubr.bf16.vlgmr.msra.gmra.mrb[20].mxu1 %v5626_v31  ;;  %v4810_v31 = vld [vmem:[%s6283_s1 + $0x878] ss:$12 sps:$4 sm:$0xff]  }
 0x127   : > { %4300 = vmatpush3.bf16.msra.mxu1 %v4801_v11  ;;  %3513 = vmatprep.mubr.bf16.mxu1 %v5656_v39  ;;  %v4812_v39 = vld [vmem:[%s6283_s1 + $0xa08] ss:$12 sps:$4 sm:$0xff]  }
 0x128   : > { %3207 = vmatpush1.bf16.msra.mxu0 %v4797_v9  ;;  %4301 = vmatprep.subr.bf16.mxu1 %v4805_v12  ;;  %v4871_v9 = vld [vmem:[%s6283_s1 + $0x998] ss:$12 sps:$4 sm:$0xff]   ;;  %v4875_v12 = vld [vmem:[%s6283_s1 + $0xa70] ss:$12 sps:$4 sm:$0xff]  }
 0x129   : > { %3208 = vmatprep.subr.bf16.mxu0 %v4804_v10  ;;  %v4874_v10 = vld [vmem:[%s6283_s1 + $0xb2c] ss:$12 sps:$4 sm:$0xff]  }
 0x12b   : > { %4302 = vmatpush3.bf16.msra.mxu1 %v4806_v43  ;;  %v4876_v43 = vld [vmem:[%s6283_s1 + $0x9b0] ss:$12 sps:$4 sm:$0xff]  }
 0x12c   : > { %3209 = vmatpush1.bf16.msra.mxu0 %v4802_v13  ;;  %4303 = vmatprep.subr.bf16.mxu1 %v4810_v31  ;;  %v4872_v13 = vld [vmem:[%s6283_s1 + $0xb28] ss:$12 sps:$4 sm:$0xff]  }
 0x12d   : > { %3210 = vmatprep.subr.bf16.mxu0 %v4809_v14  ;;  %v4879_v14 = vld [vmem:[%s6283_s1 + $0xb44] ss:$12 sps:$4 sm:$0xff]   ;;  %v4880_v31 = vld [vmem:[%s6283_s1 + $0xb48] ss:$12 sps:$4 sm:$0xff]  }
 0x12f   : > { %4304 = vmatpush3.bf16.msra.mxu1 %v4811_v16  ;;  %v4881_v16 = vld [vmem:[%s6283_s1 + $0xa88] ss:$12 sps:$4 sm:$0xff]  }
 0x130   : > { %3211 = vmatpush1.bf16.msra.mxu0 %v4807_v15  ;;  %4305 = vmatprep.subr.bf16.mxu1 %v4815_v18  ;;  %v4877_v15 = vld [vmem:[%s6283_s1 + $0xb40] ss:$12 sps:$4 sm:$0xff]  }
 0x131   : > { %3212 = vmatprep.subr.bf16.mxu0 %v4814_v17  ;;  %v4884_v17 = vld [vmem:[%s6283_s1 + $0xb5c] ss:$12 sps:$4 sm:$0xff]   ;;  %v4885_v18 = vld [vmem:[%s6283_s1 + $0xb60] ss:$12 sps:$4 sm:$0xff]  }
 0x133   : > { %4306 = vmatpush3.bf16.msra.mxu1 %v4816_v19  ;;  %v4886_v19 = vld [vmem:[%s6283_s1 + $0xaa0] ss:$12 sps:$4 sm:$0xff]  }
 0x134   : > { %3213 = vmatpush1.bf16.msra.mxu0 %v4812_v39  ;;  %4307 = vmatprep.subr.bf16.mxu1 %v4820_v23  ;;  %v4882_v39 = vld [vmem:[%s6283_s1 + $0xb58] ss:$12 sps:$4 sm:$0xff]  }
 0x135   : > { %3214 = vmatprep.subr.bf16.mxu0 %v4819_v20  ;;  %v4889_v20 = vld [vmem:[%s6283_s1 + $0xb74] ss:$12 sps:$4 sm:$0xff]   ;;  %v4890_v23 = vld [vmem:[%s6283_s1 + $0xb78] ss:$12 sps:$4 sm:$0xff]  }
 0x137   : > { %4308 = vmatpush3.bf16.msra.mxu1 %v4821_v25  ;;  %v4891_v25 = vld [vmem:[%s6283_s1 + $0xab8] ss:$12 sps:$4 sm:$0xff]  }
 0x138   : > { %3215 = vmatpush1.bf16.msra.mxu0 %v4817_v24  ;;  %4309 = vmatprep.subr.bf16.mxu1 %v4825_v27  ;;  %v4887_v24 = vld [vmem:[%s6283_s1 + $0xb70] ss:$12 sps:$4 sm:$0xff]  }
 0x139   : > { %3216 = vmatprep.subr.bf16.mxu0 %v4824_v26  ;;  %v4894_v26 = vld [vmem:[%s6283_s1 + $0xb8c] ss:$12 sps:$4 sm:$0xff]   ;;  %v4895_v27 = vld [vmem:[%s6283_s1 + $0xb90] ss:$12 sps:$4 sm:$0xff]  }
 0x13b   : > { %4310 = vmatpush3.bf16.msra.mxu1 %v4826_v29  ;;  %v4896_v29 = vld [vmem:[%s6283_s1 + $0xad0] ss:$12 sps:$4 sm:$0xff]  }
 0x13c   : > { %3217 = vmatpush1.bf16.msra.mxu0 %v4822_v28  ;;  %4311 = vmatprep.subr.bf16.mxu1 %v4830_v32  ;;  %v4892_v28 = vld [vmem:[%s6283_s1 + $0xb88] ss:$12 sps:$4 sm:$0xff]  }
 0x13d   : > { %3218 = vmatprep.subr.bf16.mxu0 %v4829_v30  ;;  %v4899_v30 = vld [vmem:[%s6283_s1 + $0xba4] ss:$12 sps:$4 sm:$0xff]   ;;  %v4900_v32 = vld [vmem:[%s6283_s1 + $0xba8] ss:$12 sps:$4 sm:$0xff]  }
 0x13f   : > { %4312 = vmatpush3.bf16.msra.mxu1 %v4831_v33  ;;  %v4901_v33 = vld [vmem:[%s6283_s1 + $0xae8] ss:$12 sps:$4 sm:$0xff]  }
 0x140   : > { %3219 = vmatpush1.bf16.msra.mxu0 %v4827_v52  ;;  %4313 = vmatprep.subr.bf16.mxu1 %v4835_v35  ;;  %v4897_v52 = vld [vmem:[%s6283_s1 + $0xba0] ss:$12 sps:$4 sm:$0xff]  }
 0x141   : > { %3220 = vmatprep.subr.bf16.mxu0 %v4834_v34  ;;  %v4904_v34 = vld [vmem:[%s6283_s1 + $0xbbc] ss:$12 sps:$4 sm:$0xff]   ;;  %v4905_v35 = vld [vmem:[%s6283_s1 + $0xbc0] ss:$12 sps:$4 sm:$0xff]  }
 0x143   : > { %4314 = vmatpush3.bf16.msra.mxu1 %v4836_v45  ;;  %v4906_v45 = vld [vmem:[%s6283_s1 + $0xb00] ss:$12 sps:$4 sm:$0xff]  }
 0x144   : > { %3221 = vmatpush1.bf16.msra.mxu0 %v4832_v38  ;;  %4321 = vmatprep.subr.bf16.mxu1 %v4840_v46  ;;  %v4902_v38 = vld [vmem:[%s6283_s1 + $0xbb8] ss:$12 sps:$4 sm:$0xff]  }
 0x145   : > { %3233 = vmatprep.subr.bf16.mxu0 %v4839_v55  ;;  %v4909_v55 = vld [vmem:[%s6283_s1 + $0xbd4] ss:$12 sps:$4 sm:$0xff]   ;;  %v4910_v46 = vld [vmem:[%s6283_s1 + $0xbd8] ss:$12 sps:$4 sm:$0xff]  }
 0x146   : > { %3514 = vmatmul.mubr.bf16.vlgmr.msra.gmra.mrb[24].mxu1 %v5841_v42  ;;  %v4850_v42 = vld [vmem:[%s6283_s1 + $0x9f8] ss:$12 sps:$4 sm:$0xff]  }
 0x147   : > { %3223 = vmatmul.mubr.bf16.vlgmr.msra.gmra.mrb[0].mxu0 %v6047_v36  ;;  %4322 = vmatpush3.bf16.msra.mxu1 %v4841_v22 }
 0x148   : > { %3234 = vmatpush1.bf16.msra.mxu0 %v4837_v49  ;;  %4323 = vmatprep.subr.bf16.mxu1 %v4845_v44 }
 0x149   : > { %3235 = vmatprep.subr.bf16.mxu0 %v4844_v21  ;;  %3554 = vmatprep.mubr.bf16.mxu1 %v5860_v37  ;;  %v4855_v37 = vld [vmem:[%s6283_s1 + $0xa10] ss:$12 sps:$4 sm:$0xff]  }
 0x14a   : > { %3265 = vmatprep.mubr.bf16.mxu0 %v6069_v50  ;;  %v4907_v21 = vld [vmem:[%s6283_s1 + $0xbd0] ss:$12 sps:$4 sm:$0xff]  }
 0x14b   : > { %4324 = vmatpush3.bf16.msra.mxu1 %v4846_v40  ;;  %v4914_v40 = vld [vmem:[%s6283_s1 + $0xbec] ss:$12 sps:$4 sm:$0xff]  }
 0x14c   : > { %3236 = vmatpush1.bf16.msra.mxu0 %v4842_v51  ;;  %4325 = vmatprep.subr.bf16.mxu1 %v4850_v42 }
 0x14d   : > { %3237 = vmatprep.subr.bf16.mxu0 %v4849_v53  ;;  %v4915_v53 = vld [vmem:[%s6283_s1 + $0xbf0] ss:$12 sps:$4 sm:$0xff]  }
 0x14f   : > { %4326 = vmatpush3.bf16.msra.mxu1 %v4851_v56  ;;  %v4916_v56 = vld [vmem:[%s6283_s1 + $0xb30] ss:$12 sps:$4 sm:$0xff]  }
 0x150   : > { %3238 = vmatpush1.bf16.msra.mxu0 %v4847_v54  ;;  %4327 = vmatprep.subr.bf16.mxu1 %v4855_v37  ;;  %v4912_v54 = vld [vmem:[%s6283_s1 + $0xbe8] ss:$12 sps:$4 sm:$0xff]   ;;  %v789_v37 = vlaneseq }
 0x151   : > { %3239 = vmatprep.subr.bf16.mxu0 %v4854_v57  ;;  %v3782_v57 = vcombine.low %v6050_v47, %v6053_v48 }
 0x153   : > { %4328 = vmatpush3.bf16.msra.mxu1 %v4856_v59 }
 0x154   : > { %3240 = vmatpush1.bf16.msra.mxu0 %v4852_v58  ;;  %4329 = vmatprep.subr.bf16.mxu1 %v4860_v61  ;;  %v790_v58 = vshrl.u32 %v789_v37, 7 }
 0x155   : > { %3241 = vmatprep.subr.bf16.mxu0 %v4859_v60  ;;  %v787_v60 = vld [vmem:[%s6284_s2] sm:$0x7] }
 0x156   : > { %v799_v59 = vsub.s32 2, %v790_v58 }
 0x157   : > { %4330 = vmatpush3.bf16.msra.mxu1 %v4861_v63 }
 0x158   : > { %3242 = vmatpush1.bf16.msra.mxu0 %v4857_v62  ;;  %4331 = vmatprep.subr.bf16.mxu1 %v4865_v1  ;;  %v800_v61 = vrot.slane %v787_v60, %v799_v59 }
 0x159   : > { %3243 = vmatprep.subr.bf16.mxu0 %v4864_v0  ;;  %v6135_v5 = vpop.f32.mrb[0].mxu1 }
 0x15a   : > { %v6137_v41 = vpop.f32.mrb[1].mxu1 }
 0x15b   : > { %v6139_v6 = vpop.f32.mrb[2].mxu1  ;;  %4332 = vmatpush3.bf16.msra.mxu1 %v4866_v3 }
 0x15c   : > { %3244 = vmatpush1.bf16.msra.mxu0 %v4862_v2  ;;  %v6147_v11 = vpop.f32.mrb[3].mxu1  ;;  %4333 = vmatprep.subr.bf16.mxu1 %v4870_v4 }
 0x15d   : > { %3245 = vmatprep.subr.bf16.mxu0 %v4869_v8 }
 0x15f   : > { %4334 = vmatpush3.bf16.msra.mxu1 %v4871_v9 }
 0x160   : > { %3246 = vmatpush1.bf16.msra.mxu0 %v4867_v7  ;;  %4335 = vmatprep.subr.bf16.mxu1 %v4875_v12 }
 0x161   : > { %3247 = vmatprep.subr.bf16.mxu0 %v4874_v10 }
 0x163   : > { %4336 = vmatpush3.bf16.msra.mxu1 %v4876_v43 }
 0x164   : > { %3248 = vmatpush1.bf16.msra.mxu0 %v4872_v13  ;;  %4343 = vmatprep.subr.bf16.mxu1 %v4880_v31 }
 0x165   : > { %3249 = vmatprep.subr.bf16.mxu0 %v4879_v14 }
 0x166   : > { %3555 = vmatmul.mubr.bf16.vlgmr.msra.gmra.mrb[28].mxu1 %v6047_v36 }
 0x167   : > { %4344 = vmatpush3.bf16.msra.mxu1 %v4881_v16  ;;  %3595 = vmatprep.mubr.bf16.mxu1 %v6069_v50  ;;  %v4911_v50 = vld [vmem:[%s6283_s1 + $0xb18] ss:$12 sps:$4 sm:$0xff]  }
 0x168   : > { %3250 = vmatpush1.bf16.msra.mxu0 %v4877_v15  ;;  %4345 = vmatprep.subr.bf16.mxu1 %v4885_v18 }
 0x169   : > { %3251 = vmatprep.subr.bf16.mxu0 %v4884_v17 }
 0x16b   : > { %4346 = vmatpush3.bf16.msra.mxu1 %v4886_v19 }
 0x16c   : > { %3252 = vmatpush1.bf16.msra.mxu0 %v4882_v39  ;;  %4347 = vmatprep.subr.bf16.mxu1 %v4890_v23 }
 0x16d   : > { %3253 = vmatprep.subr.bf16.mxu0 %v4889_v20 }
 0x16f   : > { %4348 = vmatpush3.bf16.msra.mxu1 %v4891_v25 }
 0x170   : > { %3254 = vmatpush1.bf16.msra.mxu0 %v4887_v24  ;;  %4349 = vmatprep.subr.bf16.mxu1 %v4895_v27 }
 0x171   : > { %3255 = vmatprep.subr.bf16.mxu0 %v4894_v26 }
 0x173   : > { %4350 = vmatpush3.bf16.msra.mxu1 %v4896_v29 }
 0x174   : > { %3256 = vmatpush1.bf16.msra.mxu0 %v4892_v28  ;;  %4351 = vmatprep.subr.bf16.mxu1 %v4900_v32 }
 0x175   : > { %3257 = vmatprep.subr.bf16.mxu0 %v4899_v30 }
 0x177   : > { %4352 = vmatpush3.bf16.msra.mxu1 %v4901_v33 }
 0x178   : > { %3258 = vmatpush1.bf16.msra.mxu0 %v4897_v52  ;;  %4353 = vmatprep.subr.bf16.mxu1 %v4905_v35 }
 0x179   : > { %3259 = vmatprep.subr.bf16.mxu0 %v4904_v34  ;;  %v4205_v36 = vpop.f32.mrb[4].mxu1 }
 0x17a   : > { %v4206_v49 = vpop.f32.mrb[5].mxu1 }
 0x17b   : > { %4354 = vmatpush3.bf16.msra.mxu1 %v4906_v45  ;;  %v4207_v22 = vadd.f32 %v4206_v49, %v4205_v36  ;;  %v4208_v44 = vpop.f32.mrb[6].mxu1 }
 0x17c   : > { %3260 = vmatpush1.bf16.msra.mxu0 %v4902_v38  ;;  %4355 = vmatprep.subr.bf16.mxu1 %v4910_v46  ;;  %v4209_v51 = vpop.f32.mrb[7].mxu1 }
 0x17d   : > { %3261 = vmatprep.subr.bf16.mxu0 %v4909_v55  ;;  %v4210_v42 = vadd.f32 %v4209_v51, %v4208_v44  ;;  %v3311_v0 = vadd.f32 %v4207_v22, %v800_v61 }
 0x17f   : > { %4356 = vmatpush3.bf16.msra.mxu1 %v4911_v50  ;;  %v3314_v8 = vadd.f32 %v4210_v42, %v800_v61  ;;  %v795_v42 = vsub.s32 1, %v790_v58 }
 0x180   : > { %3262 = vmatpush1.bf16.msra.mxu0 %v4907_v21  ;;  %4357 = vmatprep.subr.bf16.mxu1 %v4915_v53  ;;  %v791_v53 = vsub.s32 0, %v790_v58 }
 0x181   : > { %3263 = vmatprep.subr.bf16.mxu0 %v4914_v40 }
 0x183   : > { %4358 = vmatpush3.bf16.msra.mxu1 %v4916_v56  ;;  %v796_v56 = vrot.slane %v787_v60, %v795_v42 }
 0x184   : > { %3264 = vmatpush1.bf16.msra.mxu0 %v4912_v54  ;;  %v792_v54 = vrot.slane %v787_v60, %v791_v53 }
 0x185   : > { %v4367_v37 = vadd.f32 %v6137_v41, %v796_v56 }
 0x186   : > { %3596 = vmatmul.mubr.bf16.vlgmr.msra.gmra.mrb[32].mxu1 %v3782_v57 }
 0x187   : > { %3266 = vmatmul.mubr.bf16.vlgmr.msra.gmra.mrb[0].mxu0 %v3782_v57  ;;  %v4365_v57 = vadd.f32 %v6135_v5, %v792_v54 }
 0x199   : > { %v4227_v62 = vpop.f32.mrb[8].mxu1 }
 0x19a   : > { %v4228_v63 = vpop.f32.mrb[9].mxu1 }
 0x19b   : > { %v4229_v1 = vadd.f32 %v4228_v63, %v4227_v62  ;;  %v4230_v2 = vpop.f32.mrb[10].mxu1  ;;  %v4369_v62 = vadd.f32 %v6139_v6, %v792_v54 }
 0x19c   : > { %v4231_v3 = vpop.f32.mrb[11].mxu1 }
 0x19d   : > { %v3352_v47 = vadd.f32 %v4229_v1, %v3311_v0  ;;  %v4232_v48 = vadd.f32 %v4231_v3, %v4230_v2  ;;  %v4371_v2 = vadd.f32 %v6147_v11, %v796_v56 }
 0x19f   : > { %v3355_v4 = vadd.f32 %v4232_v48, %v3314_v8 }
 0x1b9   : > { %v4249_v7 = vpop.f32.mrb[12].mxu1 }
 0x1ba   : > { %v4250_v9 = vpop.f32.mrb[13].mxu1 }
 0x1bb   : > { %v4251_v10 = vadd.f32 %v4250_v9, %v4249_v7  ;;  %v4252_v12 = vpop.f32.mrb[14].mxu1 }
 0x1bc   : > { %v4253_v13 = vpop.f32.mrb[15].mxu1 }
 0x1bd   : > { %v3393_v43 = vadd.f32 %v4251_v10, %v3352_v47  ;;  %v4254_v14 = vadd.f32 %v4253_v13, %v4252_v12 }
 0x1bf   : > { %v3396_v31 = vadd.f32 %v4254_v14, %v3355_v4 }
 0x1d9   : > { %v4271_v15 = vpop.f32.mrb[16].mxu1 }
 0x1da   : > { %v4272_v16 = vpop.f32.mrb[17].mxu1 }
 0x1db   : > { %v4273_v17 = vadd.f32 %v4272_v16, %v4271_v15  ;;  %v4274_v18 = vpop.f32.mrb[18].mxu1 }
 0x1dc   : > { %v4275_v39 = vpop.f32.mrb[19].mxu1 }
 0x1dd   : > { %v3434_v19 = vadd.f32 %v4273_v17, %v3393_v43  ;;  %v4276_v20 = vadd.f32 %v4275_v39, %v4274_v18 }
 0x1df   : > { %v3437_v23 = vadd.f32 %v4276_v20, %v3396_v31 }
 0x1f9   : > { %v4293_v24 = vpop.f32.mrb[20].mxu1 }
 0x1fa   : > { %v4294_v25 = vpop.f32.mrb[21].mxu1 }
 0x1fb   : > { %v4295_v26 = vadd.f32 %v4294_v25, %v4293_v24  ;;  %v4296_v27 = vpop.f32.mrb[22].mxu1 }
 0x1fc   : > { %v4297_v28 = vpop.f32.mrb[23].mxu1 }
 0x1fd   : > { %v3475_v29 = vadd.f32 %v4295_v26, %v3434_v19  ;;  %v4298_v30 = vadd.f32 %v4297_v28, %v4296_v27 }
 0x1ff   : > { %v3478_v32 = vadd.f32 %v4298_v30, %v3437_v23 }
 0x219   : > { %v4315_v52 = vpop.f32.mrb[24].mxu1 }
 0x21a   : > { %v4316_v33 = vpop.f32.mrb[25].mxu1 }
 0x21b   : > { %v4317_v34 = vadd.f32 %v4316_v33, %v4315_v52  ;;  %v4318_v35 = vpop.f32.mrb[26].mxu1 }
 0x21c   : > { %v4319_v38 = vpop.f32.mrb[27].mxu1 }
 0x21d   : > { %v3516_v45 = vadd.f32 %v4317_v34, %v3475_v29  ;;  %v4320_v55 = vadd.f32 %v4319_v38, %v4318_v35 }
 0x21f   : > { %v3519_v46 = vadd.f32 %v4320_v55, %v3478_v32 }
 0x239   : > { %v4337_v36 = vpop.f32.mrb[28].mxu1 }
 0x23a   : > { %v4338_v49 = vpop.f32.mrb[29].mxu1 }
 0x23b   : > { %v4339_v22 = vadd.f32 %v4338_v49, %v4337_v36  ;;  %v4340_v21 = vpop.f32.mrb[30].mxu1 }
 0x23c   : > { %v4341_v44 = vpop.f32.mrb[31].mxu1 }
 0x23d   : > { %v3557_v50 = vadd.f32 %v4339_v22, %v3516_v45  ;;  %v4342_v51 = vadd.f32 %v4341_v44, %v4340_v21 }
 0x23f   : > { %v3560_v40 = vadd.f32 %v4342_v51, %v3519_v46 }
 0x259   : > { %v4359_v61 = vpop.f32.mrb[32].mxu1 }
 0x25a   : > { %v3267_v59 = vpop.f32.mrb[0].mxu0  ;;  %v4360_v1 = vpop.f32.mrb[33].mxu1 }
 0x25b   : > { %v4366_v63 = vadd.f32 %v4365_v57, %v3267_v59  ;;  %v3269_v0 = vpop.f32.mrb[1].mxu0  ;;  %v4361_v8 = vadd.f32 %v4360_v1, %v4359_v61  ;;  %v4362_v58 = vpop.f32.mrb[34].mxu1 }
 0x25c   : > { %v4368_v3 = vadd.f32 %v4367_v37, %v3269_v0  ;;  %v3271_v47 = vpop.f32.mrb[2].mxu0  ;;  %v4363_v5 = vpop.f32.mrb[35].mxu1 }
 0x25d   : > { %v4370_v60 = vadd.f32 %v4369_v62, %v3271_v47  ;;  %v3273_v48 = vpop.f32.mrb[3].mxu0  ;;  %v3598_v41 = vadd.f32 %v4361_v8, %v3557_v50  ;;  %v4364_v4 = vadd.f32 %v4363_v5, %v4362_v58 }
 0x25e   : > { %4917 = vtanh.f32 %v4368_v3  ;;  %v4372_v6 = vadd.f32 %v4371_v2, %v3273_v48 }
 0x25f   : > { %v4182_v7 = vpack.c.bf16 %v4370_v60, %v4366_v63  ;;  %v3601_v9 = vadd.f32 %v4364_v4, %v3560_v40  ;;  %v3618_v11 = vmax.f32 %v3598_v41, 0.0 }
 0x260   : > { %4919 = vtanh.f32 %v4372_v6 }
 0x261   : > { %4183 = vst [vmem:[%s244_s15] sm:$0xff] %v4182_v7   ;;  %v3619_v10 = vmax.f32 %v3601_v9, 0.0 }
 0x263   : > { %v4187_v12 = vpack.c.bf16 %v3619_v10, %v3618_v11 }
 0x265   : > { %4188 = vst [vmem:[%s256_s21] sm:$0xff] %v4187_v12  }
 0x268   : > { %v4918_v13 = vpop.eup %4917 }
 0x269   : > { %3616 = vst [vmem:[%s250_s24] sm:$0xff] %v4918_v13 }
 0x26a   : > { %v4920_v43 = vpop.eup %4919 }
 0x26b   : > { %3617 = vst [vmem:[%s250_s24 + $0x8] sm:$0xff] %v4920_v43 }
 0x26c PF: > { %s16_s18 = sadd.s32 1, %s4927_s18  }
 0x26d   : > { %p13_p4 = scmp.ge.s32.totalorder %s16_s18, 4  }
 0x26f   :  { %15 = sbr.rel (!%p13_p4) target bundleno = 1 (0x1), region = 86 }

// kernel: _raft_forward.16
= control target key start
LH: loop header
LB: loop body
LE: loop exit
PB: predicated region body
PF: predicated region fallthrough
CT: control target
= control target key end

     0   :  { %s2206_s12 = smov 0   ;;  %s2634_s0 = inlined_call_operand.vmem [shape: bf16[32,2048], index: 0, kind: input, shape index: {}]   ;;  %s2635_s1 = inlined_call_operand.vmem [shape: bf16[2048,128], index: 1, kind: input, shape index: {}]   ;;  %s2636_s2 = inlined_call_operand.vmem [shape: f32[1,128], index: 2, kind: input, shape index: {}]   ;;  %s2637_s3 = inlined_call_operand.vmem [shape: bf16[32,128], index: 3, kind: output, shape index: {}]  }
   0x1 LB: > { %s1699_s13 = sadd.s32 4294967295, %s2184_s12   ;;  %p1703_p0 = scmp.ge.s32.totalorder %s2184_s12, 1  ;;  %s2184_s12 = sphi %s2206_s12, %s13_s12  }
   0x2   : > { %p139_p1 = scmp.lt.s32.totalorder %s2184_s12, 3 }
   0x4   : > { %p140_p2 = pnand %p1703_p0, %p139_p1 }
   0x5   : > { %v2050_v0 = vld [vmem:[%s2635_s1 + $0x40] sm:$0xff] (!%p140_p2)   ;;  %v2054_v4 = vld [vmem:[%s2635_s1 + $0x48] sm:$0xff] (!%p140_p2)   ;;  %v2058_v8 = vld [vmem:[%s2635_s1 + $0x50] sm:$0xff] (!%p140_p2)   ;;  %s1704_s21 = sshll.u32 (!%p140_p2), %s1699_s13, 1 }
   0x6   : > { %143 = sbr.rel (%p140_p2) target bundleno = 359 (0x167), region = 32  ;;  %v2051_v1 = vld [vmem:[%s2635_s1 + $0xc0] sm:$0xff] (!%p140_p2)   ;;  %1866 = vmatprep.subr.bf16.mxu0 (!%p140_p2), %v2050_v0  ;;  %v2055_v5 = vld [vmem:[%s2635_s1 + $0xc8] sm:$0xff] (!%p140_p2)   ;;  %v2059_v9 = vld [vmem:[%s2635_s1 + $0xd0] sm:$0xff] (!%p140_p2)   ;;  %p165_p3 = scmp.lt.s32.totalorder (!%p140_p2), %s1704_s21, 3 }
   0x7   : > { %v2052_v2 = vld [vmem:[%s2635_s1] sm:$0xff] (!%p140_p2)   ;;  %1888 = vmatprep.subr.bf16.mxu1 (!%p140_p2), %v2051_v1  ;;  %v2056_v6 = vld [vmem:[%s2635_s1 + $0x8] sm:$0xff] (!%p140_p2)   ;;  %v2060_v10 = vld [vmem:[%s2635_s1 + $0x10] sm:$0xff] (!%p140_p2)  }
   0x8   : > { %v2053_v3 = vld [vmem:[%s2635_s1 + $0x80] sm:$0xff] (!%p140_p2)   ;;  %1867 = vmatpush3.bf16.msra.mxu0 (!%p140_p2), %v2052_v2  ;;  %v2057_v7 = vld [vmem:[%s2635_s1 + $0x88] sm:$0xff] (!%p140_p2)   ;;  %v2061_v11 = vld [vmem:[%s2635_s1 + $0x90] sm:$0xff] (!%p140_p2)  }
   0x9   : > { %1889 = vmatpush3.bf16.msra.mxu1 (!%p140_p2), %v2053_v3  ;;  %1868 = vmatprep.subr.bf16.mxu0 (!%p140_p2), %v2054_v4  ;;  %v2062_v12 = vld [vmem:[%s2635_s1 + $0x58] sm:$0xff] (!%p140_p2)   ;;  %v2066_v16 = vld [vmem:[%s2635_s1 + $0x60] sm:$0xff] (!%p140_p2)   ;;  %v2070_v20 = vld [vmem:[%s2635_s1 + $0x68] sm:$0xff] (!%p140_p2)  }
   0xa   : > { %1890 = vmatprep.subr.bf16.mxu1 (!%p140_p2), %v2055_v5  ;;  %v2063_v13 = vld [vmem:[%s2635_s1 + $0xd8] sm:$0xff] (!%p140_p2)   ;;  %v2067_v17 = vld [vmem:[%s2635_s1 + $0xe0] sm:$0xff] (!%p140_p2)   ;;  %v2071_v21 = vld [vmem:[%s2635_s1 + $0xe8] sm:$0xff] (!%p140_p2)  }
   0xb   : > { %v2064_v14 = vld [vmem:[%s2635_s1 + $0x18] sm:$0xff] (!%p140_p2)   ;;  %v2068_v18 = vld [vmem:[%s2635_s1 + $0x20] sm:$0xff] (!%p140_p2)   ;;  %v2072_v22 = vld [vmem:[%s2635_s1 + $0x28] sm:$0xff] (!%p140_p2)  }
   0xc   : > { %1869 = vmatpush3.bf16.msra.mxu0 (!%p140_p2), %v2056_v6  ;;  %v2065_v15 = vld [vmem:[%s2635_s1 + $0x98] sm:$0xff] (!%p140_p2)   ;;  %v2069_v19 = vld [vmem:[%s2635_s1 + $0xa0] sm:$0xff] (!%p140_p2)   ;;  %v2073_v23 = vld [vmem:[%s2635_s1 + $0xa8] sm:$0xff] (!%p140_p2)  }
   0xd   : > { %1891 = vmatpush3.bf16.msra.mxu1 %v2057_v7  ;;  %1870 = vmatprep.subr.bf16.mxu0 %v2058_v8  ;;  %s2639_s21 = smov (!%p165_p3, %s1704_s21), 3  ;;  %v2074_v24 = vld [vmem:[%s2635_s1 + $0x70] sm:$0xff]   ;;  %v2078_v28 = vld [vmem:[%s2635_s1 + $0x78] sm:$0xff]   ;;  %v2082_v40 = vld [vmem:[%s2635_s1 + $0x140] sm:$0xff]  }
   0xe   : > { %1892 = vmatprep.subr.bf16.mxu1 %v2059_v9  ;;  %v2075_v25 = vld [vmem:[%s2635_s1 + $0xf0] sm:$0xff]   ;;  %s1858_s18 = sshll.u32 %s2639_s21, 6  ;;  %v2079_v29 = vld [vmem:[%s2635_s1 + $0xf8] sm:$0xff]   ;;  %v2083_v41 = vld [vmem:[%s2635_s1 + $0x1c0] sm:$0xff]  }
   0xf   : > { %v2076_v26 = vld [vmem:[%s2635_s1 + $0x30] sm:$0xff]   ;;  %s2312_s28 = scalar_lea.vmem %s2634_s0, %s1858_s18  ;;  %v2080_v30 = vld [vmem:[%s2635_s1 + $0x38] sm:$0xff]   ;;  %v2084_v42 = vld [vmem:[%s2635_s1 + $0x100] sm:$0xff]  }
  0x10   : > { %1871 = vmatpush3.bf16.msra.mxu0 %v2060_v10  ;;  %v2077_v27 = vld [vmem:[%s2635_s1 + $0xb0] sm:$0xff]   ;;  %v2081_v31 = vld [vmem:[%s2635_s1 + $0xb8] sm:$0xff]   ;;  %v178_v32 = vld [vmem:[%s2312_s28] sm:$0xff] }
  0x11   : > { %1893 = vmatpush3.bf16.msra.mxu1 %v2061_v11  ;;  %1872 = vmatprep.subr.bf16.mxu0 %v2062_v12  ;;  %v186_v33 = vld [vmem:[%s2312_s28 + $0x40] sm:$0xff]  ;;  %v179_v34 = vld [vmem:[%s2312_s28 + $0x8] sm:$0xff]  ;;  %v2090_v48 = vld [vmem:[%s2635_s1 + $0x150] sm:$0xff]  }
  0x12   : > { %1894 = vmatprep.subr.bf16.mxu1 %v2063_v13  ;;  %v1710_v35 = vcombine.low %v178_v32, %v186_v33  ;;  %v1711_v36 = vcombine.high %v178_v32, %v186_v33  ;;  %v187_v37 = vld [vmem:[%s2312_s28 + $0x48] sm:$0xff]  ;;  %v2085_v43 = vld [vmem:[%s2635_s1 + $0x180] sm:$0xff]   ;;  %v2091_v49 = vld [vmem:[%s2635_s1 + $0x1d0] sm:$0xff]  }
  0x13   : > { %v1712_v38 = vcombine.low %v179_v34, %v187_v37  ;;  %v1713_v39 = vcombine.high %v179_v34, %v187_v37  ;;  %v2086_v44 = vld [vmem:[%s2635_s1 + $0x148] sm:$0xff]   ;;  %v2092_v50 = vld [vmem:[%s2635_s1 + $0x110] sm:$0xff]   ;;  %v2094_v52 = vld [vmem:[%s2635_s1 + $0x158] sm:$0xff]  }
  0x14   : > { %1873 = vmatpush3.bf16.msra.mxu0 %v2064_v14  ;;  %1337 = vmatprep.mubr.bf16.mxu0 %v1711_v36  ;;  %v2087_v45 = vld [vmem:[%s2635_s1 + $0x1c8] sm:$0xff]   ;;  %v2093_v51 = vld [vmem:[%s2635_s1 + $0x190] sm:$0xff]   ;;  %v2095_v53 = vld [vmem:[%s2635_s1 + $0x1d8] sm:$0xff]  }
  0x15   : > { %1895 = vmatpush3.bf16.msra.mxu1 %v2065_v15  ;;  %1874 = vmatprep.subr.bf16.mxu0 %v2066_v16  ;;  %v2088_v46 = vld [vmem:[%s2635_s1 + $0x108] sm:$0xff]   ;;  %v2096_v54 = vld [vmem:[%s2635_s1 + $0x118] sm:$0xff]   ;;  %v2098_v56 = vld [vmem:[%s2635_s1 + $0x160] sm:$0xff]  }
  0x16   : > { %1896 = vmatprep.subr.bf16.mxu1 %v2067_v17  ;;  %1378 = vmatprep.mubr.bf16.mxu1 %v1713_v39  ;;  %v2089_v47 = vld [vmem:[%s2635_s1 + $0x188] sm:$0xff]   ;;  %v2097_v55 = vld [vmem:[%s2635_s1 + $0x198] sm:$0xff]   ;;  %v2099_v57 = vld [vmem:[%s2635_s1 + $0x1e0] sm:$0xff]  }
  0x17   : > { %v2100_v58 = vld [vmem:[%s2635_s1 + $0x120] sm:$0xff]   ;;  %v2102_v60 = vld [vmem:[%s2635_s1 + $0x168] sm:$0xff]   ;;  %v2106_v0 = vld [vmem:[%s2635_s1 + $0x170] sm:$0xff]  }
  0x18   : > { %1875 = vmatpush3.bf16.msra.mxu0 %v2068_v18  ;;  %v2101_v59 = vld [vmem:[%s2635_s1 + $0x1a0] sm:$0xff]   ;;  %v2103_v61 = vld [vmem:[%s2635_s1 + $0x1e8] sm:$0xff]   ;;  %v2107_v1 = vld [vmem:[%s2635_s1 + $0x1f0] sm:$0xff]  }
  0x19   : > { %1897 = vmatpush3.bf16.msra.mxu1 %v2069_v19  ;;  %1876 = vmatprep.subr.bf16.mxu0 %v2070_v20  ;;  %v2104_v62 = vld [vmem:[%s2635_s1 + $0x128] sm:$0xff]   ;;  %v2108_v2 = vld [vmem:[%s2635_s1 + $0x130] sm:$0xff]   ;;  %v2110_v4 = vld [vmem:[%s2635_s1 + $0x178] sm:$0xff]  }
  0x1a   : > { %1898 = vmatprep.subr.bf16.mxu1 %v2071_v21  ;;  %v2105_v63 = vld [vmem:[%s2635_s1 + $0x1a8] sm:$0xff]   ;;  %v2109_v3 = vld [vmem:[%s2635_s1 + $0x1b0] sm:$0xff]   ;;  %v2111_v5 = vld [vmem:[%s2635_s1 + $0x1f8] sm:$0xff]  }
  0x1b   : > { %v2112_v6 = vld [vmem:[%s2635_s1 + $0x138] sm:$0xff]   ;;  %v180_v8 = vld [vmem:[%s2312_s28 + $0x10] sm:$0xff]  ;;  %v2114_v16 = vld [vmem:[%s2635_s1 + $0x240] sm:$0xff]  }
  0x1c   : > { %1877 = vmatpush3.bf16.msra.mxu0 %v2072_v22  ;;  %v2113_v7 = vld [vmem:[%s2635_s1 + $0x1b8] sm:$0xff]   ;;  %v188_v9 = vld [vmem:[%s2312_s28 + $0x50] sm:$0xff]  ;;  %v2115_v17 = vld [vmem:[%s2635_s1 + $0x2c0] sm:$0xff]  }
  0x1d   : > { %1899 = vmatpush3.bf16.msra.mxu1 %v2073_v23  ;;  %1878 = vmatprep.subr.bf16.mxu0 %v2074_v24  ;;  %v1714_v10 = vcombine.low %v180_v8, %v188_v9  ;;  %v1715_v11 = vcombine.high %v180_v8, %v188_v9  ;;  %v181_v12 = vld [vmem:[%s2312_s28 + $0x18] sm:$0xff]  ;;  %v2116_v18 = vld [vmem:[%s2635_s1 + $0x200] sm:$0xff]   ;;  %v2118_v20 = vld [vmem:[%s2635_s1 + $0x248] sm:$0xff]  }
  0x1e   : > { %1900 = vmatprep.subr.bf16.mxu1 %v2075_v25  ;;  %v189_v13 = vld [vmem:[%s2312_s28 + $0x58] sm:$0xff]  ;;  %v2117_v19 = vld [vmem:[%s2635_s1 + $0x280] sm:$0xff]   ;;  %v2119_v21 = vld [vmem:[%s2635_s1 + $0x2c8] sm:$0xff]  }
  0x1f   : > { %v1716_v14 = vcombine.low %v181_v12, %v189_v13  ;;  %v1717_v15 = vcombine.high %v181_v12, %v189_v13  ;;  %v2120_v22 = vld [vmem:[%s2635_s1 + $0x208] sm:$0xff]   ;;  %v2122_v24 = vld [vmem:[%s2635_s1 + $0x250] sm:$0xff]   ;;  %v2130_v32 = vld [vmem:[%s2635_s1 + $0x260] sm:$0xff]  }
  0x20   : > { %1879 = vmatpush3.bf16.msra.mxu0 %v2076_v26  ;;  %v2121_v23 = vld [vmem:[%s2635_s1 + $0x288] sm:$0xff]   ;;  %v2123_v25 = vld [vmem:[%s2635_s1 + $0x2d0] sm:$0xff]   ;;  %v2131_v33 = vld [vmem:[%s2635_s1 + $0x2e0] sm:$0xff]  }
  0x21   : > { %1901 = vmatpush3.bf16.msra.mxu1 %v2077_v27  ;;  %1880 = vmatprep.subr.bf16.mxu0 %v2078_v28  ;;  %v2124_v26 = vld [vmem:[%s2635_s1 + $0x210] sm:$0xff]   ;;  %v2126_v28 = vld [vmem:[%s2635_s1 + $0x258] sm:$0xff]   ;;  %v2132_v34 = vld [vmem:[%s2635_s1 + $0x220] sm:$0xff]  }
  0x22   : > { %1902 = vmatprep.subr.bf16.mxu1 %v2079_v29  ;;  %v2125_v27 = vld [vmem:[%s2635_s1 + $0x290] sm:$0xff]   ;;  %v2127_v29 = vld [vmem:[%s2635_s1 + $0x2d8] sm:$0xff]   ;;  %v2134_v36 = vld [vmem:[%s2635_s1 + $0x268] sm:$0xff]  }
  0x23   : > { %v2135_v37 = vld [vmem:[%s2635_s1 + $0x2e8] sm:$0xff]   ;;  %v2162_v8 = vld [vmem:[%s2635_s1 + $0x360] sm:$0xff]  }
  0x24   : > { %1881 = vmatpush3.bf16.msra.mxu0 %v2080_v30  ;;  %v2128_v30 = vld [vmem:[%s2635_s1 + $0x218] sm:$0xff]   ;;  %v2137_v39 = vld [vmem:[%s2635_s1 + $0x2a8] sm:$0xff]   ;;  %v2163_v9 = vld [vmem:[%s2635_s1 + $0x3e0] sm:$0xff]  }
  0x25   : > { %1903 = vmatpush3.bf16.msra.mxu1 %v2081_v31  ;;  %1910 = vmatprep.subr.bf16.mxu0 %v2082_v40  ;;  %v2129_v31 = vld [vmem:[%s2635_s1 + $0x298] sm:$0xff]   ;;  %v2138_v40 = vld [vmem:[%s2635_s1 + $0x270] sm:$0xff]   ;;  %v2166_v12 = vld [vmem:[%s2635_s1 + $0x368] sm:$0xff]  }
  0x26   : > { %1932 = vmatprep.subr.bf16.mxu1 %v2083_v41  ;;  %v2139_v41 = vld [vmem:[%s2635_s1 + $0x2f0] sm:$0xff]   ;;  %v2167_v13 = vld [vmem:[%s2635_s1 + $0x3e8] sm:$0xff]  }
  0x27   : > { %1338 = vmatmul.mubr.bf16.vlgmr.msra.gmra.mrb[0].mxu0 %v1710_v35  ;;  %v2133_v35 = vld [vmem:[%s2635_s1 + $0x2a0] sm:$0xff]  }
  0x28   : > { %1379 = vmatmul.mubr.bf16.vlgmr.msra.gmra.mrb[0].mxu1 %v1712_v38  ;;  %1911 = vmatpush3.bf16.msra.mxu0 %v2084_v42  ;;  %v2136_v38 = vld [vmem:[%s2635_s1 + $0x228] sm:$0xff]   ;;  %v2140_v42 = vld [vmem:[%s2635_s1 + $0x230] sm:$0xff]  }
  0x29   : > { %1933 = vmatpush3.bf16.msra.mxu1 %v2085_v43  ;;  %1912 = vmatprep.subr.bf16.mxu0 %v2086_v44  ;;  %v2141_v43 = vld [vmem:[%s2635_s1 + $0x2b0] sm:$0xff]   ;;  %v2142_v44 = vld [vmem:[%s2635_s1 + $0x278] sm:$0xff]  }
  0x2a   : > { %1934 = vmatprep.subr.bf16.mxu1 %v2087_v45  ;;  %1419 = vmatprep.mubr.bf16.mxu0 %v1715_v11  ;;  %v2143_v45 = vld [vmem:[%s2635_s1 + $0x2f8] sm:$0xff]   ;;  %v2165_v11 = vld [vmem:[%s2635_s1 + $0x3a0] sm:$0xff]  }
  0x2b   : > { %1460 = vmatprep.mubr.bf16.mxu1 %v1717_v15  ;;  %v2169_v15 = vld [vmem:[%s2635_s1 + $0x3a8] sm:$0xff]  }
  0x2c   : > { %1913 = vmatpush3.bf16.msra.mxu0 %v2088_v46  ;;  %v2144_v46 = vld [vmem:[%s2635_s1 + $0x238] sm:$0xff]  }
  0x2d   : > { %1935 = vmatpush3.bf16.msra.mxu1 %v2089_v47  ;;  %1914 = vmatprep.subr.bf16.mxu0 %v2090_v48  ;;  %v2145_v47 = vld [vmem:[%s2635_s1 + $0x2b8] sm:$0xff]   ;;  %v182_v48 = vld [vmem:[%s2312_s28 + $0x20] sm:$0xff] }
  0x2e   : > { %1936 = vmatprep.subr.bf16.mxu1 %v2091_v49  ;;  %v190_v49 = vld [vmem:[%s2312_s28 + $0x60] sm:$0xff] }
  0x30   : > { %1915 = vmatpush3.bf16.msra.mxu0 %v2092_v50  ;;  %v183_v50 = vld [vmem:[%s2312_s28 + $0x28] sm:$0xff] }
  0x31   : > { %1937 = vmatpush3.bf16.msra.mxu1 %v2093_v51  ;;  %1916 = vmatprep.subr.bf16.mxu0 %v2094_v52  ;;  %v191_v51 = vld [vmem:[%s2312_s28 + $0x68] sm:$0xff]  ;;  %v1718_v52 = vcombine.low %v182_v48, %v190_v49 }
  0x32   : > { %1938 = vmatprep.subr.bf16.mxu1 %v2095_v53  ;;  %v1719_v53 = vcombine.high %v182_v48, %v190_v49 }
  0x34   : > { %1917 = vmatpush3.bf16.msra.mxu0 %v2096_v54  ;;  %v1720_v54 = vcombine.low %v183_v50, %v191_v51 }
  0x35   : > { %1939 = vmatpush3.bf16.msra.mxu1 %v2097_v55  ;;  %1918 = vmatprep.subr.bf16.mxu0 %v2098_v56  ;;  %v1721_v55 = vcombine.high %v183_v50, %v191_v51  ;;  %v2146_v56 = vld [vmem:[%s2635_s1 + $0x340] sm:$0xff]  }
  0x36   : > { %1940 = vmatprep.subr.bf16.mxu1 %v2099_v57  ;;  %v2147_v57 = vld [vmem:[%s2635_s1 + $0x3c0] sm:$0xff]  }
  0x38   : > { %1919 = vmatpush3.bf16.msra.mxu0 %v2100_v58  ;;  %v2148_v58 = vld [vmem:[%s2635_s1 + $0x300] sm:$0xff]  }
  0x39   : > { %1941 = vmatpush3.bf16.msra.mxu1 %v2101_v59  ;;  %1920 = vmatprep.subr.bf16.mxu0 %v2102_v60  ;;  %v2149_v59 = vld [vmem:[%s2635_s1 + $0x380] sm:$0xff]   ;;  %v2150_v60 = vld [vmem:[%s2635_s1 + $0x348] sm:$0xff]  }
  0x3a   : > { %1942 = vmatprep.subr.bf16.mxu1 %v2103_v61  ;;  %v2151_v61 = vld [vmem:[%s2635_s1 + $0x3c8] sm:$0xff]  }
  0x3c   : > { %1921 = vmatpush3.bf16.msra.mxu0 %v2104_v62  ;;  %v2152_v62 = vld [vmem:[%s2635_s1 + $0x308] sm:$0xff]  }
  0x3d   : > { %1943 = vmatpush3.bf16.msra.mxu1 %v2105_v63  ;;  %1922 = vmatprep.subr.bf16.mxu0 %v2106_v0  ;;  %v2153_v63 = vld [vmem:[%s2635_s1 + $0x388] sm:$0xff]   ;;  %v2154_v0 = vld [vmem:[%s2635_s1 + $0x350] sm:$0xff]  }
  0x3e   : > { %1944 = vmatprep.subr.bf16.mxu1 %v2107_v1  ;;  %v2155_v1 = vld [vmem:[%s2635_s1 + $0x3d0] sm:$0xff]  }
  0x40   : > { %1923 = vmatpush3.bf16.msra.mxu0 %v2108_v2  ;;  %v2156_v2 = vld [vmem:[%s2635_s1 + $0x310] sm:$0xff]  }
  0x41   : > { %1945 = vmatpush3.bf16.msra.mxu1 %v2109_v3  ;;  %1924 = vmatprep.subr.bf16.mxu0 %v2110_v4  ;;  %v2157_v3 = vld [vmem:[%s2635_s1 + $0x390] sm:$0xff]   ;;  %v2158_v4 = vld [vmem:[%s2635_s1 + $0x358] sm:$0xff]  }
  0x42   : > { %1946 = vmatprep.subr.bf16.mxu1 %v2111_v5  ;;  %v2159_v5 = vld [vmem:[%s2635_s1 + $0x3d8] sm:$0xff]  }
  0x44   : > { %1925 = vmatpush3.bf16.msra.mxu0 %v2112_v6  ;;  %v2160_v6 = vld [vmem:[%s2635_s1 + $0x318] sm:$0xff]  }
  0x45   : > { %1947 = vmatpush3.bf16.msra.mxu1 %v2113_v7  ;;  %1954 = vmatprep.subr.bf16.mxu0 %v2114_v16  ;;  %v2161_v7 = vld [vmem:[%s2635_s1 + $0x398] sm:$0xff]   ;;  %v2170_v16 = vld [vmem:[%s2635_s1 + $0x370] sm:$0xff]  }
  0x46   : > { %1976 = vmatprep.subr.bf16.mxu1 %v2115_v17  ;;  %v2171_v17 = vld [vmem:[%s2635_s1 + $0x3f0] sm:$0xff]  }
  0x47   : > { %1420 = vmatmul.mubr.bf16.vlgmr.msra.gmra.mrb[4].mxu0 %v1714_v10  ;;  %v2164_v10 = vld [vmem:[%s2635_s1 + $0x320] sm:$0xff]  }
  0x48   : > { %1461 = vmatmul.mubr.bf16.vlgmr.msra.gmra.mrb[4].mxu1 %v1716_v14  ;;  %1955 = vmatpush3.bf16.msra.mxu0 %v2116_v18  ;;  %v2168_v14 = vld [vmem:[%s2635_s1 + $0x328] sm:$0xff]   ;;  %v2172_v18 = vld [vmem:[%s2635_s1 + $0x330] sm:$0xff]  }
  0x49   : > { %1977 = vmatpush3.bf16.msra.mxu1 %v2117_v19  ;;  %1956 = vmatprep.subr.bf16.mxu0 %v2118_v20  ;;  %v2173_v19 = vld [vmem:[%s2635_s1 + $0x3b0] sm:$0xff]   ;;  %v2174_v20 = vld [vmem:[%s2635_s1 + $0x378] sm:$0xff]  }
  0x4a   : > { %1978 = vmatprep.subr.bf16.mxu1 %v2119_v21  ;;  %1501 = vmatprep.mubr.bf16.mxu0 %v1719_v53  ;;  %v2175_v21 = vld [vmem:[%s2635_s1 + $0x3f8] sm:$0xff]  }
  0x4b   : > { %1542 = vmatprep.mubr.bf16.mxu1 %v1721_v55 }
  0x4c   : > { %1957 = vmatpush3.bf16.msra.mxu0 %v2120_v22  ;;  %v2176_v22 = vld [vmem:[%s2635_s1 + $0x338] sm:$0xff]  }
  0x4d   : > { %1979 = vmatpush3.bf16.msra.mxu1 %v2121_v23  ;;  %1958 = vmatprep.subr.bf16.mxu0 %v2122_v24  ;;  %v2177_v23 = vld [vmem:[%s2635_s1 + $0x3b8] sm:$0xff]   ;;  %v184_v24 = vld [vmem:[%s2312_s28 + $0x30] sm:$0xff] }
  0x4e   : > { %1980 = vmatprep.subr.bf16.mxu1 %v2123_v25  ;;  %v192_v25 = vld [vmem:[%s2312_s28 + $0x70] sm:$0xff] }
  0x50   : > { %1959 = vmatpush3.bf16.msra.mxu0 %v2124_v26  ;;  %v185_v26 = vld [vmem:[%s2312_s28 + $0x38] sm:$0xff] }
  0x51   : > { %1981 = vmatpush3.bf16.msra.mxu1 %v2125_v27  ;;  %1960 = vmatprep.subr.bf16.mxu0 %v2126_v28  ;;  %v1722_v27 = vcombine.low %v184_v24, %v192_v25  ;;  %v1723_v28 = vcombine.high %v184_v24, %v192_v25 }
  0x52   : > { %1982 = vmatprep.subr.bf16.mxu1 %v2127_v29  ;;  %v193_v29 = vld [vmem:[%s2312_s28 + $0x78] sm:$0xff]  ;;  %s1708_s28 = sshll.u32 %s2639_s21, 2 }
  0x53   : > { %s175_s9 = scalar_lea.vmem %s2637_s3, %s1708_s28 }
  0x54   : > { %1961 = vmatpush3.bf16.msra.mxu0 %v2128_v30  ;;  %v1724_v30 = vcombine.low %v185_v26, %v193_v29 }
  0x55   : > { %1983 = vmatpush3.bf16.msra.mxu1 %v2129_v31  ;;  %1962 = vmatprep.subr.bf16.mxu0 %v2130_v32  ;;  %v1725_v31 = vcombine.high %v185_v26, %v193_v29 }
  0x56   : > { %1984 = vmatprep.subr.bf16.mxu1 %v2131_v33 }
  0x58   : > { %1963 = vmatpush3.bf16.msra.mxu0 %v2132_v34  ;;  %v1709_v34 = vld [vmem:[%s2636_s2] ss:$0 sm:$0xff] }
  0x59   : > { %1985 = vmatpush3.bf16.msra.mxu1 %v2133_v35  ;;  %1964 = vmatprep.subr.bf16.mxu0 %v2134_v36 }
  0x5a   : > { %1986 = vmatprep.subr.bf16.mxu1 %v2135_v37 }
  0x5c   : > { %1965 = vmatpush3.bf16.msra.mxu0 %v2136_v38 }
  0x5d   : > { %1987 = vmatpush3.bf16.msra.mxu1 %v2137_v39  ;;  %1966 = vmatprep.subr.bf16.mxu0 %v2138_v40 }
  0x5e   : > { %1988 = vmatprep.subr.bf16.mxu1 %v2139_v41 }
  0x60   : > { %1967 = vmatpush3.bf16.msra.mxu0 %v2140_v42 }
  0x61   : > { %1989 = vmatpush3.bf16.msra.mxu1 %v2141_v43  ;;  %1968 = vmatprep.subr.bf16.mxu0 %v2142_v44 }
  0x62   : > { %1990 = vmatprep.subr.bf16.mxu1 %v2143_v45 }
  0x64   : > { %1969 = vmatpush3.bf16.msra.mxu0 %v2144_v46 }
  0x65   : > { %1991 = vmatpush3.bf16.msra.mxu1 %v2145_v47  ;;  %1998 = vmatprep.subr.bf16.mxu0 %v2146_v56 }
  0x66   : > { %2020 = vmatprep.subr.bf16.mxu1 %v2147_v57 }
  0x67   : > { %1502 = vmatmul.mubr.bf16.vlgmr.msra.gmra.mrb[8].mxu0 %v1718_v52 }
  0x68   : > { %1543 = vmatmul.mubr.bf16.vlgmr.msra.gmra.mrb[8].mxu1 %v1720_v54  ;;  %1999 = vmatpush3.bf16.msra.mxu0 %v2148_v58 }
  0x69   : > { %2021 = vmatpush3.bf16.msra.mxu1 %v2149_v59  ;;  %2000 = vmatprep.subr.bf16.mxu0 %v2150_v60 }
  0x6a   : > { %2022 = vmatprep.subr.bf16.mxu1 %v2151_v61  ;;  %1583 = vmatprep.mubr.bf16.mxu0 %v1723_v28 }
  0x6b   : > { %1624 = vmatprep.mubr.bf16.mxu1 %v1725_v31 }
  0x6c   : > { %2001 = vmatpush3.bf16.msra.mxu0 %v2152_v62 }
  0x6d   : > { %2023 = vmatpush3.bf16.msra.mxu1 %v2153_v63  ;;  %2002 = vmatprep.subr.bf16.mxu0 %v2154_v0 }
  0x6e   : > { %2024 = vmatprep.subr.bf16.mxu1 %v2155_v1 }
  0x70   : > { %2003 = vmatpush3.bf16.msra.mxu0 %v2156_v2 }
  0x71   : > { %2025 = vmatpush3.bf16.msra.mxu1 %v2157_v3  ;;  %2004 = vmatprep.subr.bf16.mxu0 %v2158_v4 }
  0x72   : > { %2026 = vmatprep.subr.bf16.mxu1 %v2159_v5 }
  0x74   : > { %2005 = vmatpush3.bf16.msra.mxu0 %v2160_v6 }
  0x75   : > { %2027 = vmatpush3.bf16.msra.mxu1 %v2161_v7  ;;  %2006 = vmatprep.subr.bf16.mxu0 %v2162_v8 }
  0x76   : > { %2028 = vmatprep.subr.bf16.mxu1 %v2163_v9 }
  0x78   : > { %2007 = vmatpush3.bf16.msra.mxu0 %v2164_v10 }
  0x79   : > { %2029 = vmatpush3.bf16.msra.mxu1 %v2165_v11  ;;  %2008 = vmatprep.subr.bf16.mxu0 %v2166_v12 }
  0x7a   : > { %2030 = vmatprep.subr.bf16.mxu1 %v2167_v13 }
  0x7c   : > { %2009 = vmatpush3.bf16.msra.mxu0 %v2168_v14 }
  0x7d   : > { %2031 = vmatpush3.bf16.msra.mxu1 %v2169_v15  ;;  %2010 = vmatprep.subr.bf16.mxu0 %v2170_v16 }
  0x7e   : > { %2032 = vmatprep.subr.bf16.mxu1 %v2171_v17 }
  0x80   : > { %2011 = vmatpush3.bf16.msra.mxu0 %v2172_v18 }
  0x81   : > { %2033 = vmatpush3.bf16.msra.mxu1 %v2173_v19  ;;  %2012 = vmatprep.subr.bf16.mxu0 %v2174_v20 }
  0x82   : > { %2034 = vmatprep.subr.bf16.mxu1 %v2175_v21 }
  0x84   : > { %2013 = vmatpush3.bf16.msra.mxu0 %v2176_v22 }
  0x85   : > { %2035 = vmatpush3.bf16.msra.mxu1 %v2177_v23 }
  0x87   : > { %1584 = vmatmul.mubr.bf16.vlgmr.msra.gmra.mrb[12].mxu0 %v1722_v27 }
  0x88   : > { %1625 = vmatmul.mubr.bf16.vlgmr.msra.gmra.mrb[12].mxu1 %v1724_v30 }
  0xfa   : > { %v1882_v32 = vpop.f32.mrb[0].mxu0 }
  0xfb   : > { %v1904_v33 = vpop.f32.mrb[0].mxu1  ;;  %v1883_v35 = vpop.f32.mrb[1].mxu0 }
  0xfc   : > { %v1884_v36 = vadd.f32 %v1883_v35, %v1882_v32  ;;  %v1905_v37 = vpop.f32.mrb[1].mxu1  ;;  %v1885_v38 = vpop.f32.mrb[2].mxu0 }
  0xfd   : > { %v1906_v39 = vadd.f32 %v1905_v37, %v1904_v33  ;;  %v1907_v40 = vpop.f32.mrb[2].mxu1  ;;  %v1886_v41 = vpop.f32.mrb[3].mxu0 }
  0xfe   : > { %v1340_v42 = vadd.f32 %v1884_v36, %v1709_v34  ;;  %v1887_v43 = vadd.f32 %v1886_v41, %v1885_v38  ;;  %v1908_v44 = vpop.f32.mrb[3].mxu1 }
  0xff   : > { %v1909_v45 = vadd.f32 %v1908_v44, %v1907_v40 }
 0x100   : > { %v1381_v46 = vadd.f32 %v1906_v39, %v1340_v42  ;;  %v1343_v47 = vadd.f32 %v1887_v43, %v1709_v34 }
 0x102   : > { %v1384_v48 = vadd.f32 %v1909_v45, %v1343_v47 }
 0x11a   : > { %v1926_v49 = vpop.f32.mrb[4].mxu0 }
 0x11b   : > { %v1948_v50 = vpop.f32.mrb[4].mxu1  ;;  %v1927_v51 = vpop.f32.mrb[5].mxu0 }
 0x11c   : > { %v1928_v52 = vadd.f32 %v1927_v51, %v1926_v49  ;;  %v1949_v53 = vpop.f32.mrb[5].mxu1  ;;  %v1929_v54 = vpop.f32.mrb[6].mxu0 }
 0x11d   : > { %v1950_v55 = vadd.f32 %v1949_v53, %v1948_v50  ;;  %v1951_v56 = vpop.f32.mrb[6].mxu1  ;;  %v1930_v57 = vpop.f32.mrb[7].mxu0 }
 0x11e   : > { %v1422_v58 = vadd.f32 %v1928_v52, %v1381_v46  ;;  %v1931_v59 = vadd.f32 %v1930_v57, %v1929_v54  ;;  %v1952_v60 = vpop.f32.mrb[7].mxu1 }
 0x11f   : > { %v1953_v61 = vadd.f32 %v1952_v60, %v1951_v56 }
 0x120   : > { %v1463_v62 = vadd.f32 %v1950_v55, %v1422_v58  ;;  %v1425_v63 = vadd.f32 %v1931_v59, %v1384_v48 }
 0x122   : > { %v1466_v0 = vadd.f32 %v1953_v61, %v1425_v63 }
 0x13a   : > { %v1970_v1 = vpop.f32.mrb[8].mxu0 }
 0x13b   : > { %v1992_v2 = vpop.f32.mrb[8].mxu1  ;;  %v1971_v3 = vpop.f32.mrb[9].mxu0 }
 0x13c   : > { %v1993_v4 = vpop.f32.mrb[9].mxu1  ;;  %v1972_v5 = vadd.f32 %v1971_v3, %v1970_v1  ;;  %v1973_v7 = vpop.f32.mrb[10].mxu0 }
 0x13d   : > { %v1994_v6 = vadd.f32 %v1993_v4, %v1992_v2  ;;  %v1995_v8 = vpop.f32.mrb[10].mxu1  ;;  %v1974_v9 = vpop.f32.mrb[11].mxu0 }
 0x13e   : > { %v1996_v10 = vpop.f32.mrb[11].mxu1  ;;  %v1504_v11 = vadd.f32 %v1972_v5, %v1463_v62  ;;  %v1975_v12 = vadd.f32 %v1974_v9, %v1973_v7 }
 0x13f   : > { %v1997_v13 = vadd.f32 %v1996_v10, %v1995_v8 }
 0x140   : > { %v1545_v14 = vadd.f32 %v1994_v6, %v1504_v11  ;;  %v1507_v15 = vadd.f32 %v1975_v12, %v1466_v0 }
 0x142   : > { %v1548_v16 = vadd.f32 %v1997_v13, %v1507_v15 }
 0x15a   : > { %v2014_v17 = vpop.f32.mrb[12].mxu0 }
 0x15b   : > { %v2036_v18 = vpop.f32.mrb[12].mxu1  ;;  %v2015_v19 = vpop.f32.mrb[13].mxu0 }
 0x15c   : > { %v2016_v20 = vadd.f32 %v2015_v19, %v2014_v17  ;;  %v2037_v21 = vpop.f32.mrb[13].mxu1  ;;  %v2017_v22 = vpop.f32.mrb[14].mxu0 }
 0x15d   : > { %v2038_v23 = vadd.f32 %v2037_v21, %v2036_v18  ;;  %v2039_v24 = vpop.f32.mrb[14].mxu1  ;;  %v2018_v25 = vpop.f32.mrb[15].mxu0 }
 0x15e   : > { %v1586_v26 = vadd.f32 %v2016_v20, %v1545_v14  ;;  %v2019_v27 = vadd.f32 %v2018_v25, %v2017_v22  ;;  %v2040_v28 = vpop.f32.mrb[15].mxu1 }
 0x15f   : > { %v2041_v29 = vadd.f32 %v2040_v28, %v2039_v24 }
 0x160   : > { %v1627_v30 = vadd.f32 %v2038_v23, %v1586_v26  ;;  %v1589_v31 = vadd.f32 %v2019_v27, %v1548_v16 }
 0x162   : > { %v1630_v32 = vadd.f32 %v2041_v29, %v1589_v31 }
 0x164   : > { %v1864_v33 = vpack.c.bf16 %v1630_v32, %v1627_v30 }
 0x166   : > { %1865 = vst [vmem:[%s175_s9] sm:$0xff] %v1864_v33  }
 0x167 PF: > { %s13_s12 = sadd.s32 1, %s2184_s12  }
 0x168   : > { %p10_p4 = scmp.ge.s32.totalorder %s13_s12, 4  }
 0x16a   :  { %12 = sbr.rel (!%p10_p4) target bundleno = 1 (0x1), region = 62 }

// kernel: _raft_forward.17
= control target key start
LH: loop header
LB: loop body
LE: loop exit
PB: predicated region body
PF: predicated region fallthrough
CT: control target
= control target key end

     0   :  { %s521_s9 = smov 0   ;;  %s523_s10 = smov 0   ;;  %s575_s0 = inlined_call_operand.vmem [shape: bf16[2,16,128], index: 0, kind: input, shape index: {}]   ;;  %s576_s1 = inlined_call_operand.vmem [shape: bf16[2,16,128], index: 1, kind: input, shape index: {}]   ;;  %s577_s2 = inlined_call_operand.vmem [shape: f32[2,16,16], index: 2, kind: output, shape index: {}]  }
   0x1   :  { %s525_s11 = smov 0   ;;  %s527_s12 = smov 0  }
   0x2   :  { %s529_s13 = smov 0  }
   0x3 LB: > { %s27_s14 = sadd.s32 1, %s494_s11  ;;  %s31_s15 = sadd.s32 1, %s498_s12  ;;  %s502_s13 = sphi %s529_s13, %s12_s13   ;;  %s498_s12 = sphi %s527_s12, %s581_s12   ;;  %s494_s11 = sphi %s525_s11, %s580_s11   ;;  %s490_s10 = sphi %s523_s10, %s579_s10   ;;  %s486_s9 = sphi %s521_s9, %s578_s9  }
   0x4   : > { %p29_p0 = scmp.ge.s32.totalorder %s27_s14, 2  ;;  %p402_p1 = scmp.ge.s32.totalorder %s502_s13, 1 }
   0x5   : > { %p157_p2 = scmp.lt.s32.totalorder %s502_s13, 5 }
   0x6   : > { %s583_s14 = smov (%p29_p0, %s27_s14), 0  ;;  %s585_s15 = smov (!%p29_p0, %s31_s15), %s498_s12 }
   0x7   : > { %p158_p3 = pnand %p402_p1, %p157_p2  ;;  %p33_p4 = scmp.ge.s32.totalorder %s585_s15, 2 }
   0x8   : > { %p197_p5 = scmp.lt.s32.totalorder (!%p158_p3), %s490_s10, 1  ;;  %p199_p6 = scmp.lt.s32.totalorder (!%p158_p3), %s486_s9, 1  ;;  %v504_v0 = vmov (!%p158_p3), 0.0   ;;  %vm505_vm0 = vmmov (!%p158_p3), 0   ;;  %vm279_vm1 = vcmask (!%p158_p3), 130048  }
   0x9   : > { %s587_s15 = smov (%p33_p4, %s585_s15), 0  ;;  %161 = sbr.rel (%p158_p3) target bundleno = 243 (0xf3), region = 28 }
   0xa   : > { %415 = vmatprep.subr.bf16.mxu0 (!%p158_p3), %v504_v0  ;;  %417 = vmatprep.mubr.msk.bf16.mxu0 (!%p158_p3), %vm505_vm0, %v504_v0 }
  0x10   : > { %s589_s10 = smov (!%p197_p5, %s490_s10), 1  ;;  %s591_s9 = smov (!%p199_p6, %s486_s9), 1 }
  0x11   : > { %s412_s16 = sshll.u32 %s589_s10, 3  ;;  %s403_s17 = sshll.u32 %s589_s10, 1 }
  0x12   : > { %s213_s20 = scalar_lea.vmem %s576_s1, %s412_s16  ;;  %s202_s21 = sadd.s32 %s403_s17, %s591_s9 }
  0x13   : > { %v463_v1 = vld [vmem:[%s213_s20] sm:$0xff]   ;;  %s404_s22 = sshll.u32 %s202_s21, 2  ;;  %s408_s26 = sshll.u32 %s202_s21, 3 }
  0x14   : > { %s204_s25 = scalar_lea.vmem %s575_s0, %s404_s22  ;;  %416 = vmatpush3.bf16.xpose.msra.mxu0 %v463_v1  ;;  %s225_s29 = scalar_lea.vmem %s577_s2, %s408_s26 }
  0x15   : > { %v227_v2 = vld [vmem:[%s204_s25] sm:$0xf] }
  0x16   : > { %v228_v3 = vunpack.c.l.bf16 %v227_v2 }
  0x18   : > { %v229_v4 = vmul.f32 0.088388346, %v228_v3 }
  0x1a   : > { %v230_v5 = vpack.c.bf16 %v229_v4, %v229_v4 }
  0x1c   : > { %418 = vmatmul.mubr.bf16.vlgmr.msra.gmra.mrb[0].mxu0 %v230_v5 }
  0xef   : > { %v273_v6 = vpop.f32.mrb[0].mxu0 }
  0xf0   : > { %280 = vst.msk [vmem:[%s225_s29] sm:$0xff] %vm279_vm1, %v273_v6  ;;  %v419_v7 = vpop.f32.mrb[1].mxu0 }
  0xf1   : > { %v276_v8 = vpop.f32.mrb[2].mxu0 }
  0xf2   : > { %v420_v9 = vpop.f32.mrb[3].mxu0 }
  0xf3 PF: > { %s12_s13 = sadd.s32 1, %s502_s13   ;;  %s578_s9 = smov %s494_s11 }
  0xf4   : > { %p9_p7 = scmp.ge.s32.totalorder %s12_s13, 6   ;;  %s579_s10 = smov %s498_s12 }
  0xf5   : > { %s580_s11 = smov %s583_s14  ;;  %s581_s12 = smov %s587_s15 }
  0xf6   :  { %11 = sbr.rel (!%p9_p7) target bundleno = 3 (0x3), region = 61 }

// kernel: _raft_forward.24
= control target key start
LH: loop header
LB: loop body
LE: loop exit
PB: predicated region body
PF: predicated region fallthrough
CT: control target
= control target key end

     0   :  { %s367_s12 = smov 0   ;;  %s390_s0 = inlined_call_operand.vmem [shape: f32[16,4], index: 0, kind: input, shape index: {}]   ;;  %s391_s1 = inlined_call_operand.vmem [shape: f32[4,32], index: 1, kind: input, shape index: {}]   ;;  %s392_s2 = inlined_call_operand.vmem [shape: f32[1,32], index: 2, kind: input, shape index: {}]   ;;  %s393_s3 = inlined_call_operand.vmem [shape: f32[16,32], index: 3, kind: output, shape index: {}]  }
   0x1 LB: > { %s308_s13 = sadd.s32 4294967295, %s343_s12   ;;  %p312_p0 = scmp.ge.s32.totalorder %s343_s12, 1  ;;  %s343_s12 = sphi %s367_s12, %s13_s12  }
   0x2   : > { %p136_p1 = scmp.lt.s32.totalorder %s343_s12, 3 }
   0x4   : > { %p137_p2 = pnand %p312_p0, %p136_p1 }
   0x5   : > { %v167_v0 = vld [vmem:[%s391_s1] sm:$0xf] (!%p137_p2)  ;;  %vm179_vm0 = vcmask (!%p137_p2), 1043456   ;;  %p158_p3 = scmp.lt.s32.totalorder (!%p137_p2), %s308_s13, 1  ;;  %v345_v1 = vmov (!%p137_p2), 0.0   ;;  %vm346_vm1 = vmmov (!%p137_p2), 0  }
   0x6   : > { %140 = sbr.rel (%p137_p2) target bundleno = 232 (0xe8), region = 32  ;;  %322 = vmatprep.subr.mxu0 (!%p137_p2), %v345_v1  ;;  %324 = vmatprep.mubr.msk.f32.mxu0 (!%p137_p2), %vm346_vm1, %v345_v1  ;;  %vm175_vm2 = vcmask (!%p137_p2), 31744   ;;  %v315_v3 = vld [vmem:[%s392_s2] ss:$0 sm:$0xff] (!%p137_p2)  ;;  %vm253_vm3 = vcmask (!%p137_p2), 261120  }
   0x7   : > { %323 = vmatpush3.msk.msra.mxu0 (!%p137_p2), %vm179_vm0, %v167_v0 }
   0xd   : > { %s395_s13 = smov (!%p158_p3, %s308_s13), 1 }
   0xe   : > { %s313_s16 = sshll.u32 %s395_s13, 3 }
   0xf   : > { %s161_s19 = scalar_lea.vmem %s390_s0, %s313_s16  ;;  %s165_s24 = scalar_lea.vmem %s393_s3, %s313_s16 }
  0x10   : > { %v166_v2 = vld [vmem:[%s161_s19] sm:$0xff] }
  0x11   : > { %325 = vmatmul.mubr.msk.f32.vlgmr.msra.gmra.mrb[0].mxu0 %vm175_vm2, %v166_v2 }
  0xe4   : > { %v249_v4 = vpop.f32.mrb[0].mxu0 }
  0xe5   : > { %v250_v5 = vadd.f32 %v315_v3, %v249_v4  ;;  %v326_v6 = vpop.f32.mrb[1].mxu0 }
  0xe7   : > { %254 = vst.msk [vmem:[%s165_s24] sm:$0xff] %vm253_vm3, %v250_v5 }
  0xe8 PF: > { %s13_s12 = sadd.s32 1, %s343_s12  }
  0xe9   : > { %p10_p4 = scmp.ge.s32.totalorder %s13_s12, 4  }
  0xeb   :  { %12 = sbr.rel (!%p10_p4) target bundleno = 1 (0x1), region = 62 }

// kernel: _raft_forward.18
= control target key start
LH: loop header
LB: loop body
LE: loop exit
PB: predicated region body
PF: predicated region fallthrough
CT: control target
= control target key end

     0   :  { %s3591_s0 = inlined_call_operand.vmem [shape: f32[32,128], index: 0, kind: input, shape index: {}, may-alias: {0,22}]   ;;  %s3592_s1 = inlined_call_operand.vmem [shape: bf16[32,128], index: 1, kind: input, shape index: {}]   ;;  %s3593_s2 = inlined_call_operand.vmem [shape: bf16[32,160], index: 2, kind: input, shape index: {}]   ;;  %s3594_s3 = inlined_call_operand.vmem [shape: bf16[160,96], index: 3, kind: input, shape index: {}]   ;;  %s3595_s4 = inlined_call_operand.vmem [shape: f32[1,96], index: 4, kind: input, shape index: {}]   ;;  %s3596_s5 = inlined_call_operand.vmem [shape: f32[2,64], index: 5, kind: input, shape index: {}]   ;;  %s3597_s6 = inlined_call_operand.vmem [shape: f32[1,64], index: 6, kind: input, shape index: {}]   ;;  %s3598_s7 = inlined_call_operand.vmem [shape: bf16[64,32], index: 7, kind: input, shape index: {}]   ;;  %s3599_s8 = inlined_call_operand.vmem [shape: f32[1,32], index: 8, kind: input, shape index: {}]   ;;  %s3600_s9 = inlined_call_operand.vmem [shape: bf16[96,80], index: 9, kind: input, shape index: {}]   ;;  %s3601_s10 = inlined_call_operand.vmem [shape: bf16[32,80], index: 10, kind: input, shape index: {}]   ;;  %s3602_s11 = inlined_call_operand.vmem [shape: f32[1,80], index: 11, kind: input, shape index: {}]   ;;  %s3603_s12 = inlined_call_operand.vmem [shape: bf16[128,256], index: 12, kind: input, shape index: {}]   ;;  %s3604_s13 = inlined_call_operand.vmem [shape: bf16[128,128], index: 13, kind: input, shape index: {}]   ;;  %s3605_s14 = inlined_call_operand.vmem [shape: bf16[128,384], index: 14, kind: input, shape index: {}]   ;;  %s3606_s15 = inlined_call_operand.vmem [shape: bf16[80,384], index: 15, kind: input, shape index: {}]   ;;  %s3607_s16 = inlined_call_operand.vmem [shape: f32[2,384], index: 16, kind: input, shape index: {}]   ;;  %s3608_s17 = inlined_call_operand.vmem [shape: f32[1,384], index: 17, kind: input, shape index: {}]   ;;  %s3609_s18 = inlined_call_operand.vmem [shape: bf16[128,128], index: 18, kind: input, shape index: {}]   ;;  %s3610_s19 = inlined_call_operand.vmem [shape: f32[1,128], index: 19, kind: input, shape index: {}]   ;;  %s3611_s20 = inlined_call_operand.vmem [shape: bf16[128,128], index: 20, kind: input, shape index: {}]   ;;  %s3612_s21 = inlined_call_operand.vmem [shape: f32[1,128], index: 21, kind: input, shape index: {}]   ;;  %s3613_s22 = inlined_call_operand.vmem [shape: f32[32,128], index: 22, kind: output, shape index: {0}, may-alias: {0,22}]   ;;  %s3614_s23 = inlined_call_operand.vmem [shape: f32[32,128], index: 23, kind: output, shape index: {1}]  }
   0x1   :  { %3619 = sst [smem:[#allocation2_spill]] %s3591_s0 }
   0x2   :  { %3620 = sst [smem:[#allocation3_spill]] %s3592_s1 }
   0x3   :  { %3621 = sst [smem:[#allocation4_spill]] %s3593_s2 }
   0x4   :  { %3622 = sst [smem:[#allocation5_spill]] %s3594_s3 }
   0x5   :  { %3623 = sst [smem:[#allocation6_spill]] %s3595_s4  ;;  %s3064_s4 = smov 0  }
   0x6   :  { %3624 = sst [smem:[#allocation7_spill]] %s3596_s5 }
   0x7   :  { %3625 = sst [smem:[#allocation8_spill]] %s3597_s6 }
   0x8   :  { %3626 = sst [smem:[#allocation9_spill]] %s3598_s7 }
   0x9   :  { %3627 = sst [smem:[#allocation10_spill]] %s3599_s8 }
   0xa LB: > { %s2398_s30 = sadd.s32 4294967295, %s2937_s4   ;;  %p2402_p0 = scmp.ge.s32.totalorder %s2937_s4, 1  ;;  %s2937_s4 = sphi %s3064_s4, %s34_s4  }
   0xb   : > { %p664_p1 = scmp.lt.s32.totalorder %s2937_s4, 3 }
   0xd   : > { %p665_p2 = pnand %p2402_p0, %p664_p1 }
   0xe   : > { %s2403_s24 = sshll.u32 (!%p665_p2), %s2398_s30, 1  ;;  %v2939_v0 = vmov (!%p665_p2), 0   ;;  %s3628_s26 = sld [smem:[#allocation5_spill]] (!%p665_p2)  ;;  %v2940_v3 = vmov (!%p665_p2), 0.0   ;;  %v1687_v19 = vlaneseq (!%p665_p2)  ;;  %v3140_v37 = vld [vmem:[%s3608_s17] sm:$0x7] (!%p665_p2) }
   0xf   : > { %668 = sbr.rel (%p665_p2) target bundleno = 1738 (0x6ca), region = 108  ;;  %p745_p3 = scmp.lt.s32.totalorder (!%p665_p2), %s2403_s24, 3  ;;  %2780 = vset.pattern.permute.xlu1 (!%p665_p2), %v2939_v0  ;;  %2774 = vset.pattern.permute.xlu0 (!%p665_p2), %v2939_v0  ;;  %v1685_v26 = vld [vmem:[%s3607_s16] ss:$2 sm:$0x7] (!%p665_p2)  ;;  %vm2943_vm0 = vmmov (!%p665_p2), 0  }
  0x10   : > { %903 = vmatprep.subr.bf16.mxu0 (!%p665_p2), %v2939_v0  ;;  %s3629_s27 = sld [smem:[#allocation9_spill]] (!%p665_p2)  ;;  %s3630_s29 = sld [smem:[#allocation4_spill]] (!%p665_p2)  ;;  %2597 = vmatprep.subr.bf16.mxu1 (!%p665_p2), %v2940_v3  ;;  %v1688_v22 = vshrl.u32 (!%p665_p2), %v1687_v19, 7  ;;  %v2490_v29 = vld [vmem:[%s3607_s16 + $0x1] ss:$2 sm:$0x7] (!%p665_p2) }
  0x11   : > { %s2941_s5 = smov (!%p665_p2), 108   ;;  %s2942_s1 = smov (!%p665_p2), 109   ;;  %2605 = vmatprep.mubr.msk.bf16.mxu1 (!%p665_p2), %vm2943_vm0, %v2940_v3  ;;  %vm899_vm1 = vcmask (!%p665_p2), 261120   ;;  %vm1033_vm2 = vcmask (!%p665_p2), 523264   ;;  %vm1190_vm3 = vcmask (!%p665_p2), 785408   ;;  %vm1379_vm4 = vcmask (!%p665_p2), 654336  }
  0x12   : > { %v1689_v25 = vsub.s32 (!%p665_p2), 0, %v1688_v22  ;;  %v1697_v27 = vsub.s32 (!%p665_p2), 2, %v1688_v22  ;;  %v3179_v47 = vsub.s32 (!%p665_p2), 1, %v1688_v22  ;;  %s3631_s2 = sld [smem:[#allocation7_spill]] (!%p665_p2)  ;;  %s3633_s28 = sld [smem:[#allocation6_spill]] (!%p665_p2) }
  0x13   : > { %s3634_s8 = sld [smem:[#allocation10_spill]] (!%p665_p2) }
  0x14   : > { %v2786_v1 = vld [vmem:[%s3628_s26] sm:$0xff] (!%p665_p2)   ;;  %v2787_v4 = vld [vmem:[%s3628_s26 + $0x8] sm:$0xff] (!%p665_p2)   ;;  %v2789_v23 = vld [vmem:[%s3628_s26 + $0x10] sm:$0xff] (!%p665_p2)   ;;  %v3116_v28 = vrot.slane (!%p665_p2), %v1685_v26, %v1689_v25  ;;  %v1720_v32 = vrot.slane (!%p665_p2), %v2490_v29, %v1689_v25  ;;  %v3127_v33 = vrot.slane (!%p665_p2), %v1685_v26, %v1697_v27  ;;  %v3129_v34 = vrot.slane (!%p665_p2), %v2490_v29, %v1697_v27  ;;  %s3636_s6 = sld [smem:[#allocation2_spill]] (!%p665_p2) }
  0x15   : > { %904 = vmatpush1.bf16.msra.mxu0 (!%p665_p2), %v2786_v1  ;;  %v2791_v30 = vld [vmem:[%s3628_s26 + $0x18] sm:$0xff] (!%p665_p2)   ;;  %v2793_v35 = vld [vmem:[%s3628_s26 + $0x20] sm:$0xff] (!%p665_p2)   ;;  %v3145_v38 = vrot.slane (!%p665_p2), %v3140_v37, %v1689_v25  ;;  %v3150_v39 = vrot.slane (!%p665_p2), %v3140_v37, %v1697_v27  ;;  %v2795_v40 = vld [vmem:[%s3628_s26 + $0x28] sm:$0xff] (!%p665_p2)   ;;  %v1694_v52 = vrot.slane (!%p665_p2), %v1685_v26, %v3179_v47  ;;  %v1724_v53 = vrot.slane (!%p665_p2), %v2490_v29, %v3179_v47 }
  0x16   : > { %s3638_s24 = smov (!%p745_p3, %s2403_s24), 3  ;;  %v2788_v2 = vld [vmem:[%s3629_s27] sm:$0xff]   ;;  %905 = vmatprep.subr.bf16.mxu0 %v2939_v0  ;;  %v2790_v24 = vld [vmem:[%s3629_s27 + $0x8] sm:$0xff]   ;;  %v2792_v31 = vld [vmem:[%s3629_s27 + $0x10] sm:$0xff]  }
  0x17   : > { %s3077_s25 = sshll.u32 %s3638_s24, 3  ;;  %2598 = vmatpush3.bf16.msra.mxu1 %v2788_v2  ;;  %v2794_v36 = vld [vmem:[%s3629_s27 + $0x18] sm:$0xff]   ;;  %v2796_v42 = vld [vmem:[%s3628_s26 + $0x30] sm:$0xff]   ;;  %v2798_v44 = vld [vmem:[%s3628_s26 + $0x40] sm:$0xff]   ;;  %s2406_s7 = sshll.u32 %s3638_s24, 2 }
  0x18   : > { %s761_s3 = scalar_lea.vmem %s3630_s29, %s3077_s25  ;;  %2599 = vmatprep.subr.bf16.mxu1 %v2940_v3  ;;  %v2797_v43 = vld [vmem:[%s3628_s26 + $0x38] sm:$0xff]   ;;  %v2799_v45 = vld [vmem:[%s3628_s26 + $0x48] sm:$0xff]   ;;  %v2429_v48 = vld [vmem:[%s3631_s2 + $0x1] ss:$0 sm:$0xff]  ;;  %s767_s29 = scalar_lea.vmem %s3613_s22, %s3077_s25 }
  0x19   : > { %v3094_v5 = vld [vmem:[%s761_s3] sm:$0xff]  ;;  %v3096_v6 = vld [vmem:[%s761_s3 + $0x8] sm:$0xff]  ;;  %906 = vmatpush1.bf16.msra.mxu0 %v2787_v4  ;;  %s3632_s3 = sld [smem:[#allocation8_spill]] }
  0x1a   : > { %795 = vrot.lane.b32.xlu1 %v3094_v5, %s2941_s5  ;;  %785 = vrot.lane.b32.xlu0 %v3094_v5, %s2942_s1  ;;  %v2416_v41 = vcombine.high %v3094_v5, %v3096_v6  ;;  %v2415_v46 = vcombine.low %v3094_v5, %v3096_v6  ;;  %v2428_v50 = vld [vmem:[%s3631_s2] ss:$0 sm:$0xff] }
  0x1b   : > { %907 = vmatprep.subr.bf16.mxu0 %v2939_v0  ;;  %2600 = vmatpush3.bf16.msra.mxu1 %v2790_v24 }
  0x1c   : > { %2601 = vmatprep.subr.bf16.mxu1 %v2940_v3  ;;  %2427 = vmatprep.mubr.msk.bf16.mxu0 %vm899_vm1, %v2416_v41 }
  0x1d   : > { %908 = vmatpush1.bf16.msra.mxu0 %v2789_v23 }
  0x1e   : > { %797 = vrot.lane.b32.xlu1 %v3096_v6, %s2941_s5  ;;  %787 = vrot.lane.b32.xlu0 %v3096_v6, %s2942_s1 }
  0x1f   : > { %909 = vmatprep.subr.bf16.mxu0 %v2939_v0  ;;  %2602 = vmatpush3.bf16.msra.mxu1 %v2792_v31  ;;  %v2430_v62 = vld [vmem:[%s3632_s3] ss:$0 sm:$0xff]  ;;  %v2803_v31 = vld [vmem:[%s3601_s10 + $0x8] sm:$0xff]   ;;  %s3635_s3 = sld [smem:[#allocation3_spill]] }
  0x20   : > { %2603 = vmatprep.subr.bf16.mxu1 %v2940_v3 }
  0x21   : > { %910 = vmatpush1.bf16.msra.mxu0 %v2791_v30  ;;  %v2802_v30 = vld [vmem:[%s3601_s10] sm:$0xff]  }
  0x22   : > { %911 = vmatprep.subr.bf16.mxu0 %v2939_v0 }
  0x23   : > { %2604 = vmatpush3.bf16.msra.mxu1 %v2794_v36 }
  0x24   : > { %2609 = vmatprep.subr.bf16.mxu1 %v2940_v3 }
  0x25   : > { %912 = vmatpush1.bf16.msra.mxu0 %v2793_v35  ;;  %s3316_s2 = scalar_lea.vmem %s3635_s3, %s2406_s7  ;;  %s748_s7 = scalar_lea.vmem %s3636_s6, %s3077_s25 }
  0x26   : > { %913 = vmatprep.subr.bf16.mxu0 %v2939_v0 }
  0x29   : > { %914 = vmatpush1.bf16.msra.mxu0 %v2795_v40 }
  0x2a   : > { %915 = vmatprep.subr.bf16.mxu0 %v2939_v0 }
  0x2d   : > { %916 = vmatpush1.bf16.msra.mxu0 %v2796_v42 }
  0x2e   : > { %917 = vmatprep.subr.bf16.mxu0 %v2939_v0 }
  0x31   : > { %918 = vmatpush1.bf16.msra.mxu0 %v2797_v43  ;;  %v2431_v43 = vld [vmem:[%s3634_s8] ss:$0 sm:$0xff] }
  0x32   : > { %919 = vmatprep.subr.bf16.mxu0 %v2939_v0 }
  0x35   : > { %920 = vmatpush1.bf16.msra.mxu0 %v2798_v44 }
  0x36   : > { %921 = vmatprep.subr.bf16.mxu0 %v2939_v0 }
  0x39   : > { %922 = vmatpush1.bf16.msra.mxu0 %v2799_v45 }
  0x3c   : > { %936 = vmatmul.mubr.bf16.vlgmr.msra.gmra.mrb[0].mxu0 %v2415_v46 }
  0x3d   : > { %1415 = vmatprep.mubr.bf16.mxu0 %v2939_v0 }
  0x8c   : > { %v796_v7 = vpop.permute.xlu1 %795  ;;  %v786_v8 = vpop.permute.xlu0 %785 }
  0x8d   : > { %v799_v9 = vrot.slane %v796_v7, 4  ;;  %v789_v10 = vrot.slane %v786_v8, 4 }
  0x8f   : > { %v803_v15 = vunpack.c.l.bf16 %v799_v9  ;;  %v793_v16 = vunpack.c.l.bf16 %v789_v10 }
  0x90   : > { %v798_v11 = vpop.permute.xlu1 %797  ;;  %v788_v12 = vpop.permute.xlu0 %787 }
  0x91   : > { %v800_v13 = vrot.slane %v798_v11, 4  ;;  %v790_v14 = vrot.slane %v788_v12, 4 }
  0x93   : > { %v804_v17 = vunpack.c.l.bf16 %v800_v13  ;;  %v794_v18 = vunpack.c.l.bf16 %v790_v14 }
  0x95   : > { %v2781_v20 = vpack.i.bf16 %v804_v17, %v803_v15  ;;  %v2775_v21 = vpack.i.bf16 %v794_v18, %v793_v16 }
  0x97   : > { %2782 = vperm.xlu1 %2780, %v2781_v20   ;;  %2776 = vperm.xlu0 %2774, %v2775_v21  }
 0x116   : > { %v2783_v49 = vpop.permute.xlu1 %2782  ;;  %v2777_v51 = vpop.permute.xlu0 %2776 }
 0x117   : > { %v2785_v54 = vunpack.i.h.bf16 %v2783_v49  ;;  %v2784_v55 = vunpack.i.l.bf16 %v2783_v49  ;;  %v2779_v56 = vunpack.i.h.bf16 %v2777_v51  ;;  %v2778_v57 = vunpack.i.l.bf16 %v2777_v51 }
 0x119   : > { %v979_v58 = vmul.f32 %v2785_v54, %v2429_v48  ;;  %v978_v59 = vmul.f32 %v2784_v55, %v2429_v48  ;;  %v962_v60 = vmul.f32 %v2779_v56, %v2428_v50  ;;  %v961_v61 = vmul.f32 %v2778_v57, %v2428_v50 }
 0x11a   : > { %v1702_v63 = vmul.f32 %v2778_v57, %v3116_v28  ;;  %v1732_v1 = vmul.f32 %v2784_v55, %v1720_v32  ;;  %v1703_v2 = vmul.f32 %v2778_v57, %v1694_v52  ;;  %v1733_v4 = vmul.f32 %v2784_v55, %v1724_v53 }
 0x11b   : > { %v981_v5 = vadd.f32 %v979_v58, %v962_v60  ;;  %v980_v6 = vadd.f32 %v978_v59, %v961_v61  ;;  %v1705_v7 = vmul.f32 %v2779_v56, %v3116_v28  ;;  %v1735_v8 = vmul.f32 %v2785_v54, %v1720_v32  ;;  %v2414_v32 = vld [vmem:[%s3633_s28] ss:$0 sm:$0xff]  ;;  %v2809_v59 = vld [vmem:[%s3600_s9 + $0x28] sm:$0xff]   ;;  %v2812_v61 = vld [vmem:[%s3606_s15 + $0x4] ss:$12 sps:$4 sm:$0xff]   ;;  %s773_s28 = scalar_lea.vmem %s3614_s23, %s3077_s25 }
 0x11c   : > { %v2727_v9 = vadd.f32 %v1732_v1, %v1702_v63  ;;  %v3194_v10 = vadd.f32 %v1733_v4, %v1703_v2  ;;  %v1706_v11 = vmul.f32 %v2779_v56, %v1694_v52  ;;  %v1736_v12 = vmul.f32 %v2785_v54, %v1724_v53  ;;  %v2804_v53 = vld [vmem:[%s3600_s9] sm:$0xff]   ;;  %v2816_v63 = vld [vmem:[%s3606_s15 + $0x1c] ss:$12 sps:$4 sm:$0xff]   ;;  %1383 = vmatprep.subr.bf16.mxu0 %v2812_v61 }
 0x11d   : > { %v989_v13 = vadd.f32 %v2430_v62, %v980_v6  ;;  %v990_v14 = vadd.f32 %v2430_v62, %v981_v5  ;;  %v2733_v15 = vadd.f32 %v1735_v8, %v1705_v7  ;;  %v1704_v16 = vmul.f32 %v2778_v57, %v3127_v33  ;;  %v2807_v57 = vld [vmem:[%s3600_s9 + $0x18] sm:$0xff]   ;;  %v2808_v58 = vld [vmem:[%s3600_s9 + $0x20] sm:$0xff]   ;;  %v2813_v62 = vld [vmem:[%s3606_s15 + $0x8] ss:$12 sps:$4 sm:$0xff]  }
 0x11e   : > { %v3198_v17 = vadd.f32 %v2727_v9, %v3145_v38  ;;  %v3200_v18 = vadd.f32 %v1736_v12, %v1706_v11  ;;  %v1734_v19 = vmul.f32 %v2784_v55, %v3129_v34  ;;  %v1707_v23 = vmul.f32 %v2779_v56, %v3127_v33  ;;  %v937_v33 = vpop.f32.mrb[0].mxu0  ;;  %v2805_v55 = vld [vmem:[%s3600_s9 + $0x8] sm:$0xff]   ;;  %v2806_v56 = vld [vmem:[%s3600_s9 + $0x10] sm:$0xff]   ;;  %v2814_v2 = vld [vmem:[%s3606_s15 + $0x18] ss:$12 sps:$4 sm:$0xff]  }
 0x11f   : > { %v991_v20 = vmax.f32 %v989_v13, 0.0  ;;  %v992_v21 = vmax.f32 %v990_v14, 0.0  ;;  %v3204_v22 = vadd.f32 %v2733_v15, %v3145_v38  ;;  %v1737_v25 = vmul.f32 %v2785_v54, %v3129_v34  ;;  %v939_v35 = vpop.f32.mrb[1].mxu0  ;;  %v2810_v60 = vld [vmem:[%s3606_s15] ss:$12 sps:$4 sm:$0xff]  }
 0x120   : > { %v2739_v24 = vadd.f32 %v1734_v19, %v1704_v16  ;;  %v938_v34 = vadd.f32 %v2414_v32, %v937_v33  ;;  %v940_v36 = vpop.f32.mrb[2].mxu0  ;;  %v2817_v1 = vld [vmem:[%s3606_s15 + $0x20] ss:$12 sps:$4 sm:$0xff]   ;;  %1384 = vmatpush1.bf16.msra.mxu0 %v2810_v60  ;;  %v2818_v5 = vld [vmem:[%s3606_s15 + $0x30] ss:$12 sps:$4 sm:$0xff]  }
 0x121   : > { %v993_v26 = vpack.c.bf16 %v992_v21, %v991_v20  ;;  %v2742_v28 = vadd.f32 %v1737_v25, %v1707_v23  ;;  %v942_v40 = vpop.f32.mrb[3].mxu0  ;;  %1385 = vmatprep.subr.bf16.mxu0 %v2816_v63  ;;  %v2820_v4 = vld [vmem:[%s3606_s15 + $0x34] ss:$12 sps:$4 sm:$0xff]   ;;  %v2821_v6 = vld [vmem:[%s3606_s15 + $0x38] ss:$12 sps:$4 sm:$0xff]  }
 0x122   : > { %v3209_v27 = vadd.f32 %v2739_v24, %v3150_v39  ;;  %v944_v38 = vmax.f32 %v938_v34, 0.0  ;;  %v2824_v7 = vld [vmem:[%s3606_s15 + $0x4c] ss:$12 sps:$4 sm:$0xff]   ;;  %v2822_v8 = vld [vmem:[%s3606_s15 + $0x48] ss:$12 sps:$4 sm:$0xff]   ;;  %v2857_v61 = vld [vmem:[%s3316_s2] sm:$0xff]  }
 0x123   : > { %2606 = vmatmul.mubr.msk.bf16.vlgmr.msra.gmra.mrb[0].mxu1 %vm1033_vm2, %v993_v26  ;;  %v3214_v29 = vadd.f32 %v2742_v28, %v3150_v39  ;;  %v941_v39 = vadd.f32 %v2414_v32, %v940_v36  ;;  %v2825_v9 = vld [vmem:[%s3606_s15 + $0x50] ss:$12 sps:$4 sm:$0xff]   ;;  %v2826_v12 = vld [vmem:[%s3606_s15 + $0x60] ss:$12 sps:$4 sm:$0xff]   ;;  %v2829_v13 = vld [vmem:[%s3606_s15 + $0x68] ss:$12 sps:$4 sm:$0xff]  }
 0x124   : > { %2613 = vmatprep.mubr.msk.bf16.mxu1 %vm2943_vm0, %v2940_v3  ;;  %2610 = vmatpush3.bf16.msra.mxu1 %v2802_v30  ;;  %v2828_v11 = vld [vmem:[%s3606_s15 + $0x64] ss:$12 sps:$4 sm:$0xff]   ;;  %v2447_v23 = vld [vmem:[%s3602_s11] ss:$0 sm:$0xff]  ;;  %v2860_v63 = vld [vmem:[%s3603_s12 + $0x14] ss:$8 sps:$4 sm:$0xff]  }
 0x125   : > { %2611 = vmatprep.subr.bf16.mxu1 %v2940_v3  ;;  %v945_v41 = vmax.f32 %v941_v39, 0.0  ;;  %1386 = vmatpush1.bf16.msra.mxu0 %v2814_v2  ;;  %v2832_v14 = vld [vmem:[%s3605_s14 + $0x4] ss:$12 sps:$4 sm:$0xff]   ;;  %v2830_v35 = vld [vmem:[%s3605_s14] ss:$12 sps:$4 sm:$0xff]  }
 0x126   : > { %1387 = vmatprep.subr.bf16.mxu0 %v2820_v4  ;;  %v2879_v39 = vld [vmem:[%s3605_s14 + $0x8] ss:$12 sps:$4 sm:$0xff]   ;;  %v2833_v40 = vld [vmem:[%s3605_s14 + $0x18] ss:$12 sps:$4 sm:$0xff]  }
 0x127   : > { %v1080_v42 = vpack.c.bf16 %v945_v41, %v944_v38  ;;  %v2835_v38 = vld [vmem:[%s3605_s14 + $0x1c] ss:$12 sps:$4 sm:$0xff]   ;;  %v2838_v41 = vld [vmem:[%s3605_s14 + $0x34] ss:$12 sps:$4 sm:$0xff]   ;;  %v2856_v60 = vld [vmem:[%s3603_s12 + $0x4] ss:$8 sps:$4 sm:$0xff]  }
 0x128   : > { %2612 = vmatpush3.bf16.msra.mxu1 %v2803_v31  ;;  %v2863_v2 = vld [vmem:[%s3603_s12 + $0x24] ss:$8 sps:$4 sm:$0xff]   ;;  %v2861_v4 = vld [vmem:[%s3603_s12 + $0x20] ss:$8 sps:$4 sm:$0xff]  }
 0x129   : > { %2617 = vmatprep.subr.bf16.mxu1 %v2940_v3  ;;  %1388 = vmatpush1.bf16.msra.mxu0 %v2818_v5  ;;  %v2866_v5 = vld [vmem:[%s3603_s12 + $0x34] ss:$8 sps:$4 sm:$0xff]  }
 0x12a   : > { %1389 = vmatprep.subr.bf16.mxu0 %v2824_v7  ;;  %v2867_v7 = vld [vmem:[%s3603_s12 + $0x40] ss:$8 sps:$4 sm:$0xff]  }
 0x12d   : > { %1390 = vmatpush1.bf16.msra.mxu0 %v2822_v8  ;;  %v2872_v8 = vld [vmem:[%s3603_s12 + $0x54] ss:$8 sps:$4 sm:$0xff]  }
 0x12e   : > { %1391 = vmatprep.subr.bf16.mxu0 %v2828_v11  ;;  %v2875_v11 = vld [vmem:[%s3603_s12 + $0x64] ss:$8 sps:$4 sm:$0xff]  }
 0x131   : > { %1392 = vmatpush1.bf16.msra.mxu0 %v2826_v12  ;;  %v2873_v12 = vld [vmem:[%s3603_s12 + $0x60] ss:$8 sps:$4 sm:$0xff]  }
 0x132   : > { %1601 = vmatprep.subr.bf16.mxu0 %v2832_v14  ;;  %v2876_v14 = vld [vmem:[%s3603_s12 + $0x70] ss:$8 sps:$4 sm:$0xff]  }
 0x1f6   : > { %v1071_v44 = vpop.f32.mrb[0].mxu1 }
 0x1f7   : > { %v1072_v45 = vadd.f32 %v2431_v43, %v1071_v44  ;;  %v2607_v46 = vpop.f32.mrb[1].mxu1  ;;  %v2841_v44 = vld [vmem:[%s3605_s14 + $0x4c] ss:$12 sps:$4 sm:$0xff]  }
 0x1f8   : > { %v1074_v48 = vpop.f32.mrb[2].mxu1  ;;  %v2839_v46 = vld [vmem:[%s3605_s14 + $0x48] ss:$12 sps:$4 sm:$0xff]  }
 0x1f9   : > { %v1075_v49 = vadd.f32 %v2431_v43, %v1074_v48  ;;  %v2608_v50 = vpop.f32.mrb[3].mxu1  ;;  %v1078_v51 = vmax.f32 %v1072_v45, 0.0  ;;  %v2836_v43 = vld [vmem:[%s3605_s14 + $0x30] ss:$12 sps:$4 sm:$0xff]   ;;  %v2881_v45 = vld [vmem:[%s3605_s14 + $0x38] ss:$12 sps:$4 sm:$0xff]  }
 0x1fa   : > { %v2844_v48 = vld [vmem:[%s3605_s14 + $0x64] ss:$12 sps:$4 sm:$0xff]   ;;  %v2842_v50 = vld [vmem:[%s3605_s14 + $0x60] ss:$12 sps:$4 sm:$0xff]  }
 0x1fb   : > { %v1079_v52 = vmax.f32 %v1075_v49, 0.0  ;;  %v2882_v49 = vld [vmem:[%s3605_s14 + $0x50] ss:$12 sps:$4 sm:$0xff]  }
 0x1fd   : > { %v1093_v54 = vpack.c.bf16 %v1079_v52, %v1078_v51  ;;  %v2847_v51 = vld [vmem:[%s3605_s14 + $0x7c] ss:$12 sps:$4 sm:$0xff]  }
 0x1fe   : > { %v2883_v52 = vld [vmem:[%s3605_s14 + $0x68] ss:$12 sps:$4 sm:$0xff]  }
 0x1ff   : > { %2614 = vmatmul.mubr.msk.bf16.vlgmr.msra.gmra.mrb[4].mxu1 %vm899_vm1, %v1093_v54  ;;  %v2850_v54 = vld [vmem:[%s3605_s14 + $0x94] ss:$12 sps:$4 sm:$0xff]  }
 0x200   : > { %2618 = vmatpush3.bf16.msra.mxu1 %v2804_v53  ;;  %2629 = vmatprep.mubr.msk.bf16.mxu1 %vm2943_vm0, %v2940_v3  ;;  %v2845_v53 = vld [vmem:[%s3605_s14 + $0x78] ss:$12 sps:$4 sm:$0xff]  }
 0x201   : > { %2619 = vmatprep.subr.bf16.mxu1 %v2940_v3 }
 0x204   : > { %2620 = vmatpush3.bf16.msra.mxu1 %v2805_v55  ;;  %v2884_v55 = vld [vmem:[%s3605_s14 + $0x80] ss:$12 sps:$4 sm:$0xff]  }
 0x205   : > { %2621 = vmatprep.subr.bf16.mxu1 %v2940_v3 }
 0x208   : > { %2622 = vmatpush3.bf16.msra.mxu1 %v2806_v56  ;;  %v2848_v56 = vld [vmem:[%s3605_s14 + $0x90] ss:$12 sps:$4 sm:$0xff]  }
 0x209   : > { %2623 = vmatprep.subr.bf16.mxu1 %v2940_v3 }
 0x20c   : > { %2624 = vmatpush3.bf16.msra.mxu1 %v2807_v57  ;;  %v2853_v57 = vld [vmem:[%s3605_s14 + $0xac] ss:$12 sps:$4 sm:$0xff]  }
 0x20d   : > { %2625 = vmatprep.subr.bf16.mxu1 %v2940_v3 }
 0x210   : > { %2626 = vmatpush3.bf16.msra.mxu1 %v2808_v58  ;;  %v2885_v58 = vld [vmem:[%s3605_s14 + $0x98] ss:$12 sps:$4 sm:$0xff]  }
 0x211   : > { %2627 = vmatprep.subr.bf16.mxu1 %v2940_v3 }
 0x214   : > { %2628 = vmatpush3.bf16.msra.mxu1 %v2809_v59  ;;  %v2851_v59 = vld [vmem:[%s3605_s14 + $0xa8] ss:$12 sps:$4 sm:$0xff]  }
 0x215   : > { %2633 = vmatprep.subr.bf16.mxu1 %v2940_v3 }
 0x217   : > { %2630 = vmatmul.mubr.msk.bf16.vlgmr.msra.gmra.mrb[8].mxu1 %vm1190_vm3, %v1080_v42  ;;  %v2880_v42 = vld [vmem:[%s3605_s14 + $0x20] ss:$12 sps:$4 sm:$0xff]  }
 0x218   : > { %2643 = vmatprep.mubr.msk.bf16.mxu1 %vm2943_vm0, %v2940_v3  ;;  %2634 = vmatpush3.bf16.msra.mxu1 %v2813_v62  ;;  %v2854_v62 = vld [vmem:[%s3603_s12] ss:$8 sps:$4 sm:$0xff]  }
 0x219   : > { %2635 = vmatprep.subr.bf16.mxu1 %v2940_v3 }
 0x21c   : > { %2636 = vmatpush3.bf16.msra.mxu1 %v2817_v1  ;;  %v2858_v1 = vld [vmem:[%s3603_s12 + $0x10] ss:$8 sps:$4 sm:$0xff]  }
 0x21d   : > { %2637 = vmatprep.subr.bf16.mxu1 %v2940_v3 }
 0x220   : > { %2638 = vmatpush3.bf16.msra.mxu1 %v2821_v6  ;;  %v2869_v6 = vld [vmem:[%s3603_s12 + $0x44] ss:$8 sps:$4 sm:$0xff]  }
 0x221   : > { %2639 = vmatprep.subr.bf16.mxu1 %v2940_v3 }
 0x224   : > { %2640 = vmatpush3.bf16.msra.mxu1 %v2825_v9  ;;  %v2870_v9 = vld [vmem:[%s3603_s12 + $0x50] ss:$8 sps:$4 sm:$0xff]  }
 0x225   : > { %2641 = vmatprep.subr.bf16.mxu1 %v2940_v3 }
 0x228   : > { %2642 = vmatpush3.bf16.msra.mxu1 %v2829_v13  ;;  %v2878_v13 = vld [vmem:[%s3603_s12 + $0x74] ss:$8 sps:$4 sm:$0xff]  }
 0x229   : > { %2647 = vmatprep.subr.bf16.mxu1 %v2940_v3 }
 0x2d2   : > { %v1147_v15 = vpop.f32.mrb[4].mxu1 }
 0x2d3   : > { %v2615_v16 = vpop.f32.mrb[5].mxu1 }
 0x2d4   : > { %v1150_v19 = vpop.f32.mrb[6].mxu1  ;;  %v3453_v16 = vld [vmem:[%s748_s7 + $0x8] sm:$0xff] }
 0x2d5   : > { %v2616_v20 = vpop.f32.mrb[7].mxu1 }
 0x2d6   : > { %v2886_v20 = vld [vmem:[%s3605_s14 + $0xb0] ss:$12 sps:$4 sm:$0xff]  }
 0x2ea   : > { %v1228_v21 = vpop.f32.mrb[8].mxu1 }
 0x2eb   : > { %v1229_v24 = vadd.f32 %v1228_v21, %v1147_v15  ;;  %v2631_v25 = vpop.f32.mrb[9].mxu1  ;;  %v3451_v15 = vld [vmem:[%s748_s7] sm:$0xff] }
 0x2ec   : > { %v1231_v26 = vpop.f32.mrb[10].mxu1  ;;  %v2887_v21 = vld [vmem:[%s3604_s13] sm:$0xff]   ;;  %v2890_v25 = vld [vmem:[%s3604_s13 + $0x18] sm:$0xff]  }
 0x2ed   : > { %v1242_v28 = vadd.f32 %v2447_v23, %v1229_v24  ;;  %v1232_v30 = vadd.f32 %v1231_v26, %v1150_v19  ;;  %v2632_v31 = vpop.f32.mrb[11].mxu1  ;;  %v778_v19 = vpack.c.bf16 %v3453_v16, %v3451_v15  ;;  %v2889_v24 = vld [vmem:[%s3604_s13 + $0x10] sm:$0xff]   ;;  %v2891_v26 = vld [vmem:[%s3604_s13 + $0x20] sm:$0xff]  }
 0x2ee   : > { %v2894_v31 = vld [vmem:[%s3604_s13 + $0x38] sm:$0xff]  }
 0x2ef   : > { %v1243_v32 = vadd.f32 %v2447_v23, %v1232_v30  ;;  %v1244_v33 = vmax.f32 %v1242_v28, 0.0  ;;  %v2888_v23 = vld [vmem:[%s3604_s13 + $0x8] sm:$0xff]   ;;  %v2893_v30 = vld [vmem:[%s3604_s13 + $0x30] sm:$0xff]  }
 0x2f0   : > { %v2892_v28 = vld [vmem:[%s3604_s13 + $0x28] sm:$0xff]  }
 0x2f1   : > { %v1245_v34 = vmax.f32 %v1243_v32, 0.0  ;;  %v2895_v32 = vld [vmem:[%s3609_s18] sm:$0xff]  }
 0x2f3   : > { %v1278_v36 = vpack.c.bf16 %v1245_v34, %v1244_v33  ;;  %v2896_v33 = vld [vmem:[%s3609_s18 + $0x8] sm:$0xff]   ;;  %v2897_v34 = vld [vmem:[%s3609_s18 + $0x10] sm:$0xff]  }
 0x2f5   : > { %2463 = vmatmul.mubr.msk.bf16.vlgmr.msra.gmra.mrb[4].mxu0 %vm1379_vm4, %v1278_v36  ;;  %2644 = vmatmul.mubr.msk.bf16.vlgmr.msra.gmra.mrb[12].mxu1 %vm1379_vm4, %v1278_v36 }
 0x2f6   : > { %1602 = vmatpush1.bf16.msra.mxu0 %v2830_v35  ;;  %1633 = vmatprep.mubr.bf16.mxu0 %v2939_v0  ;;  %v1753_v35 = vrot.slane %v3140_v37, %v3179_v47 }
 0x2f7   : > { %1603 = vmatprep.subr.bf16.mxu0 %v2835_v38  ;;  %2648 = vmatpush3.bf16.msra.mxu1 %v2879_v39 }
 0x2f8   : > { %2649 = vmatprep.subr.bf16.mxu1 %v2940_v3  ;;  %2663 = vmatprep.mubr.msk.bf16.mxu1 %vm2943_vm0, %v2940_v3  ;;  %v2731_v38 = vadd.f32 %v3194_v10, %v1753_v35 }
 0x2fa   : > { %1604 = vmatpush1.bf16.msra.mxu0 %v2833_v40 }
 0x2fb   : > { %1605 = vmatprep.subr.bf16.mxu0 %v2838_v41  ;;  %2650 = vmatpush3.bf16.msra.mxu1 %v2880_v42 }
 0x2fc   : > { %2651 = vmatprep.subr.bf16.mxu1 %v2940_v3 }
 0x2fe   : > { %1606 = vmatpush1.bf16.msra.mxu0 %v2836_v43  ;;  %v2737_v43 = vadd.f32 %v3200_v18, %v1753_v35 }
 0x2ff   : > { %1607 = vmatprep.subr.bf16.mxu0 %v2841_v44  ;;  %2652 = vmatpush3.bf16.msra.mxu1 %v2881_v45 }
 0x300   : > { %2653 = vmatprep.subr.bf16.mxu1 %v2940_v3 }
 0x302   : > { %1608 = vmatpush1.bf16.msra.mxu0 %v2839_v46 }
 0x303   : > { %1609 = vmatprep.subr.bf16.mxu0 %v2844_v48  ;;  %2654 = vmatpush3.bf16.msra.mxu1 %v2882_v49 }
 0x304   : > { %2655 = vmatprep.subr.bf16.mxu1 %v2940_v3 }
 0x306   : > { %1610 = vmatpush1.bf16.msra.mxu0 %v2842_v50 }
 0x307   : > { %1611 = vmatprep.subr.bf16.mxu0 %v2847_v51  ;;  %2656 = vmatpush3.bf16.msra.mxu1 %v2883_v52 }
 0x308   : > { %2657 = vmatprep.subr.bf16.mxu1 %v2940_v3 }
 0x30a   : > { %1612 = vmatpush1.bf16.msra.mxu0 %v2845_v53 }
 0x30b   : > { %1613 = vmatprep.subr.bf16.mxu0 %v2850_v54  ;;  %2658 = vmatpush3.bf16.msra.mxu1 %v2884_v55  ;;  %v2899_v54 = vld [vmem:[%s3609_s18 + $0x20] sm:$0xff]   ;;  %v2900_v55 = vld [vmem:[%s3609_s18 + $0x28] sm:$0xff]  }
 0x30c   : > { %2659 = vmatprep.subr.bf16.mxu1 %v2940_v3 }
 0x30e   : > { %1614 = vmatpush1.bf16.msra.mxu0 %v2848_v56  ;;  %v2901_v56 = vld [vmem:[%s3609_s18 + $0x30] sm:$0xff]  }
 0x30f   : > { %1615 = vmatprep.subr.bf16.mxu0 %v2853_v57  ;;  %2660 = vmatpush3.bf16.msra.mxu1 %v2885_v58  ;;  %v2902_v57 = vld [vmem:[%s3609_s18 + $0x38] sm:$0xff]   ;;  %v2903_v58 = vld [vmem:[%s3611_s20] sm:$0xff]  }
 0x310   : > { %2661 = vmatprep.subr.bf16.mxu1 %v2940_v3 }
 0x312   : > { %1616 = vmatpush1.bf16.msra.mxu0 %v2851_v59  ;;  %v2904_v59 = vld [vmem:[%s3611_s20 + $0x8] sm:$0xff]  }
 0x313   : > { %1863 = vmatprep.subr.bf16.mxu0 %v2856_v60  ;;  %2662 = vmatpush3.bf16.msra.mxu1 %v2886_v20  ;;  %v2905_v60 = vld [vmem:[%s3611_s20 + $0x10] sm:$0xff]  }
 0x314   : > { %2667 = vmatprep.subr.bf16.mxu1 %v2940_v3 }
 0x315   : > { %1634 = vmatmul.mubr.bf16.vlgmr.msra.gmra.mrb[4].mxu0 %v2857_v61 }
 0x316   : > { %1864 = vmatpush1.bf16.msra.mxu0 %v2854_v62  ;;  %1895 = vmatprep.mubr.bf16.mxu0 %v2939_v0  ;;  %v2864_v0 = vld [vmem:[%s3603_s12 + $0x30] ss:$8 sps:$4 sm:$0xff]   ;;  %v2907_v62 = vld [vmem:[%s3611_s20 + $0x20] sm:$0xff]  }
 0x317   : > { %1865 = vmatprep.subr.bf16.mxu0 %v2860_v63  ;;  %2664 = vmatmul.mubr.bf16.vlgmr.msra.gmra.mrb[12].mxu1 %v2857_v61  ;;  %v2906_v61 = vld [vmem:[%s3611_s20 + $0x18] sm:$0xff]   ;;  %v2908_v63 = vld [vmem:[%s3611_s20 + $0x28] sm:$0xff]  }
 0x318   : > { %2683 = vmatprep.mubr.msk.bf16.mxu1 %vm2943_vm0, %v2940_v3  ;;  %2668 = vmatpush3.bf16.msra.mxu1 %v2887_v21 }
 0x319   : > { %2669 = vmatprep.subr.bf16.mxu1 %v2940_v3 }
 0x31a   : > { %1866 = vmatpush1.bf16.msra.mxu0 %v2858_v1 }
 0x31b   : > { %1867 = vmatprep.subr.bf16.mxu0 %v2863_v2 }
 0x31c   : > { %2670 = vmatpush3.bf16.msra.mxu1 %v2888_v23 }
 0x31d   : > { %2671 = vmatprep.subr.bf16.mxu1 %v2940_v3 }
 0x31e   : > { %1868 = vmatpush1.bf16.msra.mxu0 %v2861_v4 }
 0x31f   : > { %1869 = vmatprep.subr.bf16.mxu0 %v2866_v5 }
 0x320   : > { %2672 = vmatpush3.bf16.msra.mxu1 %v2889_v24 }
 0x321   : > { %2673 = vmatprep.subr.bf16.mxu1 %v2940_v3 }
 0x322   : > { %1870 = vmatpush1.bf16.msra.mxu0 %v2864_v0 }
 0x323   : > { %1871 = vmatprep.subr.bf16.mxu0 %v2869_v6 }
 0x324   : > { %2674 = vmatpush3.bf16.msra.mxu1 %v2890_v25 }
 0x325   : > { %2675 = vmatprep.subr.bf16.mxu1 %v2940_v3 }
 0x326   : > { %1872 = vmatpush1.bf16.msra.mxu0 %v2867_v7 }
 0x327   : > { %1873 = vmatprep.subr.bf16.mxu0 %v2872_v8 }
 0x328   : > { %2676 = vmatpush3.bf16.msra.mxu1 %v2891_v26 }
 0x329   : > { %2677 = vmatprep.subr.bf16.mxu1 %v2940_v3 }
 0x32a   : > { %1874 = vmatpush1.bf16.msra.mxu0 %v2870_v9 }
 0x32b   : > { %1875 = vmatprep.subr.bf16.mxu0 %v2875_v11 }
 0x32c   : > { %2678 = vmatpush3.bf16.msra.mxu1 %v2892_v28 }
 0x32d   : > { %2679 = vmatprep.subr.bf16.mxu1 %v2940_v3 }
 0x32e   : > { %1876 = vmatpush1.bf16.msra.mxu0 %v2873_v12 }
 0x32f   : > { %1877 = vmatprep.subr.bf16.mxu0 %v2878_v13 }
 0x330   : > { %2680 = vmatpush3.bf16.msra.mxu1 %v2893_v30 }
 0x331   : > { %2681 = vmatprep.subr.bf16.mxu1 %v2940_v3 }
 0x332   : > { %1878 = vmatpush1.bf16.msra.mxu0 %v2876_v14 }
 0x333   : > { %2687 = vmatprep.subr.bf16.mxu0 %v2940_v3 }
 0x334   : > { %2682 = vmatpush3.bf16.msra.mxu1 %v2894_v31 }
 0x335   : > { %1896 = vmatmul.mubr.bf16.vlgmr.msra.gmra.mrb[4].mxu0 %v778_v19  ;;  %2707 = vmatprep.subr.bf16.mxu1 %v2940_v3 }
 0x336   : > { %2703 = vmatprep.mubr.msk.bf16.mxu0 %vm2943_vm0, %v2940_v3  ;;  %2688 = vmatpush3.bf16.msra.mxu0 %v2895_v32  ;;  %v2909_v32 = vld [vmem:[%s3611_s20 + $0x30] sm:$0xff]  }
 0x337   : > { %2689 = vmatprep.subr.bf16.mxu0 %v2940_v3 }
 0x33a   : > { %2690 = vmatpush3.bf16.msra.mxu0 %v2896_v33 }
 0x33b   : > { %2691 = vmatprep.subr.bf16.mxu0 %v2940_v3 }
 0x33e   : > { %2692 = vmatpush3.bf16.msra.mxu0 %v2897_v34 }
 0x33f   : > { %2693 = vmatprep.subr.bf16.mxu0 %v2940_v3 }
 0x408   : > { %v1897_v36 = vpop.f32.mrb[4].mxu0 }
 0x409   : > { %v2729_v39 = vadd.f32 %v3198_v17, %v1897_v36  ;;  %v1899_v40 = vpop.f32.mrb[5].mxu0 }
 0x40a   : > { %v2732_v41 = vadd.f32 %v2731_v38, %v1899_v40  ;;  %v1901_v42 = vpop.f32.mrb[6].mxu0 }
 0x40b   : > { %v2735_v44 = vadd.f32 %v3204_v22, %v1901_v42  ;;  %v1903_v45 = vpop.f32.mrb[7].mxu0  ;;  %v2898_v22 = vld [vmem:[%s3609_s18 + $0x18] sm:$0xff]   ;;  %v2507_v1 = vmul.f32 -1.442695, %v2729_v39 }
 0x40c   : > { %v2509_v46 = vmul.f32 -1.442695, %v2732_v41  ;;  %v2738_v48 = vadd.f32 %v2737_v43, %v1903_v45  ;;  %2694 = vmatpush3.bf16.msra.mxu0 %v2898_v22  ;;  %v2528_v43 = vld [vmem:[%s3612_s21] ss:$0 sm:$0xff] }
 0x40d   : > { %2695 = vmatprep.subr.bf16.mxu0 %v2940_v3  ;;  %v2508_v2 = vmul.f32 -1.442695, %v2735_v44 }
 0x40e   : > { %2911 = vpow2.f32 %v2509_v46  ;;  %v2510_v49 = vmul.f32 -1.442695, %v2738_v48 }
 0x410   : > { %2913 = vpow2.f32 %v2510_v49  ;;  %2696 = vmatpush3.bf16.msra.mxu0 %v2899_v54 }
 0x411   : > { %2697 = vmatprep.subr.bf16.mxu0 %v2940_v3 }
 0x414   : > { %2698 = vmatpush3.bf16.msra.mxu0 %v2900_v55 }
 0x415   : > { %2699 = vmatprep.subr.bf16.mxu0 %v2940_v3 }
 0x418   : > { %v2912_v50 = vpop.eup %2911  ;;  %2700 = vmatpush3.bf16.msra.mxu0 %v2901_v56 }
 0x419   : > { %v1928_v37 = vadd.f32 1.0, %v2912_v50  ;;  %2701 = vmatprep.subr.bf16.mxu0 %v2940_v3 }
 0x41a   : > { %v2914_v47 = vpop.eup %2913 }
 0x41b   : > { %2915 = vrcp.f32 %v1928_v37  ;;  %v1929_v10 = vadd.f32 1.0, %v2914_v47 }
 0x41c   : > { %2702 = vmatpush3.bf16.msra.mxu0 %v2902_v57 }
 0x41d   : > { %2917 = vrcp.f32 %v1929_v10 }
 0x41e   : > { %2919 = vpow2.f32 %v2507_v1 }
 0x41f   : > { %2921 = vpow2.f32 %v2508_v2 }
 0x425   : > { %v2916_v17 = vpop.eup %2915 }
 0x426   : > { %v1934_v52 = vmul.f32 %v2916_v17, %v3451_v15 }
 0x427   : > { %v2918_v51 = vpop.eup %2917 }
 0x428   : > { %v1935_v18 = vmul.f32 %v2918_v51, %v3453_v16  ;;  %v2920_v4 = vpop.eup %2919 }
 0x429   : > { %v2922_v5 = vpop.eup %2921  ;;  %v1914_v0 = vadd.f32 1.0, %v2920_v4 }
 0x42a   : > { %v1936_v53 = vpack.c.bf16 %v1935_v18, %v1934_v52  ;;  %v1915_v6 = vadd.f32 1.0, %v2922_v5 }
 0x42b   : > { %2923 = vrcp.f32 %v1914_v0 }
 0x42c   : > { %2684 = vmatmul.mubr.bf16.vlgmr.msra.gmra.mrb[12].mxu1 %v1936_v53  ;;  %2925 = vrcp.f32 %v1915_v6 }
 0x42d   : > { %2723 = vmatprep.mubr.msk.bf16.mxu1 %vm2943_vm0, %v2940_v3  ;;  %2708 = vmatpush3.bf16.msra.mxu1 %v2903_v58 }
 0x42e   : > { %2709 = vmatprep.subr.bf16.mxu1 %v2940_v3 }
 0x431   : > { %2710 = vmatpush3.bf16.msra.mxu1 %v2904_v59 }
 0x432   : > { %2711 = vmatprep.subr.bf16.mxu1 %v2940_v3 }
 0x435   : > { %2712 = vmatpush3.bf16.msra.mxu1 %v2905_v60  ;;  %v2924_v14 = vpop.eup %2923 }
 0x436   : > { %2713 = vmatprep.subr.bf16.mxu1 %v2940_v3  ;;  %v2926_v19 = vpop.eup %2925  ;;  %v2044_v20 = vsub.f32 1.0, %v2924_v14 }
 0x437   : > { %v2045_v21 = vsub.f32 1.0, %v2926_v19 }
 0x438   : > { %v2046_v24 = vmul.f32 %v2044_v20, %v3451_v15  ;;  %v2910_v15 = vld [vmem:[%s3611_s20 + $0x38] sm:$0xff]  }
 0x439   : > { %2714 = vmatpush3.bf16.msra.mxu1 %v2906_v61 }
 0x43a   : > { %2715 = vmatprep.subr.bf16.mxu1 %v2940_v3 }
 0x43d   : > { %2716 = vmatpush3.bf16.msra.mxu1 %v2907_v62 }
 0x43e   : > { %2717 = vmatprep.subr.bf16.mxu1 %v2940_v3 }
 0x441   : > { %2718 = vmatpush3.bf16.msra.mxu1 %v2908_v63 }
 0x442   : > { %2719 = vmatprep.subr.bf16.mxu1 %v2940_v3 }
 0x445   : > { %2720 = vmatpush3.bf16.msra.mxu1 %v2909_v32 }
 0x446   : > { %2721 = vmatprep.subr.bf16.mxu1 %v2940_v3 }
 0x449   : > { %2722 = vmatpush3.bf16.msra.mxu1 %v2910_v15 }
 0x4ff   : > { %v2035_v7 = vpop.f32.mrb[12].mxu1 }
 0x500   : > { %v2741_v8 = vadd.f32 %v3209_v27, %v2035_v7  ;;  %v2685_v9 = vpop.f32.mrb[13].mxu1  ;;  %v2047_v27 = vmul.f32 %v2045_v21, %v3453_v16  ;;  %v2519_v16 = vld [vmem:[%s3610_s19] ss:$0 sm:$0xff] }
 0x501   : > { %v2038_v11 = vpop.f32.mrb[14].mxu1 }
 0x502   : > { %2927 = vtanh.f32 %v2741_v8  ;;  %v2744_v12 = vadd.f32 %v3214_v29, %v2038_v11  ;;  %v2686_v13 = vpop.f32.mrb[15].mxu1 }
 0x504   : > { %2929 = vtanh.f32 %v2744_v12 }
 0x50c   : > { %v2928_v23 = vpop.eup %2927 }
 0x50d   : > { %v2048_v25 = vmul.f32 %v2928_v23, %v2924_v14 }
 0x50e   : > { %v2930_v26 = vpop.eup %2929 }
 0x50f   : > { %v2049_v28 = vmul.f32 %v2930_v26, %v2926_v19  ;;  %v2050_v30 = vadd.f32 %v2048_v25, %v2046_v24 }
 0x511   : > { %v2051_v29 = vadd.f32 %v2049_v28, %v2047_v27  ;;  %2052 = vst [vmem:[%s767_s29] sm:$0xff] %v2050_v30 }
 0x513   : > { %2053 = vst [vmem:[%s767_s29 + $0x8] sm:$0xff] %v2051_v29  ;;  %v2054_v31 = vpack.c.bf16 %v2051_v29, %v2050_v30 }
 0x515   : > { %2704 = vmatmul.mubr.bf16.vlgmr.msra.gmra.mrb[8].mxu0 %v2054_v31 }
 0x5e8   : > { %v2160_v33 = vpop.f32.mrb[8].mxu0 }
 0x5e9   : > { %v2161_v34 = vadd.f32 %v2519_v16, %v2160_v33  ;;  %v2705_v35 = vpop.f32.mrb[9].mxu0 }
 0x5ea   : > { %v2163_v36 = vpop.f32.mrb[10].mxu0 }
 0x5eb   : > { %v2164_v38 = vadd.f32 %v2519_v16, %v2163_v36  ;;  %v2706_v39 = vpop.f32.mrb[11].mxu0  ;;  %v2167_v40 = vmax.f32 %v2161_v34, 0.0 }
 0x5ed   : > { %v2168_v41 = vmax.f32 %v2164_v38, 0.0 }
 0x5ef   : > { %v2169_v42 = vpack.c.bf16 %v2168_v41, %v2167_v40 }
 0x5f1   : > { %2724 = vmatmul.mubr.bf16.vlgmr.msra.gmra.mrb[16].mxu1 %v2169_v42 }
 0x6c4   : > { %v2275_v3 = vpop.f32.mrb[16].mxu1 }
 0x6c5   : > { %v2276_v44 = vadd.f32 %v2528_v43, %v2275_v3  ;;  %v2725_v45 = vpop.f32.mrb[17].mxu1 }
 0x6c6   : > { %v2278_v46 = vpop.f32.mrb[18].mxu1 }
 0x6c7   : > { %2282 = vst [vmem:[%s773_s28] sm:$0xff] %v2276_v44  ;;  %v2279_v48 = vadd.f32 %v2528_v43, %v2278_v46  ;;  %v2726_v49 = vpop.f32.mrb[19].mxu1 }
 0x6c9   : > { %2283 = vst [vmem:[%s773_s28 + $0x8] sm:$0xff] %v2279_v48 }
 0x6ca PF: > { %s34_s4 = sadd.s32 1, %s2937_s4  }
 0x6cb   : > { %p31_p4 = scmp.ge.s32.totalorder %s34_s4, 4  }
 0x6cd   :  { %33 = sbr.rel (!%p31_p4) target bundleno = 10 (0xa), region = 157 }

// kernel: _raft_forward.25
= control target key start
LH: loop header
LB: loop body
LE: loop exit
PB: predicated region body
PF: predicated region fallthrough
CT: control target
= control target key end

     0   :  { %s471_s12 = smov 0   ;;  %s510_s0 = inlined_call_operand.vmem [shape: f32[128,4], index: 0, kind: input, shape index: {}]   ;;  %s511_s1 = inlined_call_operand.vmem [shape: f32[4,32], index: 1, kind: input, shape index: {}]   ;;  %s512_s2 = inlined_call_operand.vmem [shape: f32[1,32], index: 2, kind: input, shape index: {}]   ;;  %s513_s3 = inlined_call_operand.vmem [shape: f32[128,32], index: 3, kind: output, shape index: {}]  }
   0x1 LB: > { %s389_s13 = sadd.s32 4294967295, %s449_s12   ;;  %p393_p0 = scmp.ge.s32.totalorder %s449_s12, 1  ;;  %s449_s12 = sphi %s471_s12, %s13_s12  }
   0x2   : > { %p138_p1 = scmp.lt.s32.totalorder %s449_s12, 3 }
   0x4   : > { %p139_p2 = pnand %p393_p0, %p138_p1 }
   0x5   : > { %v182_v0 = vld [vmem:[%s511_s1] sm:$0xf] (!%p139_p2)  ;;  %vm215_vm0 = vcmask (!%p139_p2), 1043456   ;;  %s394_s16 = sshll.u32 (!%p139_p2), %s389_s13, 3  ;;  %vm190_vm1 = vcmask (!%p139_p2), 31744   ;;  %vm324_vm2 = vcmask (!%p139_p2), 261120  }
   0x6   : > { %142 = sbr.rel (%p139_p2) target bundleno = 239 (0xef), region = 32  ;;  %419 = vmatprep.subr.msk.mxu0 (!%p139_p2), %vm215_vm0, %v182_v0  ;;  %433 = vmatprep.subr.msk.mxu1 (!%p139_p2), %vm215_vm0, %v182_v0  ;;  %p163_p3 = scmp.lt.s32.totalorder (!%p139_p2), %s394_s16, 15  ;;  %v398_v9 = vld [vmem:[%s512_s2] ss:$0 sm:$0xff] (!%p139_p2) }
   0x7   : > { %420 = vmatpush3.msk.msra.mxu0 (!%p139_p2), %vm215_vm0, %v182_v0  ;;  %434 = vmatpush3.msk.msra.mxu1 (!%p139_p2), %vm215_vm0, %v182_v0 }
   0xd   : > { %s515_s16 = smov (!%p163_p3, %s394_s16), 15 }
   0xe   : > { %s395_s17 = sshll.u32 %s515_s16, 3 }
   0xf   : > { %s166_s20 = scalar_lea.vmem %s510_s0, %s395_s17  ;;  %s172_s25 = scalar_lea.vmem %s513_s3, %s395_s17 }
  0x10   : > { %v174_v1 = vld [vmem:[%s166_s20] sm:$0xff]  ;;  %v175_v3 = vld [vmem:[%s166_s20 + $0x8] sm:$0xff]  ;;  %v176_v5 = vld [vmem:[%s166_s20 + $0x10] sm:$0xff] }
  0x11   : > { %v178_v2 = vld [vmem:[%s166_s20 + $0x20] sm:$0xff]  ;;  %421 = vmatprep.mubr.msk.f32.mxu0 %vm190_vm1, %v174_v1  ;;  %v179_v4 = vld [vmem:[%s166_s20 + $0x28] sm:$0xff]  ;;  %v180_v6 = vld [vmem:[%s166_s20 + $0x30] sm:$0xff] }
  0x12   : > { %427 = vmatprep.mubr.msk.f32.mxu1 %vm190_vm1, %v178_v2  ;;  %422 = vmatmul.mubr.msk.f32.vlgmr.msra.gmra.mrb[0].mxu0 %vm190_vm1, %v175_v3  ;;  %v177_v7 = vld [vmem:[%s166_s20 + $0x18] sm:$0xff] }
  0x13   : > { %428 = vmatmul.mubr.msk.f32.vlgmr.msra.gmra.mrb[0].mxu1 %vm190_vm1, %v179_v4  ;;  %424 = vmatprep.mubr.msk.f32.mxu0 %vm190_vm1, %v176_v5  ;;  %v181_v8 = vld [vmem:[%s166_s20 + $0x38] sm:$0xff] }
  0x14   : > { %430 = vmatprep.mubr.msk.f32.mxu1 %vm190_vm1, %v180_v6 }
  0x16   : > { %425 = vmatmul.mubr.msk.f32.gmra.mrb[2].mxu0 %vm190_vm1, %v177_v7 }
  0x17   : > { %431 = vmatmul.mubr.msk.f32.gmra.mrb[2].mxu1 %vm190_vm1, %v181_v8 }
  0xe5   : > { %v423_v10 = vpop.f32.mrb[0].mxu0 }
  0xe6   : > { %v429_v11 = vpop.f32.mrb[0].mxu1  ;;  %v291_v12 = vadd.f32 %v423_v10, %v398_v9  ;;  %v285_v14 = vpop.f32.mrb[1].mxu0 }
  0xe7   : > { %v311_v13 = vadd.f32 %v429_v11, %v398_v9  ;;  %v305_v15 = vpop.f32.mrb[1].mxu1  ;;  %v286_v16 = vadd.f32 %v398_v9, %v285_v14 }
  0xe8   : > { %v306_v17 = vadd.f32 %v398_v9, %v305_v15  ;;  %326 = vst.msk [vmem:[%s172_s25 + $0x8] sm:$0xff] %vm324_vm2, %v291_v12 }
  0xe9   : > { %330 = vst.msk [vmem:[%s172_s25 + $0x28] sm:$0xff] %vm324_vm2, %v311_v13  ;;  %325 = vst.msk [vmem:[%s172_s25] sm:$0xff] %vm324_vm2, %v286_v16  ;;  %v426_v18 = vpop.f32.mrb[2].mxu0 }
  0xea   : > { %329 = vst.msk [vmem:[%s172_s25 + $0x20] sm:$0xff] %vm324_vm2, %v306_v17  ;;  %v432_v19 = vpop.f32.mrb[2].mxu1  ;;  %v301_v20 = vadd.f32 %v426_v18, %v398_v9  ;;  %v295_v22 = vpop.f32.mrb[3].mxu0 }
  0xeb   : > { %v321_v21 = vadd.f32 %v432_v19, %v398_v9  ;;  %v315_v23 = vpop.f32.mrb[3].mxu1  ;;  %v296_v24 = vadd.f32 %v398_v9, %v295_v22 }
  0xec   : > { %v316_v25 = vadd.f32 %v398_v9, %v315_v23  ;;  %328 = vst.msk [vmem:[%s172_s25 + $0x18] sm:$0xff] %vm324_vm2, %v301_v20 }
  0xed   : > { %332 = vst.msk [vmem:[%s172_s25 + $0x38] sm:$0xff] %vm324_vm2, %v321_v21  ;;  %327 = vst.msk [vmem:[%s172_s25 + $0x10] sm:$0xff] %vm324_vm2, %v296_v24 }
  0xee   : > { %331 = vst.msk [vmem:[%s172_s25 + $0x30] sm:$0xff] %vm324_vm2, %v316_v25 }
  0xef PF: > { %s13_s12 = sadd.s32 1, %s449_s12  }
  0xf0   : > { %p10_p4 = scmp.ge.s32.totalorder %s13_s12, 4  }
  0xf2   :  { %12 = sbr.rel (!%p10_p4) target bundleno = 1 (0x1), region = 62 }

</bundles_post_ra>
